<compile_context>
chip_gen: v7x
topology: tpu7x:2x2x1
jax: 0.10.0
libtpu: 0.0.40
codegen_flags: <defaults>
</compile_context>

<pallas_src>
import functools

import jax
import jax.numpy as jnp
from jax.experimental import pallas as pl
from jax.experimental.pallas import tpu as pltpu


# ----------------------------- Pallas kernels -----------------------------

def _conv_kernel(x_ref, w_ref, o_ref, *, KH, KW, dh, dw, OH1, OW1):
    """Direct convolution for one batch element.

    x_ref: (Hp, Wp, Cin)       bf16 padded NHWC image (read once, stays in VMEM)
    w_ref: (KH*KW, Cin, Cout)  bf16 weights (block-diagonal over groups), resident
    o_ref: (OH1*OW1, Cout)     f32 dense (stride-1) output
    """
    cin = x_ref.shape[-1]
    cout = o_ref.shape[-1]
    acc = jnp.zeros((OH1 * OW1, cout), jnp.float32)
    for kh in range(KH):            # static unroll: all slice starts are static
        for kw in range(KW):
            win = x_ref[kh * dh:kh * dh + OH1, kw * dw:kw * dw + OW1, :]
            a = win.reshape(OH1 * OW1, cin)
            acc = acc + jnp.dot(a, w_ref[kh * KW + kw],
                                preferred_element_type=jnp.float32)
    o_ref[...] = acc


def _gn_selu_kernel(x_ref, g_ref, b_ref, o_ref, *, G, eps):
    """GroupNorm(G) + SELU for one batch element.

    x_ref: (OH*OW, C) f32   (conv output, channels on lanes)
    g_ref, b_ref: (1, C) f32 affine params
    o_ref: (C, OH*OW) f32   (NCHW-flat, lane-dense output)
    """
    x = x_ref[...]
    OHW, C = x.shape
    Cpg = C // G
    cnt = float(OHW * Cpg)

    s1 = jnp.sum(x, axis=0, keepdims=True)                       # (1, C)
    if Cpg == 1:
        mean_c = s1 / cnt
    else:
        # same-group membership matrix, built in-kernel (no HBM traffic)
        ci = jax.lax.broadcasted_iota(jnp.int32, (C, C), 0) // Cpg
        cj = jax.lax.broadcasted_iota(jnp.int32, (C, C), 1) // Cpg
        P = (ci == cj).astype(jnp.float32)                       # (C, C)
        mean_c = jnp.dot(s1, P, preferred_element_type=jnp.float32) / cnt

    d = x - mean_c
    s2 = jnp.sum(d * d, axis=0, keepdims=True)                   # (1, C)
    if Cpg == 1:
        var_c = s2 / cnt
    else:
        var_c = jnp.dot(s2, P, preferred_element_type=jnp.float32) / cnt
    inv_c = jax.lax.rsqrt(var_c + eps)                           # biased var, like PyTorch

    y = d * inv_c * g_ref[...] + b_ref[...]
    alpha = 1.6732632423543772848170429916717
    scale = 1.0507009873554804934193349852946
    y = scale * jnp.where(y > 0.0, y, alpha * (jnp.exp(y) - 1.0))
    o_ref[...] = y.T.astype(o_ref.dtype)                         # -> (C, OHW)


# ------------------------------ Op wrappers --------------------------------

def conv2d_pallas(x, w, stride, padding, dilation, groups):
    """x: (N, Cin, H, W) f32, w: (Cout, Cin//groups, KH, KW) f32 -> NHWC (N, OH, OW, Cout)."""
    N, Cin, H, W = x.shape
    Cout, Cin_g, KH, KW = w.shape
    sh, sw = stride
    ph, pw = padding
    dh, dw = dilation
    OH = (H + 2 * ph - dh * (KH - 1) - 1) // sh + 1
    OW = (W + 2 * pw - dw * (KW - 1) - 1) // sw + 1
    OH1 = H + 2 * ph - dh * (KH - 1)     # dense (stride-1) output extent
    OW1 = W + 2 * pw - dw * (KW - 1)
    Hp, Wp = H + 2 * ph, W + 2 * pw

    # NCHW -> NHWC (channels on lanes), pad spatially, bf16 operands for the MXU.
    x_nhwc = jnp.transpose(x, (0, 2, 3, 1))
    x_pad = jnp.pad(x_nhwc, ((0, 0), (ph, ph), (pw, pw), (0, 0))).astype(jnp.bfloat16)

    # Weights -> (KH*KW, Cin, Cout); groups folded via a block-diagonal matrix so one
    # kernel launch produces the full-Cout output (no per-group loop / concat).
    wt = jnp.transpose(w, (2, 3, 1, 0)).reshape(KH * KW, Cin_g, Cout)
    if groups == 1:
        w_bd = wt
    else:
        # TODO(synk): block-diagonal folding wastes MACs for very large `groups`
        # (e.g. depthwise); a dedicated grouped kernel would be better there.
        Cout_g = Cout // groups
        w_bd = jnp.zeros((KH * KW, Cin, Cout), dtype=w.dtype)
        for g in range(groups):
            w_bd = w_bd.at[:, g * Cin_g:(g + 1) * Cin_g,
                           g * Cout_g:(g + 1) * Cout_g].set(
                wt[:, :, g * Cout_g:(g + 1) * Cout_g])
    w_bd = w_bd.astype(jnp.bfloat16)

    out = pl.pallas_call(
        functools.partial(_conv_kernel, KH=KH, KW=KW, dh=dh, dw=dw,
                          OH1=OH1, OW1=OW1),
        out_shape=jax.ShapeDtypeStruct((N, OH1 * OW1, Cout), jnp.float32),
        grid_spec=pltpu.PrefetchScalarGridSpec(
            num_scalar_prefetch=0,
            grid=(N,),
            in_specs=[pl.BlockSpec((None, Hp, Wp, Cin), lambda n: (n, 0, 0, 0)),
                      pl.BlockSpec((KH * KW, Cin, Cout), lambda n: (0, 0, 0))],
            out_specs=pl.BlockSpec((None, OH1 * OW1, Cout), lambda n: (n, 0, 0)),
        ),
        compiler_params=pltpu.CompilerParams(
            dimension_semantics=("parallel",)),
    )(x_pad, w_bd)

    out = out.reshape(N, OH1, OW1, Cout)
    if sh != 1 or sw != 1:
        # TODO(synk): strided conv computes the dense stride-1 result and subsamples;
        # correct, but does sh*sw extra MXU work.
        out = out[:, ::sh, ::sw, :]
    return out


def gn_selu_pallas(y, gamma, beta, num_groups, eps=1e-5):
    """y: (N, OH*OW, C) f32 -> GroupNorm(num_groups)+SELU, returned as (N, C, OH*OW)."""
    N, OHW, C = y.shape
    g2 = gamma.reshape(1, C).astype(jnp.float32)
    b2 = beta.reshape(1, C).astype(jnp.float32)
    return pl.pallas_call(
        functools.partial(_gn_selu_kernel, G=num_groups, eps=eps),
        out_shape=jax.ShapeDtypeStruct((N, C, OHW), jnp.float32),
        grid_spec=pltpu.PrefetchScalarGridSpec(
            num_scalar_prefetch=0,
            grid=(N,),
            in_specs=[pl.BlockSpec((None, OHW, C), lambda n: (n, 0, 0)),
                      pl.BlockSpec((1, C), lambda n: (0, 0)),
                      pl.BlockSpec((1, C), lambda n: (0, 0))],
            out_specs=pl.BlockSpec((None, C, OHW), lambda n: (n, 0, 0)),
        ),
        compiler_params=pltpu.CompilerParams(
            dimension_semantics=("parallel",)),
    )(y, g2, b2)


# ------------------------------ Conv module --------------------------------

class ConvPallas:
    """Pallas equivalent of the PyTorch `Conv` module (bias=False path)."""

    def __init__(self, nIn, nOut, kSize, stride, padding,
                 dilation=(1, 1), groups=1, bn_acti=False, *, key):
        to2 = lambda v: (v, v) if isinstance(v, int) else tuple(v)
        self.kSize = to2(kSize)
        self.stride = to2(stride)
        self.padding = to2(padding)
        self.dilation = to2(dilation)
        self.groups = groups
        self.bn_acti = bn_acti
        self.nOut = nOut

        kw_, kg, kb = jax.random.split(key, 3)
        kh, kw = self.kSize
        # deterministic synthetic init (PyTorch shape: (Cout, Cin//groups, KH, KW))
        self.weight = 0.1 * jax.random.normal(
            kw_, (nOut, nIn // groups, kh, kw), dtype=jnp.float32)
        if bn_acti:
            self.num_groups = 32 if nOut >= 32 else nOut
            self.gamma = 1.0 + 0.1 * jax.random.normal(kg, (nOut,), dtype=jnp.float32)
            self.beta = 0.1 * jax.random.normal(kb, (nOut,), dtype=jnp.float32)

    def __call__(self, x):
        out = conv2d_pallas(x, self.weight, self.stride, self.padding,
                            self.dilation, self.groups)          # (N, OH, OW, C)
        N, OH, OW, C = out.shape
        if self.bn_acti:
            out = gn_selu_pallas(out.reshape(N, OH * OW, C),
                                 self.gamma, self.beta, self.num_groups)
            return out.reshape(N, C, OH, OW)                     # NCHW, no XLA transpose
        return jnp.transpose(out, (0, 3, 1, 2))                  # NCHW


# ------------------------------ Reference -----------------------------------

def _reference(x, mod: ConvPallas):
    out = jax.lax.conv_general_dilated(
        x.astype(jnp.float32), mod.weight,
        window_strides=mod.stride,
        padding=[(mod.padding[0], mod.padding[0]), (mod.padding[1], mod.padding[1])],
        rhs_dilation=mod.dilation,
        dimension_numbers=("NCHW", "OIHW", "NCHW"),
        feature_group_count=mod.groups,
        precision=jax.lax.Precision.HIGHEST,
    )
    if mod.bn_acti:
        N, C, H, W = out.shape
        G = mod.num_groups
        xr = out.reshape(N, G, -1)
        mean = xr.mean(-1, keepdims=True)
        var = ((xr - mean) ** 2).mean(-1, keepdims=True)
        xn = ((xr - mean) / jnp.sqrt(var + 1e-5)).reshape(N, C, H, W)
        y = xn * mod.gamma.reshape(1, C, 1, 1) + mod.beta.reshape(1, C, 1, 1)
        alpha = 1.6732632423543772848170429916717
        scale = 1.0507009873554804934193349852946
        out = scale * jnp.where(y > 0, y, alpha * (jnp.exp(y) - 1.0))
    return out


# --------------------------------- main --------------------------------------

if __name__ == "__main__":
    key = jax.random.PRNGKey(0)
    k_x, k_p = jax.random.split(key)

    # Conv(nIn=4, nOut=8, kSize=3, stride=1, padding=1, bn_acti=True, bias=False)
    x = jax.random.normal(k_x, (2, 4, 16, 16), dtype=jnp.float32)
    mod = ConvPallas(nIn=4, nOut=8, kSize=3, stride=1, padding=1,
                     dilation=(1, 1), groups=1, bn_acti=True, key=k_p)

    fwd = jax.jit(mod.__call__)
    out = jax.block_until_ready(fwd(x))

    ref = jax.block_until_ready(_reference(x, mod))
    assert out.shape == ref.shape == (2, 8, 16, 16)
    # bf16 matmul operands (f32 accumulation) vs a full-f32 HIGHEST reference.
    err = float(jnp.max(jnp.abs(out - ref)))
    assert err < 2e-2, f"mismatch vs reference: {err}"

    print("KERNEL_OK")
</pallas_src>

<mosaic_0001>
module attributes {stable_mosaic.version = 11 : i64} {
  func.func @_conv_kernel(%arg0: i32, %arg1: memref<1x18x18x4xbf16, #tpu.memory_space<vmem>>, %arg2: memref<9x4x8xbf16, #tpu.memory_space<vmem>>, %arg3: memref<1x256x8xf32, #tpu.memory_space<vmem>>) attributes {dimension_semantics = [#tpu.dimension_semantics<parallel>], iteration_bounds = array<i64: 2>, scalar_prefetch = 0 : i64, scratch_operands = 0 : i64, tpu.core_type = #tpu.core_type<tc>, window_params = [{transform_indices = @transform_0, window_bounds = array<i64: 1, 18, 18, 4>}, {pipeline_mode = #tpu.pipeline_mode<synchronous>, transform_indices = @transform_1, window_bounds = array<i64: 9, 4, 8>}, {transform_indices = @transform_2, window_bounds = array<i64: 1, 256, 8>}]} {
    %cst = arith.constant 0.000000e+00 : f32
    %0 = vector.broadcast %cst : f32 to vector<256x8xf32>
    %c0 = arith.constant 0 : index
    %c0_0 = arith.constant 0 : index
    %c0_1 = arith.constant 0 : index
    %c0_2 = arith.constant 0 : index
    %1 = vector.load %arg1[%c0, %c0_0, %c0_1, %c0_2] : memref<1x18x18x4xbf16, #tpu.memory_space<vmem>>, vector<1x16x16x4xbf16>
    %2 = vector.shape_cast %1 : vector<1x16x16x4xbf16> to vector<16x16x4xbf16>
    %3 = vector.shape_cast %2 : vector<16x16x4xbf16> to vector<256x4xbf16>
    %c0_3 = arith.constant 0 : index
    %c0_4 = arith.constant 0 : index
    %c0_5 = arith.constant 0 : index
    %4 = vector.load %arg2[%c0_3, %c0_4, %c0_5] : memref<9x4x8xbf16, #tpu.memory_space<vmem>>, vector<1x4x8xbf16>
    %5 = vector.shape_cast %4 : vector<1x4x8xbf16> to vector<4x8xbf16>
    %cst_6 = arith.constant dense<0.000000e+00> : vector<256x8xf32>
    %6 = tpu.matmul %3, %5, %cst_6 {dimension_numbers = #tpu.dot_dimension_numbers<[1], [0], [0], [1], [0, 0, 1, 1], [], []>} : vector<256x4xbf16>, vector<4x8xbf16>, vector<256x8xf32> -> vector<256x8xf32>
    %7 = arith.addf %0, %6 : vector<256x8xf32>
    %c0_7 = arith.constant 0 : index
    %c0_8 = arith.constant 0 : index
    %c1 = arith.constant 1 : index
    %c0_9 = arith.constant 0 : index
    %8 = vector.load %arg1[%c0_7, %c0_8, %c1, %c0_9] : memref<1x18x18x4xbf16, #tpu.memory_space<vmem>>, vector<1x16x16x4xbf16>
    %9 = vector.shape_cast %8 : vector<1x16x16x4xbf16> to vector<16x16x4xbf16>
    %10 = vector.shape_cast %9 : vector<16x16x4xbf16> to vector<256x4xbf16>
    %c1_10 = arith.constant 1 : index
    %c0_11 = arith.constant 0 : index
    %c0_12 = arith.constant 0 : index
    %11 = vector.load %arg2[%c1_10, %c0_11, %c0_12] : memref<9x4x8xbf16, #tpu.memory_space<vmem>>, vector<1x4x8xbf16>
    %12 = vector.shape_cast %11 : vector<1x4x8xbf16> to vector<4x8xbf16>
    %cst_13 = arith.constant dense<0.000000e+00> : vector<256x8xf32>
    %13 = tpu.matmul %10, %12, %cst_13 {dimension_numbers = #tpu.dot_dimension_numbers<[1], [0], [0], [1], [0, 0, 1, 1], [], []>} : vector<256x4xbf16>, vector<4x8xbf16>, vector<256x8xf32> -> vector<256x8xf32>
    %14 = arith.addf %7, %13 : vector<256x8xf32>
    %c0_14 = arith.constant 0 : index
    %c0_15 = arith.constant 0 : index
    %c2 = arith.constant 2 : index
    %c0_16 = arith.constant 0 : index
    %15 = vector.load %arg1[%c0_14, %c0_15, %c2, %c0_16] : memref<1x18x18x4xbf16, #tpu.memory_space<vmem>>, vector<1x16x16x4xbf16>
    %16 = vector.shape_cast %15 : vector<1x16x16x4xbf16> to vector<16x16x4xbf16>
    %17 = vector.shape_cast %16 : vector<16x16x4xbf16> to vector<256x4xbf16>
    %c2_17 = arith.constant 2 : index
    %c0_18 = arith.constant 0 : index
    %c0_19 = arith.constant 0 : index
    %18 = vector.load %arg2[%c2_17, %c0_18, %c0_19] : memref<9x4x8xbf16, #tpu.memory_space<vmem>>, vector<1x4x8xbf16>
    %19 = vector.shape_cast %18 : vector<1x4x8xbf16> to vector<4x8xbf16>
    %cst_20 = arith.constant dense<0.000000e+00> : vector<256x8xf32>
    %20 = tpu.matmul %17, %19, %cst_20 {dimension_numbers = #tpu.dot_dimension_numbers<[1], [0], [0], [1], [0, 0, 1, 1], [], []>} : vector<256x4xbf16>, vector<4x8xbf16>, vector<256x8xf32> -> vector<256x8xf32>
    %21 = arith.addf %14, %20 : vector<256x8xf32>
    %c0_21 = arith.constant 0 : index
    %c1_22 = arith.constant 1 : index
    %c0_23 = arith.constant 0 : index
    %c0_24 = arith.constant 0 : index
    %22 = vector.load %arg1[%c0_21, %c1_22, %c0_23, %c0_24] : memref<1x18x18x4xbf16, #tpu.memory_space<vmem>>, vector<1x16x16x4xbf16>
    %23 = vector.shape_cast %22 : vector<1x16x16x4xbf16> to vector<16x16x4xbf16>
    %24 = vector.shape_cast %23 : vector<16x16x4xbf16> to vector<256x4xbf16>
    %c3 = arith.constant 3 : index
    %c0_25 = arith.constant 0 : index
    %c0_26 = arith.constant 0 : index
    %25 = vector.load %arg2[%c3, %c0_25, %c0_26] : memref<9x4x8xbf16, #tpu.memory_space<vmem>>, vector<1x4x8xbf16>
    %26 = vector.shape_cast %25 : vector<1x4x8xbf16> to vector<4x8xbf16>
    %cst_27 = arith.constant dense<0.000000e+00> : vector<256x8xf32>
    %27 = tpu.matmul %24, %26, %cst_27 {dimension_numbers = #tpu.dot_dimension_numbers<[1], [0], [0], [1], [0, 0, 1, 1], [], []>} : vector<256x4xbf16>, vector<4x8xbf16>, vector<256x8xf32> -> vector<256x8xf32>
    %28 = arith.addf %21, %27 : vector<256x8xf32>
    %c0_28 = arith.constant 0 : index
    %c1_29 = arith.constant 1 : index
    %c1_30 = arith.constant 1 : index
    %c0_31 = arith.constant 0 : index
    %29 = vector.load %arg1[%c0_28, %c1_29, %c1_30, %c0_31] : memref<1x18x18x4xbf16, #tpu.memory_space<vmem>>, vector<1x16x16x4xbf16>
    %30 = vector.shape_cast %29 : vector<1x16x16x4xbf16> to vector<16x16x4xbf16>
    %31 = vector.shape_cast %30 : vector<16x16x4xbf16> to vector<256x4xbf16>
    %c4 = arith.constant 4 : index
    %c0_32 = arith.constant 0 : index
    %c0_33 = arith.constant 0 : index
    %32 = vector.load %arg2[%c4, %c0_32, %c0_33] : memref<9x4x8xbf16, #tpu.memory_space<vmem>>, vector<1x4x8xbf16>
    %33 = vector.shape_cast %32 : vector<1x4x8xbf16> to vector<4x8xbf16>
    %cst_34 = arith.constant dense<0.000000e+00> : vector<256x8xf32>
    %34 = tpu.matmul %31, %33, %cst_34 {dimension_numbers = #tpu.dot_dimension_numbers<[1], [0], [0], [1], [0, 0, 1, 1], [], []>} : vector<256x4xbf16>, vector<4x8xbf16>, vector<256x8xf32> -> vector<256x8xf32>
    %35 = arith.addf %28, %34 : vector<256x8xf32>
    %c0_35 = arith.constant 0 : index
    %c1_36 = arith.constant 1 : index
    %c2_37 = arith.constant 2 : index
    %c0_38 = arith.constant 0 : index
    %36 = vector.load %arg1[%c0_35, %c1_36, %c2_37, %c0_38] : memref<1x18x18x4xbf16, #tpu.memory_space<vmem>>, vector<1x16x16x4xbf16>
    %37 = vector.shape_cast %36 : vector<1x16x16x4xbf16> to vector<16x16x4xbf16>
    %38 = vector.shape_cast %37 : vector<16x16x4xbf16> to vector<256x4xbf16>
    %c5 = arith.constant 5 : index
    %c0_39 = arith.constant 0 : index
    %c0_40 = arith.constant 0 : index
    %39 = vector.load %arg2[%c5, %c0_39, %c0_40] : memref<9x4x8xbf16, #tpu.memory_space<vmem>>, vector<1x4x8xbf16>
    %40 = vector.shape_cast %39 : vector<1x4x8xbf16> to vector<4x8xbf16>
    %cst_41 = arith.constant dense<0.000000e+00> : vector<256x8xf32>
    %41 = tpu.matmul %38, %40, %cst_41 {dimension_numbers = #tpu.dot_dimension_numbers<[1], [0], [0], [1], [0, 0, 1, 1], [], []>} : vector<256x4xbf16>, vector<4x8xbf16>, vector<256x8xf32> -> vector<256x8xf32>
    %42 = arith.addf %35, %41 : vector<256x8xf32>
    %c0_42 = arith.constant 0 : index
    %c2_43 = arith.constant 2 : index
    %c0_44 = arith.constant 0 : index
    %c0_45 = arith.constant 0 : index
    %43 = vector.load %arg1[%c0_42, %c2_43, %c0_44, %c0_45] : memref<1x18x18x4xbf16, #tpu.memory_space<vmem>>, vector<1x16x16x4xbf16>
    %44 = vector.shape_cast %43 : vector<1x16x16x4xbf16> to vector<16x16x4xbf16>
    %45 = vector.shape_cast %44 : vector<16x16x4xbf16> to vector<256x4xbf16>
    %c6 = arith.constant 6 : index
    %c0_46 = arith.constant 0 : index
    %c0_47 = arith.constant 0 : index
    %46 = vector.load %arg2[%c6, %c0_46, %c0_47] : memref<9x4x8xbf16, #tpu.memory_space<vmem>>, vector<1x4x8xbf16>
    %47 = vector.shape_cast %46 : vector<1x4x8xbf16> to vector<4x8xbf16>
    %cst_48 = arith.constant dense<0.000000e+00> : vector<256x8xf32>
    %48 = tpu.matmul %45, %47, %cst_48 {dimension_numbers = #tpu.dot_dimension_numbers<[1], [0], [0], [1], [0, 0, 1, 1], [], []>} : vector<256x4xbf16>, vector<4x8xbf16>, vector<256x8xf32> -> vector<256x8xf32>
    %49 = arith.addf %42, %48 : vector<256x8xf32>
    %c0_49 = arith.constant 0 : index
    %c2_50 = arith.constant 2 : index
    %c1_51 = arith.constant 1 : index
    %c0_52 = arith.constant 0 : index
    %50 = vector.load %arg1[%c0_49, %c2_50, %c1_51, %c0_52] : memref<1x18x18x4xbf16, #tpu.memory_space<vmem>>, vector<1x16x16x4xbf16>
    %51 = vector.shape_cast %50 : vector<1x16x16x4xbf16> to vector<16x16x4xbf16>
    %52 = vector.shape_cast %51 : vector<16x16x4xbf16> to vector<256x4xbf16>
    %c7 = arith.constant 7 : index
    %c0_53 = arith.constant 0 : index
    %c0_54 = arith.constant 0 : index
    %53 = vector.load %arg2[%c7, %c0_53, %c0_54] : memref<9x4x8xbf16, #tpu.memory_space<vmem>>, vector<1x4x8xbf16>
    %54 = vector.shape_cast %53 : vector<1x4x8xbf16> to vector<4x8xbf16>
    %cst_55 = arith.constant dense<0.000000e+00> : vector<256x8xf32>
    %55 = tpu.matmul %52, %54, %cst_55 {dimension_numbers = #tpu.dot_dimension_numbers<[1], [0], [0], [1], [0, 0, 1, 1], [], []>} : vector<256x4xbf16>, vector<4x8xbf16>, vector<256x8xf32> -> vector<256x8xf32>
    %56 = arith.addf %49, %55 : vector<256x8xf32>
    %c0_56 = arith.constant 0 : index
    %c2_57 = arith.constant 2 : index
    %c2_58 = arith.constant 2 : index
    %c0_59 = arith.constant 0 : index
    %57 = vector.load %arg1[%c0_56, %c2_57, %c2_58, %c0_59] : memref<1x18x18x4xbf16, #tpu.memory_space<vmem>>, vector<1x16x16x4xbf16>
    %58 = vector.shape_cast %57 : vector<1x16x16x4xbf16> to vector<16x16x4xbf16>
    %59 = vector.shape_cast %58 : vector<16x16x4xbf16> to vector<256x4xbf16>
    %c8 = arith.constant 8 : index
    %c0_60 = arith.constant 0 : index
    %c0_61 = arith.constant 0 : index
    %60 = vector.load %arg2[%c8, %c0_60, %c0_61] : memref<9x4x8xbf16, #tpu.memory_space<vmem>>, vector<1x4x8xbf16>
    %61 = vector.shape_cast %60 : vector<1x4x8xbf16> to vector<4x8xbf16>
    %cst_62 = arith.constant dense<0.000000e+00> : vector<256x8xf32>
    %62 = tpu.matmul %59, %61, %cst_62 {dimension_numbers = #tpu.dot_dimension_numbers<[1], [0], [0], [1], [0, 0, 1, 1], [], []>} : vector<256x4xbf16>, vector<4x8xbf16>, vector<256x8xf32> -> vector<256x8xf32>
    %63 = arith.addf %56, %62 : vector<256x8xf32>
    %c0_63 = arith.constant 0 : index
    %c0_64 = arith.constant 0 : index
    %c0_65 = arith.constant 0 : index
    %64 = vector.load %arg3[%c0_63, %c0_64, %c0_65] : memref<1x256x8xf32, #tpu.memory_space<vmem>>, vector<1x256x8xf32>
    %65 = vector.shape_cast %64 : vector<1x256x8xf32> to vector<256x8xf32>
    %66 = vector.shape_cast %63 : vector<256x8xf32> to vector<1x256x8xf32>
    tpu.vector_store %arg3[%c0_63, %c0_64, %c0_65], %66 {strides = array<i32>} : memref<1x256x8xf32, #tpu.memory_space<vmem>>, vector<1x256x8xf32>,
    return
  }
  func.func @transform_0(%arg0: i32) -> (i32, i32, i32, i32) {
    %c0_i32 = arith.constant 0 : i32
    %c0_i32_0 = arith.constant 0 : i32
    %c0_i32_1 = arith.constant 0 : i32
    %c0_i32_2 = arith.constant 0 : i32
    return %arg0, %c0_i32, %c0_i32_0, %c0_i32_1 : i32, i32, i32, i32
  }
  func.func @transform_1(%arg0: i32) -> (i32, i32, i32) {
    %c0_i32 = arith.constant 0 : i32
    %c0_i32_0 = arith.constant 0 : i32
    %c0_i32_1 = arith.constant 0 : i32
    %c0_i32_2 = arith.constant 0 : i32
    return %c0_i32, %c0_i32_0, %c0_i32_1 : i32, i32, i32
  }
  func.func @transform_2(%arg0: i32) -> (i32, i32, i32) {
    %c0_i32 = arith.constant 0 : i32
    %c0_i32_0 = arith.constant 0 : i32
    %c0_i32_1 = arith.constant 0 : i32
    return %arg0, %c0_i32, %c0_i32_0 : i32, i32, i32
  }
}

module attributes {stable_mosaic.version = 11 : i64} {
  func.func @_gn_selu_kernel(%arg0: i32, %arg1: memref<1x256x8xf32, #tpu.memory_space<vmem>>, %arg2: memref<1x8xf32, #tpu.memory_space<vmem>>, %arg3: memref<1x8xf32, #tpu.memory_space<vmem>>, %arg4: memref<1x8x256xf32, #tpu.memory_space<vmem>>) attributes {dimension_semantics = [#tpu.dimension_semantics<parallel>], iteration_bounds = array<i64: 2>, scalar_prefetch = 0 : i64, scratch_operands = 0 : i64, tpu.core_type = #tpu.core_type<tc>, window_params = [{transform_indices = @transform_0, window_bounds = array<i64: 1, 256, 8>}, {pipeline_mode = #tpu.pipeline_mode<synchronous>, transform_indices = @transform_1, window_bounds = array<i64: 1, 8>}, {pipeline_mode = #tpu.pipeline_mode<synchronous>, transform_indices = @transform_2, window_bounds = array<i64: 1, 8>}, {transform_indices = @transform_3, window_bounds = array<i64: 1, 8, 256>}]} {
    %c0 = arith.constant 0 : index
    %c0_0 = arith.constant 0 : index
    %c0_1 = arith.constant 0 : index
    %0 = vector.load %arg1[%c0, %c0_0, %c0_1] : memref<1x256x8xf32, #tpu.memory_space<vmem>>, vector<1x256x8xf32>
    %1 = vector.shape_cast %0 : vector<1x256x8xf32> to vector<256x8xf32>
    %cst = arith.constant dense<0.000000e+00> : vector<8xf32>
    %2 = vector.multi_reduction <add>, %1, %cst [0] : vector<256x8xf32> to vector<8xf32>
    %3 = vector.shape_cast %2 : vector<8xf32> to vector<1x8xf32>
    %cst_2 = arith.constant 2.560000e+02 : f32
    %4 = vector.broadcast %cst_2 : f32 to vector<1x8xf32>
    %5 = arith.divf %3, %4 : vector<1x8xf32>
    %6 = vector.broadcast %5 : vector<1x8xf32> to vector<256x8xf32>
    %7 = arith.subf %1, %6 : vector<256x8xf32>
    %8 = arith.mulf %7, %7 : vector<256x8xf32>
    %cst_3 = arith.constant dense<0.000000e+00> : vector<8xf32>
    %9 = vector.multi_reduction <add>, %8, %cst_3 [0] : vector<256x8xf32> to vector<8xf32>
    %10 = vector.shape_cast %9 : vector<8xf32> to vector<1x8xf32>
    %cst_4 = arith.constant 2.560000e+02 : f32
    %11 = vector.broadcast %cst_4 : f32 to vector<1x8xf32>
    %12 = arith.divf %10, %11 : vector<1x8xf32>
    %cst_5 = arith.constant 9.99999974E-6 : f32
    %13 = vector.broadcast %cst_5 : f32 to vector<1x8xf32>
    %14 = arith.addf %12, %13 : vector<1x8xf32>
    %15 = math.rsqrt %14 : vector<1x8xf32>
    %16 = vector.broadcast %15 : vector<1x8xf32> to vector<256x8xf32>
    %17 = arith.mulf %7, %16 : vector<256x8xf32>
    %c0_6 = arith.constant 0 : index
    %c0_7 = arith.constant 0 : index
    %18 = vector.load %arg2[%c0_6, %c0_7] : memref<1x8xf32, #tpu.memory_space<vmem>>, vector<1x8xf32>
    %19 = vector.broadcast %18 : vector<1x8xf32> to vector<256x8xf32>
    %20 = arith.mulf %17, %19 : vector<256x8xf32>
    %c0_8 = arith.constant 0 : index
    %c0_9 = arith.constant 0 : index
    %21 = vector.load %arg3[%c0_8, %c0_9] : memref<1x8xf32, #tpu.memory_space<vmem>>, vector<1x8xf32>
    %22 = vector.broadcast %21 : vector<1x8xf32> to vector<256x8xf32>
    %23 = arith.addf %20, %22 : vector<256x8xf32>
    %cst_10 = arith.constant 0.000000e+00 : f32
    %24 = vector.broadcast %cst_10 : f32 to vector<256x8xf32>
    %25 = arith.cmpf ogt, %23, %24 : vector<256x8xf32>
    %26 = math.exp %23 : vector<256x8xf32>
    %cst_11 = arith.constant 1.000000e+00 : f32
    %27 = vector.broadcast %cst_11 : f32 to vector<256x8xf32>
    %28 = arith.subf %26, %27 : vector<256x8xf32>
    %cst_12 = arith.constant 1.67326319 : f32
    %29 = vector.broadcast %cst_12 : f32 to vector<256x8xf32>
    %30 = arith.mulf %29, %28 : vector<256x8xf32>
    %31 = arith.select %25, %23, %30 : vector<256x8xi1>, vector<256x8xf32>
    %cst_13 = arith.constant 1.05070102 : f32
    %32 = vector.broadcast %cst_13 : f32 to vector<256x8xf32>
    %33 = arith.mulf %32, %31 : vector<256x8xf32>
    %34 = tpu.transpose %33, [1, 0] : vector<256x8xf32> -> vector<8x256xf32>
    %c0_14 = arith.constant 0 : index
    %c0_15 = arith.constant 0 : index
    %c0_16 = arith.constant 0 : index
    %35 = vector.load %arg4[%c0_14, %c0_15, %c0_16] : memref<1x8x256xf32, #tpu.memory_space<vmem>>, vector<1x8x256xf32>
    %36 = vector.shape_cast %35 : vector<1x8x256xf32> to vector<8x256xf32>
    %37 = vector.shape_cast %34 : vector<8x256xf32> to vector<1x8x256xf32>
    tpu.vector_store %arg4[%c0_14, %c0_15, %c0_16], %37 {strides = array<i32>} : memref<1x8x256xf32, #tpu.memory_space<vmem>>, vector<1x8x256xf32>,
    return
  }
  func.func @transform_0(%arg0: i32) -> (i32, i32, i32) {
    %c0_i32 = arith.constant 0 : i32
    %c0_i32_0 = arith.constant 0 : i32
    %c0_i32_1 = arith.constant 0 : i32
    return %arg0, %c0_i32, %c0_i32_0 : i32, i32, i32
  }
  func.func @transform_1(%arg0: i32) -> (i32, i32) {
    %c0_i32 = arith.constant 0 : i32
    %c0_i32_0 = arith.constant 0 : i32
    %c0_i32_1 = arith.constant 0 : i32
    return %c0_i32, %c0_i32_0 : i32, i32
  }
  func.func @transform_2(%arg0: i32) -> (i32, i32) {
    %c0_i32 = arith.constant 0 : i32
    %c0_i32_0 = arith.constant 0 : i32
    %c0_i32_1 = arith.constant 0 : i32
    return %c0_i32, %c0_i32_0 : i32, i32
  }
  func.func @transform_3(%arg0: i32) -> (i32, i32, i32) {
    %c0_i32 = arith.constant 0 : i32
    %c0_i32_0 = arith.constant 0 : i32
    %c0_i32_1 = arith.constant 0 : i32
    return %arg0, %c0_i32, %c0_i32_0 : i32, i32, i32
  }
}

</mosaic_0001>

<bundles_post_ra>
// kernel: a_call__.3
= control target key start
LH: loop header
LB: loop body
LE: loop exit
PB: predicated region body
PF: predicated region fallthrough
CT: control target
= control target key end

     0   :  { %s1015_s12 = smov 0   ;;  %s1764_s0 = inlined_call_operand.vmem [shape: f32[2,256,8], index: 0, kind: input, shape index: {}]   ;;  %s1765_s1 = inlined_call_operand.vmem [shape: f32[1,8], index: 1, kind: input, shape index: {}]   ;;  %s1766_s2 = inlined_call_operand.vmem [shape: f32[1,8], index: 2, kind: input, shape index: {}]   ;;  %s1767_s3 = inlined_call_operand.vmem [shape: f32[2,8,256], index: 3, kind: output, shape index: {}]  }
   0x1 LB: > { %s866_s13 = sadd.s32 4294967295, %s993_s12   ;;  %p870_p0 = scmp.ge.s32.totalorder %s993_s12, 1  ;;  %s993_s12 = sphi %s1015_s12, %s13_s12  }
   0x2   : > { %p137_p1 = scmp.lt.s32.totalorder %s993_s12, 3 }
   0x4   : > { %p138_p2 = pnand %p870_p0, %p137_p1 }
   0x5   : > { %p161_p3 = scmp.lt.s32.totalorder (!%p138_p2), %s866_s13, 1  ;;  %vm203_vm0 = vcmask (!%p138_p2), 64512  }
   0x6   : > { %141 = sbr.rel (%p138_p2) target bundleno = 351 (0x15f), region = 32 }
   0xd   : > { %s1769_s13 = smov (!%p161_p3, %s866_s13), 1 }
   0xe   : > { %s911_s14 = sshll.u32 %s1769_s13, 8  ;;  %s912_s22 = sshll.u32 %s1769_s13, 4 }
   0xf   : > { %s1029_s17 = scalar_lea.vmem %s1764_s0, %s911_s14  ;;  %s170_s25 = scalar_lea.vmem %s1767_s3, %s912_s22 }
  0x10   : > { %v1032_v0 = vld [vmem:[%s1029_s17] sm:$0xff]  ;;  %v1035_v1 = vld [vmem:[%s1029_s17 + $0x8] sm:$0xff]  ;;  %v1038_v2 = vld [vmem:[%s1029_s17 + $0x10] sm:$0xff] }
  0x11   : > { %v1041_v3 = vld [vmem:[%s1029_s17 + $0x18] sm:$0xff]  ;;  %v204_v4 = vsel %vm203_vm0, %v1032_v0, 0.0  ;;  %v205_v5 = vsel %vm203_vm0, %v1035_v1, 0.0  ;;  %v207_v6 = vsel %vm203_vm0, %v1038_v2, 0.0  ;;  %v1050_v7 = vld [vmem:[%s1029_s17 + $0x20] sm:$0xff]  ;;  %v1055_v10 = vld [vmem:[%s1029_s17 + $0x28] sm:$0xff] }
  0x12   : > { %v206_v8 = vadd.f32 %v205_v5, %v204_v4  ;;  %v209_v9 = vsel %vm203_vm0, %v1041_v3, 0.0  ;;  %v211_v12 = vsel %vm203_vm0, %v1050_v7, 0.0  ;;  %v1060_v13 = vld [vmem:[%s1029_s17 + $0x30] sm:$0xff]  ;;  %v213_v15 = vsel %vm203_vm0, %v1055_v10, 0.0  ;;  %v1065_v16 = vld [vmem:[%s1029_s17 + $0x38] sm:$0xff]  ;;  %v1070_v19 = vld [vmem:[%s1029_s17 + $0x40] sm:$0xff] }
  0x13   : > { %v215_v18 = vsel %vm203_vm0, %v1060_v13, 0.0  ;;  %v217_v21 = vsel %vm203_vm0, %v1065_v16, 0.0  ;;  %v1075_v22 = vld [vmem:[%s1029_s17 + $0x48] sm:$0xff]  ;;  %v219_v24 = vsel %vm203_vm0, %v1070_v19, 0.0  ;;  %v1080_v25 = vld [vmem:[%s1029_s17 + $0x50] sm:$0xff]  ;;  %v1085_v28 = vld [vmem:[%s1029_s17 + $0x58] sm:$0xff] }
  0x14   : > { %v208_v11 = vadd.f32 %v207_v6, %v206_v8  ;;  %v221_v27 = vsel %vm203_vm0, %v1075_v22, 0.0  ;;  %v223_v30 = vsel %vm203_vm0, %v1080_v25, 0.0  ;;  %v1090_v31 = vld [vmem:[%s1029_s17 + $0x60] sm:$0xff]  ;;  %v225_v33 = vsel %vm203_vm0, %v1085_v28, 0.0  ;;  %v1095_v34 = vld [vmem:[%s1029_s17 + $0x68] sm:$0xff]  ;;  %v1100_v37 = vld [vmem:[%s1029_s17 + $0x70] sm:$0xff] }
  0x15   : > { %v227_v36 = vsel %vm203_vm0, %v1090_v31, 0.0  ;;  %v229_v39 = vsel %vm203_vm0, %v1095_v34, 0.0  ;;  %v1105_v40 = vld [vmem:[%s1029_s17 + $0x78] sm:$0xff]  ;;  %v231_v42 = vsel %vm203_vm0, %v1100_v37, 0.0  ;;  %v1110_v43 = vld [vmem:[%s1029_s17 + $0x80] sm:$0xff]  ;;  %v1115_v46 = vld [vmem:[%s1029_s17 + $0x88] sm:$0xff] }
  0x16   : > { %v210_v14 = vadd.f32 %v209_v9, %v208_v11  ;;  %v233_v45 = vsel %vm203_vm0, %v1105_v40, 0.0  ;;  %v235_v48 = vsel %vm203_vm0, %v1110_v43, 0.0  ;;  %v1120_v49 = vld [vmem:[%s1029_s17 + $0x90] sm:$0xff]  ;;  %v237_v51 = vsel %vm203_vm0, %v1115_v46, 0.0  ;;  %v1125_v52 = vld [vmem:[%s1029_s17 + $0x98] sm:$0xff]  ;;  %v1130_v55 = vld [vmem:[%s1029_s17 + $0xa0] sm:$0xff] }
  0x17   : > { %v239_v54 = vsel %vm203_vm0, %v1120_v49, 0.0  ;;  %v241_v57 = vsel %vm203_vm0, %v1125_v52, 0.0  ;;  %v1135_v58 = vld [vmem:[%s1029_s17 + $0xa8] sm:$0xff]  ;;  %v243_v60 = vsel %vm203_vm0, %v1130_v55, 0.0  ;;  %v1140_v61 = vld [vmem:[%s1029_s17 + $0xb0] sm:$0xff]  ;;  %v1145_v4 = vld [vmem:[%s1029_s17 + $0xb8] sm:$0xff] }
  0x18   : > { %v212_v17 = vadd.f32 %v211_v12, %v210_v14  ;;  %v245_v63 = vsel %vm203_vm0, %v1135_v58, 0.0  ;;  %v247_v6 = vsel %vm203_vm0, %v1140_v61, 0.0  ;;  %v1150_v8 = vld [vmem:[%s1029_s17 + $0xc0] sm:$0xff]  ;;  %v249_v11 = vsel %vm203_vm0, %v1145_v4, 0.0  ;;  %v1155_v12 = vld [vmem:[%s1029_s17 + $0xc8] sm:$0xff] }
  0x1a   : > { %v214_v20 = vadd.f32 %v213_v15, %v212_v17  ;;  %v251_v15 = vsel %vm203_vm0, %v1150_v8, 0.0  ;;  %v1160_v17 = vld [vmem:[%s1029_s17 + $0xd0] sm:$0xff] }
  0x1c   : > { %v216_v23 = vadd.f32 %v215_v18, %v214_v20  ;;  %v253_v20 = vsel %vm203_vm0, %v1155_v12, 0.0 }
  0x1e   : > { %v218_v26 = vadd.f32 %v217_v21, %v216_v23  ;;  %v1165_v21 = vld [vmem:[%s1029_s17 + $0xd8] sm:$0xff] }
  0x20   : > { %v220_v29 = vadd.f32 %v219_v24, %v218_v26  ;;  %v255_v24 = vsel %vm203_vm0, %v1160_v17, 0.0  ;;  %v1170_v26 = vld [vmem:[%s1029_s17 + $0xe0] sm:$0xff] }
  0x22   : > { %v222_v32 = vadd.f32 %v221_v27, %v220_v29  ;;  %v257_v29 = vsel %vm203_vm0, %v1165_v21, 0.0 }
  0x24   : > { %v224_v35 = vadd.f32 %v223_v30, %v222_v32  ;;  %v1175_v30 = vld [vmem:[%s1029_s17 + $0xe8] sm:$0xff] }
  0x26   : > { %v226_v38 = vadd.f32 %v225_v33, %v224_v35  ;;  %v259_v33 = vsel %vm203_vm0, %v1170_v26, 0.0  ;;  %v1180_v35 = vld [vmem:[%s1029_s17 + $0xf0] sm:$0xff] }
  0x28   : > { %v228_v41 = vadd.f32 %v227_v36, %v226_v38  ;;  %v261_v38 = vsel %vm203_vm0, %v1175_v30, 0.0 }
  0x2a   : > { %v230_v44 = vadd.f32 %v229_v39, %v228_v41  ;;  %v1185_v39 = vld [vmem:[%s1029_s17 + $0xf8] sm:$0xff] }
  0x2c   : > { %v232_v47 = vadd.f32 %v231_v42, %v230_v44  ;;  %v263_v42 = vsel %vm203_vm0, %v1180_v35, 0.0 }
  0x2e   : > { %v234_v50 = vadd.f32 %v233_v45, %v232_v47  ;;  %v265_v45 = vsel %vm203_vm0, %v1185_v39, 0.0 }
  0x30   : > { %v236_v53 = vadd.f32 %v235_v48, %v234_v50 }
  0x32   : > { %v238_v56 = vadd.f32 %v237_v51, %v236_v53 }
  0x34   : > { %v240_v59 = vadd.f32 %v239_v54, %v238_v56 }
  0x36   : > { %v242_v62 = vadd.f32 %v241_v57, %v240_v59 }
  0x38   : > { %v244_v5 = vadd.f32 %v243_v60, %v242_v62 }
  0x3a   : > { %v246_v9 = vadd.f32 %v245_v63, %v244_v5 }
  0x3c   : > { %v248_v14 = vadd.f32 %v247_v6, %v246_v9 }
  0x3e   : > { %v250_v18 = vadd.f32 %v249_v11, %v248_v14 }
  0x40   : > { %v252_v23 = vadd.f32 %v251_v15, %v250_v18 }
  0x42   : > { %v254_v27 = vadd.f32 %v253_v20, %v252_v23 }
  0x44   : > { %v256_v32 = vadd.f32 %v255_v24, %v254_v27 }
  0x46   : > { %v258_v36 = vadd.f32 %v257_v29, %v256_v32 }
  0x48   : > { %v260_v41 = vadd.f32 %v259_v33, %v258_v36 }
  0x4a   : > { %v262_v44 = vadd.f32 %v261_v38, %v260_v41 }
  0x4c   : > { %v264_v47 = vadd.f32 %v263_v42, %v262_v44 }
  0x4e   : > { %v266_v48 = vadd.f32 %v265_v45, %v264_v47 }
  0x50   : > { %v267_v50 = vrot.slane %v266_v48, 4 }
  0x52   : > { %v268_v51 = vadd.f32 %v267_v50, %v266_v48 }
  0x54   : > { %v269_v53 = vrot.slane %v268_v51, 2 }
  0x56   : > { %v270_v54 = vadd.f32 %v269_v53, %v268_v51 }
  0x58   : > { %v271_v56 = vrot.slane %v270_v54, 1 }
  0x5a   : > { %v272_v57 = vadd.f32 %v271_v56, %v270_v54 }
  0x5c   : > { %v1191_v59 = vmul.f32 0.00390625, %v272_v57 }
  0x5e   : > { %v1195_v60 = vsub.f32 %v1032_v0, %v1191_v59  ;;  %v1199_v62 = vsub.f32 %v1035_v1, %v1191_v59  ;;  %v1203_v63 = vsub.f32 %v1038_v2, %v1191_v59  ;;  %v1207_v5 = vsub.f32 %v1041_v3, %v1191_v59 }
  0x5f   : > { %v1211_v6 = vsub.f32 %v1050_v7, %v1191_v59  ;;  %v1221_v2 = vsub.f32 %v1055_v10, %v1191_v59  ;;  %v1227_v7 = vsub.f32 %v1060_v13, %v1191_v59  ;;  %v1236_v10 = vsub.f32 %v1065_v16, %v1191_v59 }
  0x60   : > { %v307_v0 = vmul.f32 %v1195_v60, %v1195_v60  ;;  %v308_v9 = vmul.f32 %v1199_v62, %v1199_v62  ;;  %v309_v1 = vmul.f32 %v1203_v63, %v1203_v63  ;;  %v310_v3 = vmul.f32 %v1207_v5, %v1207_v5 }
  0x61   : > { %v311_v11 = vmul.f32 %v1211_v6, %v1211_v6  ;;  %v312_v23 = vmul.f32 %v1221_v2, %v1221_v2  ;;  %v1243_v27 = vsub.f32 %v1070_v19, %v1191_v59  ;;  %v313_v29 = vmul.f32 %v1227_v7, %v1227_v7 }
  0x62   : > { %v339_v14 = vsel %vm203_vm0, %v307_v0, 0.0  ;;  %v340_v15 = vsel %vm203_vm0, %v308_v9, 0.0  ;;  %v342_v18 = vsel %vm203_vm0, %v309_v1, 0.0  ;;  %v344_v13 = vsel %vm203_vm0, %v310_v3, 0.0 }
  0x63   : > { %v341_v20 = vadd.f32 %v340_v15, %v339_v14  ;;  %v346_v32 = vsel %vm203_vm0, %v311_v11, 0.0  ;;  %v1250_v16 = vsub.f32 %v1075_v22, %v1191_v59  ;;  %v314_v36 = vmul.f32 %v1236_v10, %v1236_v10 }
  0x64   : > { %v348_v38 = vsel %vm203_vm0, %v312_v23, 0.0  ;;  %v1257_v19 = vsub.f32 %v1080_v25, %v1191_v59  ;;  %v315_v42 = vmul.f32 %v1243_v27, %v1243_v27  ;;  %v350_v44 = vsel %vm203_vm0, %v313_v29, 0.0 }
  0x65   : > { %v343_v24 = vadd.f32 %v342_v18, %v341_v20  ;;  %v1264_v22 = vsub.f32 %v1085_v28, %v1191_v59  ;;  %v316_v47 = vmul.f32 %v1250_v16, %v1250_v16  ;;  %v352_v48 = vsel %vm203_vm0, %v314_v36, 0.0 }
  0x66   : > { %v1271_v25 = vsub.f32 %v1090_v31, %v1191_v59  ;;  %v317_v51 = vmul.f32 %v1257_v19, %v1257_v19  ;;  %v354_v53 = vsel %vm203_vm0, %v315_v42, 0.0  ;;  %v1278_v28 = vsub.f32 %v1095_v34, %v1191_v59 }
  0x67   : > { %v345_v33 = vadd.f32 %v344_v13, %v343_v24  ;;  %v318_v56 = vmul.f32 %v1264_v22, %v1264_v22  ;;  %v356_v57 = vsel %vm203_vm0, %v316_v47, 0.0  ;;  %v1285_v31 = vsub.f32 %v1100_v37, %v1191_v59 }
  0x68   : > { %v319_v9 = vmul.f32 %v1271_v25, %v1271_v25  ;;  %v358_v1 = vsel %vm203_vm0, %v317_v51, 0.0  ;;  %v1292_v34 = vsub.f32 %v1105_v40, %v1191_v59  ;;  %v320_v11 = vmul.f32 %v1278_v28, %v1278_v28 }
  0x69   : > { %v347_v41 = vadd.f32 %v346_v32, %v345_v33  ;;  %v360_v14 = vsel %vm203_vm0, %v318_v56, 0.0  ;;  %v1299_v37 = vsub.f32 %v1110_v43, %v1191_v59  ;;  %v321_v18 = vmul.f32 %v1285_v31, %v1285_v31 }
  0x6a   : > { %v362_v20 = vsel %vm203_vm0, %v319_v9, 0.0  ;;  %v1306_v40 = vsub.f32 %v1115_v46, %v1191_v59  ;;  %v322_v13 = vmul.f32 %v1292_v34, %v1292_v34  ;;  %v364_v24 = vsel %vm203_vm0, %v320_v11, 0.0 }
  0x6b   : > { %v349_v45 = vadd.f32 %v348_v38, %v347_v41  ;;  %v1313_v43 = vsub.f32 %v1120_v49, %v1191_v59  ;;  %v323_v32 = vmul.f32 %v1299_v37, %v1299_v37  ;;  %v366_v33 = vsel %vm203_vm0, %v321_v18, 0.0 }
  0x6c   : > { %v1320_v46 = vsub.f32 %v1125_v52, %v1191_v59  ;;  %v324_v38 = vmul.f32 %v1306_v40, %v1306_v40  ;;  %v368_v41 = vsel %vm203_vm0, %v322_v13, 0.0  ;;  %v1327_v49 = vsub.f32 %v1130_v55, %v1191_v59 }
  0x6d   : > { %v351_v50 = vadd.f32 %v350_v44, %v349_v45  ;;  %v325_v44 = vmul.f32 %v1313_v43, %v1313_v43  ;;  %v370_v45 = vsel %vm203_vm0, %v323_v32, 0.0  ;;  %v1334_v52 = vsub.f32 %v1135_v58, %v1191_v59 }
  0x6e   : > { %v1341_v55 = vsub.f32 %v1140_v61, %v1191_v59  ;;  %v1348_v58 = vsub.f32 %v1145_v4, %v1191_v59  ;;  %v1355_v61 = vsub.f32 %v1150_v8, %v1191_v59  ;;  %v1362_v4 = vsub.f32 %v1155_v12, %v1191_v59 }
  0x6f   : > { %v353_v54 = vadd.f32 %v352_v48, %v351_v50  ;;  %v326_v48 = vmul.f32 %v1320_v46, %v1320_v46  ;;  %v372_v50 = vsel %vm203_vm0, %v324_v38, 0.0  ;;  %v1369_v8 = vsub.f32 %v1160_v17, %v1191_v59 }
  0x70   : > { %v1376_v12 = vsub.f32 %v1165_v21, %v1191_v59  ;;  %v1383_v17 = vsub.f32 %v1170_v26, %v1191_v59  ;;  %v1390_v21 = vsub.f32 %v1175_v30, %v1191_v59  ;;  %v1397_v26 = vsub.f32 %v1180_v35, %v1191_v59 }
  0x71   : > { %v355_v0 = vadd.f32 %v354_v53, %v353_v54  ;;  %v327_v53 = vmul.f32 %v1327_v49, %v1327_v49  ;;  %v374_v54 = vsel %vm203_vm0, %v325_v44, 0.0  ;;  %v1404_v30 = vsub.f32 %v1185_v39, %v1191_v59 }
  0x72   : > { %v337_v35 = vmul.f32 %v1397_v26, %v1397_v26 }
  0x73   : > { %v357_v3 = vadd.f32 %v356_v57, %v355_v0  ;;  %v328_v57 = vmul.f32 %v1334_v52, %v1334_v52  ;;  %v376_v0 = vsel %vm203_vm0, %v326_v48, 0.0 }
  0x74   : > { %v398_v39 = vsel %vm203_vm0, %v337_v35, 0.0 }
  0x75   : > { %v359_v15 = vadd.f32 %v358_v1, %v357_v3  ;;  %v329_v1 = vmul.f32 %v1341_v55, %v1341_v55  ;;  %v378_v3 = vsel %vm203_vm0, %v327_v53, 0.0 }
  0x77   : > { %v361_v23 = vadd.f32 %v360_v14, %v359_v15  ;;  %v330_v14 = vmul.f32 %v1348_v58, %v1348_v58  ;;  %v380_v15 = vsel %vm203_vm0, %v328_v57, 0.0  ;;  %v338_v57 = vmul.f32 %v1404_v30, %v1404_v30 }
  0x79   : > { %v363_v29 = vadd.f32 %v362_v20, %v361_v23  ;;  %v331_v20 = vmul.f32 %v1355_v61, %v1355_v61  ;;  %v382_v23 = vsel %vm203_vm0, %v329_v1, 0.0  ;;  %v400_v1 = vsel %vm203_vm0, %v338_v57, 0.0 }
  0x7b   : > { %v365_v36 = vadd.f32 %v364_v24, %v363_v29  ;;  %v332_v24 = vmul.f32 %v1362_v4, %v1362_v4  ;;  %v384_v29 = vsel %vm203_vm0, %v330_v14, 0.0 }
  0x7d   : > { %v367_v42 = vadd.f32 %v366_v33, %v365_v36  ;;  %v333_v33 = vmul.f32 %v1369_v8, %v1369_v8  ;;  %v386_v36 = vsel %vm203_vm0, %v331_v20, 0.0 }
  0x7f   : > { %v369_v47 = vadd.f32 %v368_v41, %v367_v42  ;;  %v334_v41 = vmul.f32 %v1376_v12, %v1376_v12  ;;  %v388_v42 = vsel %vm203_vm0, %v332_v24, 0.0 }
  0x81   : > { %v371_v51 = vadd.f32 %v370_v45, %v369_v47  ;;  %v335_v45 = vmul.f32 %v1383_v17, %v1383_v17  ;;  %v390_v47 = vsel %vm203_vm0, %v333_v33, 0.0  ;;  %v1422_v33 = vld [vmem:[%s1765_s1] ss:$0 sm:$0xff] }
  0x83   : > { %v373_v56 = vadd.f32 %v372_v50, %v371_v51  ;;  %v336_v50 = vmul.f32 %v1390_v21, %v1390_v21  ;;  %v392_v51 = vsel %vm203_vm0, %v334_v41, 0.0 }
  0x85   : > { %v375_v9 = vadd.f32 %v374_v54, %v373_v56  ;;  %v394_v54 = vsel %vm203_vm0, %v335_v45, 0.0 }
  0x87   : > { %v377_v11 = vadd.f32 %v376_v0, %v375_v9  ;;  %v396_v0 = vsel %vm203_vm0, %v336_v50, 0.0 }
  0x89   : > { %v379_v18 = vadd.f32 %v378_v3, %v377_v11 }
  0x8b   : > { %v381_v13 = vadd.f32 %v380_v15, %v379_v18 }
  0x8d   : > { %v383_v32 = vadd.f32 %v382_v23, %v381_v13 }
  0x8f   : > { %v385_v38 = vadd.f32 %v384_v29, %v383_v32 }
  0x91   : > { %v387_v44 = vadd.f32 %v386_v36, %v385_v38 }
  0x93   : > { %v389_v48 = vadd.f32 %v388_v42, %v387_v44  ;;  %v1435_v44 = vld [vmem:[%s1766_s2] ss:$0 sm:$0xff] }
  0x95   : > { %v391_v53 = vadd.f32 %v390_v47, %v389_v48 }
  0x97   : > { %v393_v56 = vadd.f32 %v392_v51, %v391_v53 }
  0x99   : > { %v395_v9 = vadd.f32 %v394_v54, %v393_v56 }
  0x9b   : > { %v397_v59 = vadd.f32 %v396_v0, %v395_v9 }
  0x9d   : > { %v399_v3 = vadd.f32 %v398_v39, %v397_v59 }
  0x9f   : > { %v401_v11 = vadd.f32 %v400_v1, %v399_v3 }
  0xa1   : > { %v402_v14 = vrot.slane %v401_v11, 4 }
  0xa3   : > { %v403_v15 = vadd.f32 %v402_v14, %v401_v11 }
  0xa5   : > { %v404_v18 = vrot.slane %v403_v15, 2 }
  0xa7   : > { %v405_v20 = vadd.f32 %v404_v18, %v403_v15 }
  0xa9   : > { %v406_v23 = vrot.slane %v405_v20, 1 }
  0xab   : > { %v407_v13 = vadd.f32 %v406_v23, %v405_v20 }
  0xad   : > { %v408_v24 = vmul.f32 0.00390625, %v407_v13 }
  0xaf   : > { %v409_v29 = vadd.f32 1e-05, %v408_v24 }
  0xb1   : > { %921 = vrsqrt.f32 %v409_v29 }
  0xbb   : > { %v1417_v32 = vpop.eup %921 }
  0xbc   : > { %v427_v36 = vmul.f32 %v1417_v32, %v1299_v37  ;;  %v411_v38 = vmul.f32 %v1417_v32, %v1195_v60  ;;  %v428_v41 = vmul.f32 %v1417_v32, %v1306_v40  ;;  %v412_v42 = vmul.f32 %v1417_v32, %v1199_v62 }
  0xbd   : > { %v429_v45 = vmul.f32 %v1417_v32, %v1313_v43  ;;  %v413_v37 = vmul.f32 %v1417_v32, %v1203_v63  ;;  %v430_v60 = vmul.f32 %v1417_v32, %v1320_v46  ;;  %v414_v40 = vmul.f32 %v1417_v32, %v1207_v5 }
  0xbe   : > { %v466_v47 = vmul.f32 %v1422_v33, %v427_v36  ;;  %v450_v62 = vmul.f32 %v1422_v33, %v411_v38  ;;  %v467_v48 = vmul.f32 %v1422_v33, %v428_v41  ;;  %v451_v50 = vmul.f32 %v1422_v33, %v412_v42 }
  0xbf   : > { %v468_v51 = vmul.f32 %v1422_v33, %v429_v45  ;;  %v452_v43 = vmul.f32 %v1422_v33, %v413_v37  ;;  %v469_v63 = vmul.f32 %v1422_v33, %v430_v60  ;;  %v453_v53 = vmul.f32 %v1422_v33, %v414_v40 }
  0xc0   : > { %v1454_v46 = vadd.f32 %v1435_v44, %v466_v47  ;;  %v1457_v5 = vadd.f32 %v1435_v44, %v450_v62  ;;  %v1460_v35 = vadd.f32 %v1435_v44, %v467_v48  ;;  %v1463_v54 = vadd.f32 %v1435_v44, %v451_v50 }
  0xc1   : > { %v1466_v56 = vadd.f32 %v1435_v44, %v468_v51  ;;  %v1469_v57 = vadd.f32 %v1435_v44, %v452_v43  ;;  %v1474_v39 = vadd.f32 %v1435_v44, %v469_v63  ;;  %v1477_v59 = vadd.f32 %v1435_v44, %v453_v53 }
  0xc2   : > { %v585_v0 = vmul.f32 1.442695, %v1454_v46  ;;  %v553_v9 = vmul.f32 1.442695, %v1457_v5  ;;  %v587_v1 = vmul.f32 1.442695, %v1460_v35  ;;  %v431_v20 = vmul.f32 %v1417_v32, %v1327_v49 }
  0xc3   : > { %v555_v3 = vmul.f32 1.442695, %v1463_v54  ;;  %v589_v11 = vmul.f32 1.442695, %v1466_v56  ;;  %v557_v14 = vmul.f32 1.442695, %v1469_v57  ;;  %v415_v23 = vmul.f32 %v1417_v32, %v1211_v6 }
  0xc4   : > { %923 = vpow2.f32 %v585_v0  ;;  %v591_v15 = vmul.f32 1.442695, %v1474_v39  ;;  %v559_v18 = vmul.f32 1.442695, %v1477_v59  ;;  %v432_v13 = vmul.f32 %v1417_v32, %v1334_v52 }
  0xc5   : > { %925 = vpow2.f32 %v553_v9  ;;  %v416_v24 = vmul.f32 %v1417_v32, %v1221_v2  ;;  %vm537_vm1 = vcmp.gt.f32.partialorder %v1454_v46, 0.0  ;;  %v470_v29 = vmul.f32 %v1422_v33, %v431_v20 }
  0xc6   : > { %927 = vpow2.f32 %v587_v1  ;;  %v433_v36 = vmul.f32 %v1417_v32, %v1341_v55  ;;  %v417_v49 = vmul.f32 %v1417_v32, %v1227_v7  ;;  %v454_v6 = vmul.f32 %v1422_v33, %v415_v23 }
  0xc7   : > { %929 = vpow2.f32 %v555_v3  ;;  %v471_v38 = vmul.f32 %v1422_v33, %v432_v13  ;;  %v455_v52 = vmul.f32 %v1422_v33, %v416_v24  ;;  %v1503_v2 = vadd.f32 %v1435_v44, %v470_v29 }
  0xc8   : > { %931 = vpow2.f32 %v589_v11  ;;  %v472_v41 = vmul.f32 %v1422_v33, %v433_v36  ;;  %v456_v42 = vmul.f32 %v1422_v33, %v417_v49  ;;  %v1508_v55 = vadd.f32 %v1435_v44, %v454_v6 }
  0xc9   : > { %933 = vpow2.f32 %v557_v14  ;;  %v1511_v7 = vadd.f32 %v1435_v44, %v471_v38  ;;  %v1514_v45 = vadd.f32 %v1435_v44, %v455_v52  ;;  %vm521_vm2 = vcmp.gt.f32.partialorder %v1457_v5, 0.0 }
  0xca   : > { %935 = vpow2.f32 %v591_v15  ;;  %v593_v37 = vmul.f32 1.442695, %v1503_v2  ;;  %v1519_v60 = vadd.f32 %v1435_v44, %v472_v41  ;;  %v1522_v40 = vadd.f32 %v1435_v44, %v456_v42 }
  0xcb   : > { %937 = vpow2.f32 %v559_v18  ;;  %vm538_vm3 = vcmp.gt.f32.partialorder %v1460_v35, 0.0  ;;  %vm522_vm4 = vcmp.gt.f32.partialorder %v1463_v54, 0.0  ;;  %v561_v47 = vmul.f32 1.442695, %v1508_v55 }
  0xcc   : > { %v595_v62 = vmul.f32 1.442695, %v1511_v7  ;;  %vm539_vm5 = vcmp.gt.f32.partialorder %v1466_v56, 0.0  ;;  %vm523_vm6 = vcmp.gt.f32.partialorder %v1469_v57, 0.0  ;;  %939 = vpow2.f32 %v593_v37 }
  0xcd   : > { %v563_v50 = vmul.f32 1.442695, %v1514_v45  ;;  %vm540_vm7 = vcmp.gt.f32.partialorder %v1474_v39, 0.0  ;;  %941 = vpow2.f32 %v561_v47  ;;  %v597_v63 = vmul.f32 1.442695, %v1519_v60 }
  0xce   : > { %v924_v48 = vpop.eup %923  ;;  %vm524_vm8 = vcmp.gt.f32.partialorder %v1477_v59, 0.0  ;;  %943 = vpow2.f32 %v595_v62  ;;  %v565_v9 = vmul.f32 1.442695, %v1522_v40  ;;  %v434_v1 = vmul.f32 %v1417_v32, %v1348_v58 }
  0xcf   : > { %v926_v51 = vpop.eup %925  ;;  %v893_v43 = vadd.f32 -1.0, %v924_v48  ;;  %945 = vpow2.f32 %v563_v50  ;;  %v418_v15 = vmul.f32 %v1417_v32, %v1236_v10  ;;  %vm541_vm9 = vcmp.gt.f32.partialorder %v1503_v2, 0.0 }
  0xd0   : > { %v928_v53 = vpop.eup %927  ;;  %v877_v0 = vadd.f32 -1.0, %v926_v51  ;;  %947 = vpow2.f32 %v597_v63  ;;  %v473_v13 = vmul.f32 %v1422_v33, %v434_v1  ;;  %vm525_vm10 = vcmp.gt.f32.partialorder %v1508_v55, 0.0 }
  0xd1   : > { %v930_v3 = vpop.eup %929  ;;  %v665_v11 = vmul.f32 1.6732632, %v893_v43  ;;  %v894_v14 = vadd.f32 -1.0, %v928_v53  ;;  %949 = vpow2.f32 %v565_v9  ;;  %vm542_vm11 = vcmp.gt.f32.partialorder %v1511_v7, 0.0 }
  0xd2   : > { %v932_v18 = vpop.eup %931  ;;  %v649_v20 = vmul.f32 1.6732632, %v877_v0  ;;  %v878_v23 = vadd.f32 -1.0, %v930_v3  ;;  %v1557_v53 = vadd.f32 %v1435_v44, %v473_v13  ;;  %vm526_vm12 = vcmp.gt.f32.partialorder %v1514_v45, 0.0 }
  0xd3   : > { %v934_v24 = vpop.eup %933  ;;  %v697_v58 = vsel %vm537_vm1, %v1454_v46, %v665_v11  ;;  %v666_v29 = vmul.f32 1.6732632, %v894_v14  ;;  %v895_v36 = vadd.f32 -1.0, %v932_v18  ;;  %vm543_vm13 = vcmp.gt.f32.partialorder %v1519_v60, 0.0 }
  0xd4   : > { %v936_v49 = vpop.eup %935  ;;  %v729_v6 = vmul.f32 1.050701, %v697_v58  ;;  %v681_v10 = vsel %vm521_vm2, %v1457_v5, %v649_v20  ;;  %v650_v38 = vmul.f32 1.6732632, %v878_v23  ;;  %v879_v52 = vadd.f32 -1.0, %v934_v24 }
  0xd5   : > { %v938_v41 = vpop.eup %937  ;;  %v713_v42 = vmul.f32 1.050701, %v681_v10  ;;  %v698_v37 = vsel %vm538_vm3, %v1460_v35, %v666_v29  ;;  %v667_v47 = vmul.f32 1.6732632, %v895_v36  ;;  %v896_v62 = vadd.f32 -1.0, %v936_v49 }
  0xd6   : > { %777 = vxpose.xlu1.b32.start [1/16] (narrow) %v729_v6, 8  ;;  %v730_v46 = vmul.f32 1.050701, %v698_v37  ;;  %v682_v48 = vsel %vm522_vm4, %v1463_v54, %v650_v38  ;;  %v651_v50 = vmul.f32 1.6732632, %v879_v52  ;;  %v880_v51 = vadd.f32 -1.0, %v938_v41  ;;  %v940_v35 = vpop.eup %939 }
  0xd7   : > { %745 = vxpose.xlu0.b32.start [1/16] (narrow) %v713_v42, 8  ;;  %v714_v5 = vmul.f32 1.050701, %v682_v48  ;;  %v699_v43 = vsel %vm539_vm5, %v1466_v56, %v667_v47  ;;  %v668_v63 = vmul.f32 1.6732632, %v896_v62  ;;  %v457_v54 = vmul.f32 %v1422_v33, %v418_v15  ;;  %v942_v1 = vpop.eup %941 }
  0xd8   : > { %v683_v0 = vsel %vm523_vm6, %v1469_v57, %v651_v50  ;;  %v652_v9 = vmul.f32 1.6732632, %v880_v51  ;;  %v731_v3 = vmul.f32 1.050701, %v699_v43  ;;  %v897_v11 = vadd.f32 -1.0, %v940_v35  ;;  %v944_v56 = vpop.eup %943 }
  0xd9   : > { %v715_v14 = vmul.f32 1.050701, %v683_v0  ;;  %v700_v18 = vsel %vm540_vm7, %v1474_v39, %v668_v63  ;;  %v881_v57 = vadd.f32 -1.0, %v942_v1  ;;  %v599_v20 = vmul.f32 1.442695, %v1557_v53  ;;  %v946_v23 = vpop.eup %945 }
  0xda   : > { %778 = vxpose.xlu1.b32.cont [2/16] (narrow) %v730_v46, 8  ;;  %v684_v15 = vsel %vm524_vm8, %v1477_v59, %v652_v9  ;;  %v669_v13 = vmul.f32 1.6732632, %v897_v11  ;;  %v898_v24 = vadd.f32 -1.0, %v944_v56  ;;  %v1574_v58 = vadd.f32 %v1435_v44, %v457_v54  ;;  %v948_v29 = vpop.eup %947 }
  0xdb   : > { %746 = vxpose.xlu0.b32.cont [2/16] (narrow) %v714_v5, 8  ;;  %v653_v36 = vmul.f32 1.6732632, %v881_v57  ;;  %v882_v49 = vadd.f32 -1.0, %v946_v23  ;;  %951 = vpow2.f32 %v599_v20  ;;  %v435_v39 = vmul.f32 %v1417_v32, %v1355_v61  ;;  %v950_v6 = vpop.eup %949 }
  0xdc   : > { %v701_v10 = vsel %vm541_vm9, %v1503_v2, %v669_v13  ;;  %v670_v38 = vmul.f32 1.6732632, %v898_v24  ;;  %v899_v59 = vadd.f32 -1.0, %v948_v29  ;;  %v732_v52 = vmul.f32 1.050701, %v700_v18 }
  0xdd   : > { %v685_v41 = vsel %vm525_vm10, %v1508_v55, %v653_v36  ;;  %v654_v42 = vmul.f32 1.6732632, %v882_v49  ;;  %v883_v37 = vadd.f32 -1.0, %v950_v6  ;;  %v716_v47 = vmul.f32 1.050701, %v684_v15 }
  0xde   : > { %779 = vxpose.xlu1.b32.cont [3/16] (narrow) %v731_v3, 8  ;;  %v702_v61 = vsel %vm542_vm11, %v1511_v7, %v670_v38  ;;  %v671_v62 = vmul.f32 1.6732632, %v899_v59  ;;  %v474_v2 = vmul.f32 %v1422_v33, %v435_v39  ;;  %v733_v46 = vmul.f32 1.050701, %v701_v10 }
  0xdf   : > { %747 = vxpose.xlu0.b32.cont [3/16] (narrow) %v715_v14, 8  ;;  %v686_v48 = vsel %vm526_vm12, %v1514_v45, %v654_v42  ;;  %vm527_vm14 = vcmp.gt.f32.partialorder %v1522_v40, 0.0  ;;  %v567_v55 = vmul.f32 1.442695, %v1574_v58  ;;  %v717_v50 = vmul.f32 1.050701, %v685_v41 }
  0xe0   : > { %v734_v51 = vmul.f32 1.050701, %v702_v61  ;;  %v1595_v5 = vadd.f32 %v1435_v44, %v474_v2  ;;  %v419_v7 = vmul.f32 %v1417_v32, %v1243_v27  ;;  %v703_v43 = vsel %vm543_vm13, %v1519_v60, %v671_v62 }
  0xe1   : > { %v655_v63 = vmul.f32 1.6732632, %v883_v37  ;;  %953 = vpow2.f32 %v567_v55  ;;  %v436_v45 = vmul.f32 %v1417_v32, %v1362_v4  ;;  %v718_v35 = vmul.f32 1.050701, %v686_v48 }
  0xe2   : > { %780 = vxpose.xlu1.b32.cont [4/16] (narrow) %v732_v52, 8  ;;  %vm544_vm15 = vcmp.gt.f32.partialorder %v1557_v53, 0.0  ;;  %v601_v0 = vmul.f32 1.442695, %v1595_v5  ;;  %v458_v9 = vmul.f32 %v1422_v33, %v419_v7  ;;  %v420_v54 = vmul.f32 %v1417_v32, %v1250_v16 }
  0xe3   : > { %748 = vxpose.xlu0.b32.cont [4/16] (narrow) %v716_v47, 8  ;;  %v475_v27 = vmul.f32 %v1422_v33, %v436_v45  ;;  %v437_v60 = vmul.f32 %v1417_v32, %v1369_v8  ;;  %v421_v1 = vmul.f32 %v1417_v32, %v1257_v19  ;;  %v735_v4 = vmul.f32 1.050701, %v703_v43 }
  0xe4   : > { %955 = vpow2.f32 %v601_v0  ;;  %v1615_v3 = vadd.f32 %v1435_v44, %v458_v9  ;;  %v438_v11 = vmul.f32 %v1417_v32, %v1376_v12  ;;  %v459_v16 = vmul.f32 %v1422_v33, %v420_v54 }
  0xe5   : > { %v952_v56 = vpop.eup %951  ;;  %v1620_v14 = vadd.f32 %v1435_v44, %v475_v27  ;;  %v476_v8 = vmul.f32 %v1422_v33, %v437_v60  ;;  %v460_v18 = vmul.f32 %v1422_v33, %v421_v1  ;;  %v687_v19 = vsel %vm527_vm14, %v1522_v40, %v655_v63 }
  0xe6   : > { %781 = vxpose.xlu1.b32.cont [5/16] (narrow) %v733_v46, 8  ;;  %v900_v57 = vadd.f32 -1.0, %v952_v56  ;;  %v569_v20 = vmul.f32 1.442695, %v1615_v3  ;;  %v477_v12 = vmul.f32 %v1422_v33, %v438_v11  ;;  %v1632_v15 = vadd.f32 %v1435_v44, %v459_v16 }
  0xe7   : > { %749 = vxpose.xlu0.b32.cont [5/16] (narrow) %v717_v50, 8  ;;  %v603_v23 = vmul.f32 1.442695, %v1620_v14  ;;  %v1635_v13 = vadd.f32 %v1435_v44, %v476_v8  ;;  %v422_v24 = vmul.f32 %v1417_v32, %v1264_v22  ;;  %v1640_v40 = vadd.f32 %v1435_v44, %v460_v18 }
  0xe8   : > { %v672_v29 = vmul.f32 1.6732632, %v900_v57  ;;  %957 = vpow2.f32 %v569_v20  ;;  %v1643_v36 = vadd.f32 %v1435_v44, %v477_v12  ;;  %v719_v49 = vmul.f32 1.050701, %v687_v19 }
  0xe9   : > { %959 = vpow2.f32 %v603_v23  ;;  %v571_v39 = vmul.f32 1.442695, %v1632_v15  ;;  %vm528_vm0 = vcmp.gt.f32.partialorder %v1574_v58, 0.0  ;;  %v605_v22 = vmul.f32 1.442695, %v1635_v13 }
  0xea   : > { %782 = vxpose.xlu1.b32.cont [6/16] (narrow) %v734_v51, 8  ;;  %v704_v6 = vsel %vm544_vm15, %v1557_v53, %v672_v29  ;;  %v573_v10 = vmul.f32 1.442695, %v1640_v40  ;;  %vm545_vm1 = vcmp.gt.f32.partialorder %v1595_v5, 0.0  ;;  %v607_v52 = vmul.f32 1.442695, %v1643_v36 }
  0xeb   : > { %750 = vxpose.xlu0.b32.cont [6/16] (narrow) %v718_v35, 8  ;;  %v954_v38 = vpop.eup %953  ;;  %v736_v59 = vmul.f32 1.050701, %v704_v6  ;;  %961 = vpow2.f32 %v571_v39  ;;  %vm529_vm2 = vcmp.gt.f32.partialorder %v1615_v3, 0.0  ;;  %v461_v42 = vmul.f32 %v1422_v33, %v422_v24 }
  0xec   : > { %v884_v41 = vadd.f32 -1.0, %v954_v38  ;;  %963 = vpow2.f32 %v605_v22  ;;  %v439_v53 = vmul.f32 %v1417_v32, %v1383_v17  ;;  %v423_v37 = vmul.f32 %v1417_v32, %v1271_v25 }
  0xed   : > { %965 = vpow2.f32 %v573_v10  ;;  %v440_v47 = vmul.f32 %v1417_v32, %v1390_v21  ;;  %v424_v61 = vmul.f32 %v1417_v32, %v1278_v28  ;;  %v1665_v46 = vadd.f32 %v1435_v44, %v461_v42 }
  0xee   : > { %783 = vxpose.xlu1.b32.cont [7/16] (narrow) %v735_v4, 8  ;;  %v956_v62 = vpop.eup %955  ;;  %v656_v2 = vmul.f32 1.6732632, %v884_v41  ;;  %967 = vpow2.f32 %v607_v52  ;;  %v478_v17 = vmul.f32 %v1422_v33, %v439_v53  ;;  %v462_v55 = vmul.f32 %v1422_v33, %v423_v37 }
  0xef   : > { %751 = vxpose.xlu0.b32.cont [7/16] (narrow) %v719_v49, 8  ;;  %v901_v48 = vadd.f32 -1.0, %v956_v62  ;;  %v479_v25 = vmul.f32 %v1422_v33, %v440_v47  ;;  %v463_v50 = vmul.f32 %v1422_v33, %v424_v61  ;;  %vm546_vm3 = vcmp.gt.f32.partialorder %v1620_v14, 0.0 }
  0xf0   : > { %v688_v28 = vsel %vm528_vm0, %v1574_v58, %v656_v2  ;;  %v575_v21 = vmul.f32 1.442695, %v1665_v46  ;;  %v1677_v51 = vadd.f32 %v1435_v44, %v478_v17  ;;  %v1680_v63 = vadd.f32 %v1435_v44, %v462_v55 }
  0xf1   : > { %v720_v7 = vmul.f32 1.050701, %v688_v28  ;;  %v673_v43 = vmul.f32 1.6732632, %v901_v48  ;;  %v1683_v45 = vadd.f32 %v1435_v44, %v479_v25  ;;  %vm530_vm4 = vcmp.gt.f32.partialorder %v1632_v15, 0.0 }
  0xf2   : > { %784 = vxpose.xlu1.b32.cont [8/16] (narrow) %v736_v59, 8  ;;  %v958_v35 = vpop.eup %957  ;;  %969 = vpow2.f32 %v575_v21  ;;  %v609_v58 = vmul.f32 1.442695, %v1677_v51  ;;  %v1688_v0 = vadd.f32 %v1435_v44, %v463_v50  ;;  %vm547_vm5 = vcmp.gt.f32.partialorder %v1635_v13, 0.0 }
  0xf3   : > { %v960_v9 = vpop.eup %959  ;;  %752 = vxpose.xlu0.b32.cont [8/16] (narrow) %v720_v7, 8  ;;  %v705_v27 = vsel %vm545_vm1, %v1595_v5, %v673_v43  ;;  %v885_v54 = vadd.f32 -1.0, %v958_v35  ;;  %v577_v60 = vmul.f32 1.442695, %v1680_v63  ;;  %vm531_vm6 = vcmp.gt.f32.partialorder %v1640_v40, 0.0 }
  0xf4   : > { %v737_v1 = vmul.f32 1.050701, %v705_v27  ;;  %v902_v4 = vadd.f32 -1.0, %v960_v9  ;;  %971 = vpow2.f32 %v609_v58  ;;  %vm548_vm7 = vcmp.gt.f32.partialorder %v1643_v36, 0.0 }
  0xf5   : > { %v962_v11 = vpop.eup %961  ;;  %v657_v56 = vmul.f32 1.6732632, %v885_v54  ;;  %973 = vpow2.f32 %v577_v60  ;;  %v611_v16 = vmul.f32 1.442695, %v1683_v45  ;;  %v579_v19 = vmul.f32 1.442695, %v1688_v0 }
  0xf6   : > { %v964_v8 = vpop.eup %963  ;;  %785 = vxpose.xlu1.b32.cont [9/16] (narrow) %v737_v1, 8  ;;  %v674_v5 = vmul.f32 1.6732632, %v902_v4  ;;  %v886_v18 = vadd.f32 -1.0, %v962_v11  ;;  %v441_v57 = vmul.f32 %v1417_v32, %v1397_v26  ;;  %v425_v24 = vmul.f32 %v1417_v32, %v1285_v31 }
  0xf7   : > { %v966_v20 = vpop.eup %965  ;;  %v689_v12 = vsel %vm529_vm2, %v1615_v3, %v657_v56  ;;  %v903_v23 = vadd.f32 -1.0, %v964_v8  ;;  %975 = vpow2.f32 %v611_v16  ;;  %v442_v53 = vmul.f32 %v1417_v32, %v1404_v30 }
  0xf8   : > { %v968_v29 = vpop.eup %967  ;;  %v721_v49 = vmul.f32 1.050701, %v689_v12  ;;  %v706_v39 = vsel %vm546_vm3, %v1620_v14, %v674_v5  ;;  %v658_v6 = vmul.f32 1.6732632, %v886_v18  ;;  %v887_v22 = vadd.f32 -1.0, %v966_v20 }
  0xf9   : > { %v738_v10 = vmul.f32 1.050701, %v706_v39  ;;  %v675_v26 = vmul.f32 1.6732632, %v903_v23  ;;  %v904_v38 = vadd.f32 -1.0, %v968_v29  ;;  %977 = vpow2.f32 %v579_v19 }
  0xfa   : > { %753 = vxpose.xlu0.b32.cont [9/16] (narrow) %v721_v49, 8  ;;  %v690_v3 = vsel %vm530_vm4, %v1632_v15, %v658_v6  ;;  %v659_v59 = vmul.f32 1.6732632, %v887_v22  ;;  %v480_v31 = vmul.f32 %v1422_v33, %v441_v57  ;;  %v464_v52 = vmul.f32 %v1422_v33, %v425_v24 }
  0xfb   : > { %786 = vxpose.xlu1.b32.cont [10/16] (narrow) %v738_v10, 8  ;;  %v722_v41 = vmul.f32 1.050701, %v690_v3  ;;  %v707_v14 = vsel %vm547_vm5, %v1635_v13, %v675_v26  ;;  %v676_v42 = vmul.f32 1.6732632, %v904_v38  ;;  %vm532_vm8 = vcmp.gt.f32.partialorder %v1665_v46, 0.0 }
  0xfc   : > { %v970_v37 = vpop.eup %969  ;;  %v739_v47 = vmul.f32 1.050701, %v707_v14  ;;  %v691_v15 = vsel %vm531_vm6, %v1640_v40, %v659_v59  ;;  %v1723_v61 = vadd.f32 %v1435_v44, %v480_v31  ;;  %v1726_v62 = vadd.f32 %v1435_v44, %v464_v52 }
  0xfd   : > { %v708_v13 = vsel %vm548_vm7, %v1643_v36, %v676_v42  ;;  %v888_v2 = vadd.f32 -1.0, %v970_v37  ;;  %v481_v30 = vmul.f32 %v1422_v33, %v442_v53  ;;  %v723_v48 = vmul.f32 1.050701, %v691_v15 }
  0xfe   : > { %v972_v17 = vpop.eup %971  ;;  %754 = vxpose.xlu0.b32.cont [10/16] (narrow) %v722_v41, 8  ;;  %vm549_vm9 = vcmp.gt.f32.partialorder %v1677_v51, 0.0  ;;  %v613_v40 = vmul.f32 1.442695, %v1723_v61  ;;  %v426_v55 = vmul.f32 %v1417_v32, %v1292_v34  ;;  %v740_v50 = vmul.f32 1.050701, %v708_v13 }
  0xff   : > { %v974_v25 = vpop.eup %973  ;;  %787 = vxpose.xlu1.b32.cont [11/16] (narrow) %v739_v47, 8  ;;  %v660_v28 = vmul.f32 1.6732632, %v888_v2  ;;  %v905_v36 = vadd.f32 -1.0, %v972_v17  ;;  %v520_v21 = vadd.f32 %v1435_v44, %v481_v30  ;;  %v581_v43 = vmul.f32 1.442695, %v1726_v62 }
 0x100   : > { %v889_v7 = vadd.f32 -1.0, %v974_v25  ;;  %979 = vpow2.f32 %v613_v40  ;;  %v465_v35 = vmul.f32 %v1422_v33, %v426_v55  ;;  %vm533_vm10 = vcmp.gt.f32.partialorder %v1680_v63, 0.0 }
 0x101   : > { %v976_v58 = vpop.eup %975  ;;  %v692_v9 = vsel %vm532_vm8, %v1665_v46, %v660_v28  ;;  %v677_v27 = vmul.f32 1.6732632, %v905_v36  ;;  %v615_v34 = vmul.f32 1.442695, %v520_v21  ;;  %981 = vpow2.f32 %v581_v43 }
 0x102   : > { %755 = vxpose.xlu0.b32.cont [11/16] (narrow) %v723_v48, 8  ;;  %v724_v32 = vmul.f32 1.050701, %v692_v9  ;;  %v661_v54 = vmul.f32 1.6732632, %v889_v7  ;;  %v906_v60 = vadd.f32 -1.0, %v976_v58  ;;  %v504_v46 = vadd.f32 %v1435_v44, %v465_v35 }
 0x103   : > { %v978_v1 = vpop.eup %977  ;;  %788 = vxpose.xlu1.b32.cont [12/16] (narrow) %v740_v50, 8  ;;  %v709_v33 = vsel %vm549_vm9, %v1677_v51, %v677_v27  ;;  %vm550_vm11 = vcmp.gt.f32.partialorder %v1683_v45, 0.0  ;;  %983 = vpow2.f32 %v615_v34  ;;  %vm534_vm12 = vcmp.gt.f32.partialorder %v1688_v0, 0.0 }
 0x104   : > { %v741_v4 = vmul.f32 1.050701, %v709_v33  ;;  %v693_v11 = vsel %vm533_vm10, %v1680_v63, %v661_v54  ;;  %v678_v56 = vmul.f32 1.6732632, %v906_v60  ;;  %v890_v16 = vadd.f32 -1.0, %v978_v1 }
 0x105   : > { %v583_v8 = vmul.f32 1.442695, %v504_v46  ;;  %v725_v5 = vmul.f32 1.050701, %v693_v11  ;;  %vm551_vm13 = vcmp.gt.f32.partialorder %v1723_v61, 0.0  ;;  %vm535_vm14 = vcmp.gt.f32.partialorder %v1726_v62, 0.0 }
 0x106   : > { %756 = vxpose.xlu0.b32.cont [12/16] (narrow) %v724_v32, 8  ;;  %v710_v18 = vsel %vm550_vm11, %v1683_v45, %v678_v56  ;;  %v662_v19 = vmul.f32 1.6732632, %v890_v16  ;;  %vm552_vm15 = vcmp.gt.f32.partialorder %v520_v21, 0.0  ;;  %vm536_vm0 = vcmp.gt.f32.partialorder %v504_v46, 0.0 }
 0x107   : > { %789 = vxpose.xlu1.b32.cont [13/16] (narrow) %v741_v4, 8  ;;  %v742_v51 = vmul.f32 1.050701, %v710_v18  ;;  %985 = vpow2.f32 %v583_v8 }
 0x108   : > { %v694_v57 = vsel %vm534_vm12, %v1688_v0, %v662_v19 }
 0x109   : > { %v726_v44 = vmul.f32 1.050701, %v694_v57 }
 0x10a   : > { %v980_v20 = vpop.eup %979  ;;  %757 = vxpose.xlu0.b32.cont [13/16] (narrow) %v725_v5, 8 }
 0x10b   : > { %790 = vxpose.xlu1.b32.cont [14/16] (narrow) %v742_v51, 8  ;;  %v907_v63 = vadd.f32 -1.0, %v980_v20  ;;  %v982_v12 = vpop.eup %981 }
 0x10c   : > { %v891_v29 = vadd.f32 -1.0, %v982_v12 }
 0x10d   : > { %v984_v23 = vpop.eup %983  ;;  %v679_v24 = vmul.f32 1.6732632, %v907_v63 }
 0x10e   : > { %758 = vxpose.xlu0.b32.cont [14/16] (narrow) %v726_v44, 8  ;;  %v908_v45 = vadd.f32 -1.0, %v984_v23  ;;  %v663_v39 = vmul.f32 1.6732632, %v891_v29 }
 0x10f   : > { %v711_v49 = vsel %vm551_vm13, %v1723_v61, %v679_v24 }
 0x110   : > { %v743_v0 = vmul.f32 1.050701, %v711_v49  ;;  %v680_v6 = vmul.f32 1.6732632, %v908_v45  ;;  %v695_v10 = vsel %vm535_vm14, %v1726_v62, %v663_v39 }
 0x111   : > { %v986_v22 = vpop.eup %985  ;;  %v727_v26 = vmul.f32 1.050701, %v695_v10 }
 0x112   : > { %791 = vxpose.xlu1.b32.cont [15/16] (narrow) %v743_v0, 8  ;;  %v712_v38 = vsel %vm552_vm15, %v520_v21, %v680_v6  ;;  %v892_v3 = vadd.f32 -1.0, %v986_v22 }
 0x113   : > { %v744_v59 = vmul.f32 1.050701, %v712_v38  ;;  %759 = vxpose.xlu0.b32.cont [15/16] (narrow) %v727_v26, 8 }
 0x114   : > { %v664_v31 = vmul.f32 1.6732632, %v892_v3 }
 0x116   : > { %792 = vxpose.xlu1.b32.end [16/16] (narrow) %v744_v59, 8  ;;  %v696_v52 = vsel %vm536_vm0, %v504_v46, %v664_v31 }
 0x117   : > { %v728_v41 = vmul.f32 1.050701, %v696_v52 }
 0x119   : > { %760 = vxpose.xlu0.b32.end [16/16] (narrow) %v728_v41, 8 }
 0x15a   : > { %v793_v14 = vpop.trf.xlu1 }
 0x15b   : > { %810 = vst [vmem:[%s170_s25 + $0x8] sm:$0xff] %v793_v14 }
 0x15d   : > { %v761_v42 = vpop.trf.xlu0 }
 0x15e   : > { %809 = vst [vmem:[%s170_s25] sm:$0xff] %v761_v42 }
 0x15f PF: > { %s13_s12 = sadd.s32 1, %s993_s12  }
 0x160   : > { %p10_p4 = scmp.ge.s32.totalorder %s13_s12, 4  }
 0x162   :  { %12 = sbr.rel (!%p10_p4) target bundleno = 1 (0x1), region = 62 }

// kernel: a_call__.2
= control target key start
LH: loop header
LB: loop body
LE: loop exit
PB: predicated region body
PF: predicated region fallthrough
CT: control target
= control target key end

     0   :  { %s6203_s9 = smov 0   ;;  %s7987_s0 = inlined_call_operand.vmem [shape: bf16[2,18,18,4], index: 0, kind: input, shape index: {}]   ;;  %s7988_s1 = inlined_call_operand.vmem [shape: bf16[9,4,8], index: 1, kind: input, shape index: {}]   ;;  %s7989_s2 = inlined_call_operand.vmem [shape: f32[2,256,8], index: 2, kind: output, shape index: {}]  }
   0x1 LB: > { %s4792_s10 = sadd.s32 4294967295, %s6186_s9   ;;  %p4796_p0 = scmp.ge.s32.totalorder %s6186_s9, 1  ;;  %s6186_s9 = sphi %s6203_s9, %s12_s9  }
   0x2   : > { %p112_p1 = scmp.lt.s32.totalorder %s6186_s9, 3 }
   0x4   : > { %p113_p2 = pnand %p4796_p0, %p112_p1 }
   0x6   : > { %116 = sbr.rel (%p113_p2) target bundleno = 583 (0x247), region = 28 }
   0xd   : > { %v4800_v0 = vld [vmem:[%s7988_s1 + $0x2] sm:$0x3]  ;;  %vm680_vm0 = vcmask 1041408   ;;  %v5027_v1 = vld [vmem:[%s7988_s1 + $0x8] sm:$0x3]  ;;  %p134_p3 = scmp.lt.s32.totalorder %s4792_s10, 1 }
   0xe   : > { %6056 = vmatprep.subr.msk.bf16.mxu1 %vm680_vm0, %v4800_v0  ;;  %6060 = vmatprep.subr.msk.bf16.mxu0 %vm680_vm0, %v5027_v1  ;;  %v682_v2 = vsel %vm680_vm0, %v4800_v0, 0  ;;  %v6221_v3 = vsel %vm680_vm0, %v5027_v1, 0  ;;  %v177_v4 = vld [vmem:[%s7988_s1] sm:$0x3]  ;;  %v5092_v5 = vld [vmem:[%s7988_s1 + $0xa] sm:$0x3] }
   0xf   : > { %8003 = vst [vmem:[#allocation2_spill] sm:$0xff] %v6221_v3  ;;  %5493 = vmatpush3.bf16.msra.mxu1 %v682_v2  ;;  %5629 = vmatpush3.bf16.msra.mxu0 %v6221_v3  ;;  %s8058_s10 = smov (!%p134_p3, %s4792_s10), 1  ;;  %vm194_vm1 = vsmask.f32 3328  ;;  %vm195_vm2 = vsmask.f32 7440 }
  0x10   : > { %6057 = vmatprep.subr.msk.bf16.mxu1 %vm680_vm0, %v177_v4  ;;  %6062 = vmatprep.subr.msk.bf16.mxu0 %vm680_vm0, %v5092_v5  ;;  %s6066_s19 = smul.u32 216, %s8058_s10  ;;  %vm631_vm3 = vcmask 31744   ;;  %v6251_v17 = vsel %vm680_vm0, %v177_v4, 0  ;;  %v6257_v26 = vld [vmem:[%s7988_s1 + $0xc] sm:$0x3]  ;;  %vm6264_vm4 = vmor %vm194_vm1, %vm195_vm2  ;;  %v6270_v37 = vsel %vm680_vm0, %v5092_v5, 0 }
  0x11   : > { %v6274_v41 = vsel %vm680_vm0, %v6257_v26, 0  ;;  %vm1185_vm5 = vcmask 1042432   ;;  %vm1186_vm6 = vcmask 1046532   ;;  %s5338_s11 = sshll.u32 %s8058_s10, 8  ;;  %vm4704_vm8 = vcmask 64512  }
  0x12   : > { %s6238_s22 = scalar_lea.vmem %s7987_s0, %s6066_s19  ;;  %vm6490_vm7 = vmor %vm1185_vm5, %vm1186_vm6  ;;  %s7918_s14 = scalar_lea.vmem %s7989_s2, %s5338_s11 }
  0x13   : > { %v145_v6 = vld [vmem:[%s6238_s22] sm:$0xf]  ;;  %v146_v7 = vld [vmem:[%s6238_s22 + $0x4] sm:$0xf]  ;;  %v178_v8 = vld [vmem:[%s6238_s22 + $0x8] sm:$0x1] }
  0x14   : > { %v198_v9 = vshrl.u32 %v145_v6, 16  ;;  %v201_v10 = vshll.u32 %v145_v6, 16  ;;  %v207_v11 = vshll.u32 %v146_v7, 16  ;;  %v211_v12 = vshrl.u32 %v146_v7, 16  ;;  %v4979_v13 = vld [vmem:[%s6238_s22 + $0xc] sm:$0xf] }
  0x15   : > { %v217_v14 = vshll.u32 %v178_v8, 16  ;;  %v6245_v15 = vld [vmem:[%s6238_s22 + $0x10] sm:$0xf]  ;;  %v6248_v16 = vld [vmem:[%s6238_s22 + $0x14] sm:$0x1]  ;;  %v2002_v23 = vshrl.u32 %v4979_v13, 16 }
  0x16   : > { %v200_v18 = vrot.slane %v198_v9, 4  ;;  %v203_v19 = vrot.slane %v201_v10, 5  ;;  %v209_v20 = vrot.slane %v207_v11, 5  ;;  %v213_v21 = vrot.slane %v211_v12, 4  ;;  %v147_v31 = vld [vmem:[%s6238_s22 + $0xc] sm:$0xf] }
  0x17   : > { %v219_v22 = vrot.slane %v217_v14, 5  ;;  %v2005_v24 = vshll.u32 %v4979_v13, 16  ;;  %v2011_v25 = vshll.u32 %v6245_v15, 16  ;;  %v2015_v29 = vshrl.u32 %v6245_v15, 16  ;;  %v148_v36 = vld [vmem:[%s6238_s22 + $0x10] sm:$0xf] }
  0x18   : > { %v204_v27 = vor.u32 %v203_v19, %v200_v18  ;;  %v214_v28 = vor.u32 %v213_v21, %v209_v20  ;;  %v2021_v30 = vshll.u32 %v6248_v16, 16  ;;  %v2004_v33 = vrot.slane %v2002_v23, 4  ;;  %v179_v44 = vld [vmem:[%s6238_s22 + $0x14] sm:$0x1]  ;;  %v4982_v55 = vld [vmem:[%s6238_s22 + $0x18] sm:$0xf] }
  0x19   : > { %v2007_v34 = vrot.slane %v2005_v24, 5  ;;  %v2013_v35 = vrot.slane %v2011_v25, 5  ;;  %v2017_v40 = vrot.slane %v2015_v29, 4  ;;  %v222_v45 = vshrl.u32 %v147_v31, 16  ;;  %v6283_v60 = vld [vmem:[%s6238_s22 + $0x1c] sm:$0xf] }
  0x1a   : > { %v205_v38 = vrot.slane %v204_v27, 4  ;;  %v215_v39 = vrot.slane %v214_v28, 4  ;;  %v2023_v43 = vrot.slane %v2021_v30, 5  ;;  %v225_v46 = vshll.u32 %v147_v31, 16  ;;  %v6291_v1 = vld [vmem:[%s6238_s22 + $0x20] sm:$0x1] }
  0x1b   : > { %v2008_v42 = vor.u32 %v2007_v34, %v2004_v33  ;;  %v2018_v49 = vor.u32 %v2017_v40, %v2013_v35  ;;  %v231_v50 = vshll.u32 %v148_v36, 16  ;;  %v224_v53 = vrot.slane %v222_v45, 4  ;;  %v149_v18 = vld [vmem:[%s6238_s22 + $0x18] sm:$0xf]  ;;  %v150_v23 = vld [vmem:[%s6238_s22 + $0x1c] sm:$0xf] }
  0x1c   : > { %v210_v47 = vsel %vm6264_vm4, %v205_v38, %v209_v20  ;;  %v220_v48 = vsel %vm6264_vm4, %v215_v39, %v219_v22  ;;  %v227_v54 = vrot.slane %v225_v46, 5  ;;  %v235_v58 = vshrl.u32 %v148_v36, 16  ;;  %v180_v31 = vld [vmem:[%s6238_s22 + $0x20] sm:$0x1]  ;;  %v4985_v40 = vld [vmem:[%s6238_s22 + $0x24] sm:$0xf] }
  0x1d   : > { %v4801_v51 = vcombine.low %v210_v47, %v220_v48  ;;  %v2009_v52 = vrot.slane %v2008_v42, 4  ;;  %v2019_v56 = vrot.slane %v2018_v49, 4  ;;  %v233_v57 = vrot.slane %v231_v50, 5  ;;  %v6314_v46 = vld [vmem:[%s6238_s22 + $0x28] sm:$0xf] }
  0x1e   : > { %v241_v59 = vshll.u32 %v179_v44, 16  ;;  %v2745_v62 = vrot.slane %v6245_v15, 5  ;;  %v2748_v63 = vrot.slane %v6248_v16, 5  ;;  %v228_v0 = vor.u32 %v227_v54, %v224_v53  ;;  %v6323_v54 = vld [vmem:[%s6238_s22 + $0x2c] sm:$0x1] }
  0x1f   : > { %5494 = vmatprep.mubr.msk.bf16.mxu1 %vm631_vm3, %v4801_v51  ;;  %v2014_v61 = vsel %vm6264_vm4, %v2009_v52, %v2013_v35  ;;  %v2024_v2 = vsel %vm6264_vm4, %v2019_v56, %v2023_v43  ;;  %v237_v4 = vrot.slane %v235_v58, 4  ;;  %v2026_v6 = vshrl.u32 %v4982_v55, 16  ;;  %v4881_v51 = vld [vmem:[%s7988_s1 + $0x4] sm:$0x3]  ;;  %v6523_v16 = vld [vmem:[%s6238_s22 + $0x7c] sm:$0xf] }
  0x20   : > { %v243_v5 = vrot.slane %v241_v59, 5  ;;  %v5028_v7 = vcombine.low %v2014_v61, %v2024_v2  ;;  %v229_v8 = vrot.slane %v228_v0, 4  ;;  %v2029_v9 = vshll.u32 %v4982_v55, 16  ;;  %v151_v0 = vld [vmem:[%s6238_s22 + $0x24] sm:$0xf] }
  0x21   : > { %v2035_v10 = vshll.u32 %v6283_v60, 16  ;;  %v238_v11 = vor.u32 %v237_v4, %v233_v57  ;;  %v2028_v12 = vrot.slane %v2026_v6, 4  ;;  %v2039_v13 = vshrl.u32 %v6283_v60, 16 }
  0x22   : > { %v2045_v14 = vshll.u32 %v6291_v1, 16  ;;  %5630 = vmatprep.mubr.msk.bf16.mxu0 %vm631_vm3, %v5028_v7  ;;  %v234_v19 = vsel %vm6264_vm4, %v229_v8, %v233_v57  ;;  %v2031_v20 = vrot.slane %v2029_v9, 5  ;;  %v2752_v22 = vrot.slane %v6283_v60, 5  ;;  %v152_v7 = vld [vmem:[%s6238_s22 + $0x28] sm:$0xf] }
  0x23   : > { %v2037_v21 = vrot.slane %v2035_v10, 5  ;;  %v239_v24 = vrot.slane %v238_v11, 4  ;;  %v2041_v25 = vrot.slane %v2039_v13, 4  ;;  %v2755_v28 = vrot.slane %v6291_v1, 5  ;;  %v181_v13 = vld [vmem:[%s6238_s22 + $0x2c] sm:$0x1] }
  0x24   : > { %v2047_v27 = vrot.slane %v2045_v14, 5  ;;  %v2032_v29 = vor.u32 %v2031_v20, %v2028_v12  ;;  %v6307_v30 = vrot.slane %v2752_v22, 4  ;;  %v246_v33 = vshrl.u32 %v149_v18, 16 }
  0x25   : > { %v249_v34 = vshll.u32 %v149_v18, 16  ;;  %v244_v35 = vsel %vm6264_vm4, %v239_v24, %v243_v5  ;;  %v2042_v36 = vor.u32 %v2041_v25, %v2037_v21  ;;  %v255_v38 = vshll.u32 %v150_v23, 16  ;;  %v4988_v24 = vld [vmem:[%s6238_s22 + $0x30] sm:$0xf] }
  0x26   : > { %v259_v39 = vshrl.u32 %v150_v23, 16  ;;  %v4802_v42 = vcombine.low %v234_v19, %v244_v35  ;;  %v2033_v43 = vrot.slane %v2032_v29, 4  ;;  %v248_v44 = vrot.slane %v246_v33, 4  ;;  %v6343_v33 = vld [vmem:[%s6238_s22 + $0x34] sm:$0xf] }
  0x27   : > { %v251_v45 = vrot.slane %v249_v34, 5  ;;  %v2043_v47 = vrot.slane %v2042_v36, 4  ;;  %v257_v48 = vrot.slane %v255_v38, 5  ;;  %v265_v50 = vshll.u32 %v180_v31, 16 }
  0x28   : > { %v261_v49 = vrot.slane %v259_v39, 4  ;;  %5495 = vmatmul.mubr.msk.bf16.vlgmr.msra.gmra.mrb[0].mxu1 %vm631_vm3, %v4802_v42  ;;  %v2038_v52 = vsel %vm6264_vm4, %v2033_v43, %v2037_v21  ;;  %v2050_v55 = vshrl.u32 %v4985_v40, 16  ;;  %v2053_v56 = vshll.u32 %v4985_v40, 16  ;;  %v6351_v40 = vld [vmem:[%s6238_s22 + $0x38] sm:$0x1] }
  0x29   : > { %v252_v53 = vor.u32 %v251_v45, %v248_v44  ;;  %5527 = vmatpush3.bf16.msra.mxu1 %v6251_v17  ;;  %v2048_v57 = vsel %vm6264_vm4, %v2043_v47, %v2047_v27  ;;  %v267_v59 = vrot.slane %v265_v50, 5  ;;  %v2059_v61 = vshll.u32 %v6314_v46, 16 }
  0x2a   : > { %v262_v58 = vor.u32 %v261_v49, %v257_v48  ;;  %v5029_v2 = vcombine.low %v2038_v52, %v2048_v57  ;;  %v2052_v5 = vrot.slane %v2050_v55, 4  ;;  %v2055_v6 = vrot.slane %v2053_v56, 5  ;;  %6058 = vmatprep.subr.msk.bf16.mxu1 %vm680_vm0, %v4881_v51  ;;  %v153_v52 = vld [vmem:[%s6238_s22 + $0x30] sm:$0xf] }
  0x2b   : > { %v253_v4 = vrot.slane %v252_v53, 4  ;;  %v2061_v9 = vrot.slane %v2059_v61, 5  ;;  %v2063_v17 = vshrl.u32 %v6314_v46, 16  ;;  %v2069_v10 = vshll.u32 %v6323_v54, 16 }
  0x2c   : > { %v263_v8 = vrot.slane %v262_v58, 4  ;;  %5631 = vmatmul.mubr.msk.bf16.vlgmr.msra.gmra.mrb[0].mxu0 %vm631_vm3, %v5029_v2  ;;  %v2056_v12 = vor.u32 %v2055_v6, %v2052_v5  ;;  %v270_v14 = vshrl.u32 %v151_v0, 16  ;;  %v273_v18 = vshll.u32 %v151_v0, 16  ;;  %v154_v58 = vld [vmem:[%s6238_s22 + $0x34] sm:$0xf] }
  0x2d   : > { %v258_v11 = vsel %vm6264_vm4, %v253_v4, %v257_v48  ;;  %5663 = vmatpush3.bf16.msra.mxu0 %v6270_v37  ;;  %v2065_v20 = vrot.slane %v2063_v17, 4  ;;  %v2071_v21 = vrot.slane %v2069_v10, 5  ;;  %v279_v23 = vshll.u32 %v152_v7, 16  ;;  %v182_v4 = vld [vmem:[%s6238_s22 + $0x38] sm:$0x1] }
  0x2e   : > { %v268_v19 = vsel %vm6264_vm4, %v263_v8, %v267_v59  ;;  %v2057_v27 = vrot.slane %v2056_v12, 4  ;;  %v272_v29 = vrot.slane %v270_v14, 4  ;;  %v275_v31 = vrot.slane %v273_v18, 5  ;;  %6063 = vmatprep.subr.msk.bf16.mxu0 %vm680_vm0, %v6257_v26  ;;  %v4991_v12 = vld [vmem:[%s6238_s22 + $0x3c] sm:$0xf] }
  0x2f   : > { %v4803_v25 = vcombine.low %v258_v11, %v268_v19  ;;  %v2066_v34 = vor.u32 %v2065_v20, %v2061_v9  ;;  %v281_v35 = vrot.slane %v279_v23, 5  ;;  %v283_v37 = vshrl.u32 %v152_v7, 16  ;;  %v6368_v20 = vld [vmem:[%s6238_s22 + $0x40] sm:$0xf] }
  0x30   : > { %v289_v36 = vshll.u32 %v181_v13, 16  ;;  %v2062_v38 = vsel %vm6264_vm4, %v2057_v27, %v2061_v9  ;;  %v276_v39 = vor.u32 %v275_v31, %v272_v29  ;;  %v2074_v42 = vshrl.u32 %v4988_v24, 16 }
  0x31   : > { %5498 = vmatprep.mubr.msk.bf16.mxu1 %vm631_vm3, %v4803_v25  ;;  %v2077_v43 = vshll.u32 %v4988_v24, 16  ;;  %v2067_v44 = vrot.slane %v2066_v34, 4  ;;  %v285_v45 = vrot.slane %v283_v37, 4  ;;  %v2083_v26 = vshll.u32 %v6343_v33, 16  ;;  %v6373_v34 = vld [vmem:[%s6238_s22 + $0x44] sm:$0x1] }
  0x32   : > { %v291_v47 = vrot.slane %v289_v36, 5  ;;  %v277_v48 = vrot.slane %v276_v39, 4  ;;  %v2076_v49 = vrot.slane %v2074_v42, 4  ;;  %v2087_v51 = vshrl.u32 %v6343_v33, 16  ;;  %v155_v42 = vld [vmem:[%s6238_s22 + $0x3c] sm:$0xf] }
  0x33   : > { %v2079_v50 = vrot.slane %v2077_v43, 5  ;;  %v2072_v53 = vsel %vm6264_vm4, %v2067_v44, %v2071_v21  ;;  %v286_v55 = vor.u32 %v285_v45, %v281_v35  ;;  %v2085_v56 = vrot.slane %v2083_v26, 5  ;;  %v156_v26 = vld [vmem:[%s6238_s22 + $0x40] sm:$0xf] }
  0x34   : > { %v2093_v57 = vshll.u32 %v6351_v40, 16  ;;  %v5030_v59 = vcombine.low %v2062_v38, %v2072_v53  ;;  %v282_v61 = vsel %vm6264_vm4, %v277_v48, %v281_v35  ;;  %v2089_v2 = vrot.slane %v2087_v51, 4 }
  0x35   : > { %v2080_v0 = vor.u32 %v2079_v50, %v2076_v49  ;;  %v287_v5 = vrot.slane %v286_v55, 4  ;;  %v294_v7 = vshrl.u32 %v153_v52, 16  ;;  %v297_v8 = vshll.u32 %v153_v52, 16 }
  0x36   : > { %v2095_v6 = vrot.slane %v2093_v57, 5  ;;  %5634 = vmatprep.mubr.msk.bf16.mxu0 %vm631_vm3, %v5030_v59  ;;  %v2090_v17 = vor.u32 %v2089_v2, %v2085_v56  ;;  %v303_v10 = vshll.u32 %v154_v58, 16  ;;  %v307_v11 = vshrl.u32 %v154_v58, 16  ;;  %v4994_v2 = vld [vmem:[%s6238_s22 + $0x48] sm:$0xf] }
  0x37   : > { %v2081_v9 = vrot.slane %v2080_v0, 4  ;;  %v292_v13 = vsel %vm6264_vm4, %v287_v5, %v291_v47  ;;  %v296_v14 = vrot.slane %v294_v7, 4  ;;  %v299_v18 = vrot.slane %v297_v8, 5  ;;  %v6391_v8 = vld [vmem:[%s6238_s22 + $0x4c] sm:$0xf] }
  0x38   : > { %v313_v19 = vshll.u32 %v182_v4, 16  ;;  %v4804_v21 = vcombine.low %v282_v61, %v292_v13  ;;  %v2091_v24 = vrot.slane %v2090_v17, 4  ;;  %v305_v25 = vrot.slane %v303_v10, 5  ;;  %v183_v61 = vld [vmem:[%s6238_s22 + $0x44] sm:$0x1] }
  0x39   : > { %v2086_v23 = vsel %vm6264_vm4, %v2081_v9, %v2085_v56  ;;  %v300_v27 = vor.u32 %v299_v18, %v296_v14  ;;  %v309_v29 = vrot.slane %v307_v11, 4  ;;  %v2098_v35 = vshrl.u32 %v4991_v12, 16 }
  0x3a   : > { %v315_v31 = vrot.slane %v313_v19, 5  ;;  %5499 = vmatmul.mubr.msk.bf16.gmra.mrb[4].mxu1 %vm631_vm3, %v4804_v21  ;;  %v2096_v37 = vsel %vm6264_vm4, %v2091_v24, %v2095_v6  ;;  %v2101_v36 = vshll.u32 %v4991_v12, 16  ;;  %v2107_v38 = vshll.u32 %v6368_v20, 16 }
  0x3b   : > { %v2111_v39 = vshrl.u32 %v6368_v20, 16  ;;  %v5031_v43 = vcombine.low %v2086_v23, %v2096_v37  ;;  %v301_v44 = vrot.slane %v300_v27, 4  ;;  %v310_v45 = vor.u32 %v309_v29, %v305_v25  ;;  %v6399_v23 = vld [vmem:[%s6238_s22 + $0x50] sm:$0x1]  ;;  %v6403_v27 = vld [vmem:[%s6238_s22 + $0x48] sm:$0xf] }
  0x3c   : > { %v2100_v47 = vrot.slane %v2098_v35, 4  ;;  %v2103_v48 = vrot.slane %v2101_v36, 5  ;;  %v2109_v49 = vrot.slane %v2107_v38, 5  ;;  %v2117_v51 = vshll.u32 %v6373_v34, 16  ;;  %v6406_v36 = vld [vmem:[%s6238_s22 + $0x4c] sm:$0xf] }
  0x3d   : > { %v2113_v50 = vrot.slane %v2111_v39, 4  ;;  %5635 = vmatmul.mubr.msk.bf16.gmra.mrb[4].mxu0 %vm631_vm3, %v5031_v43  ;;  %v306_v52 = vsel %vm6264_vm4, %v301_v44, %v305_v25  ;;  %v311_v53 = vrot.slane %v310_v45, 4  ;;  %v318_v55 = vshrl.u32 %v155_v42, 16 }
  0x3e   : > { %v321_v56 = vshll.u32 %v155_v42, 16  ;;  %v2104_v57 = vor.u32 %v2103_v48, %v2100_v47  ;;  %v2119_v59 = vrot.slane %v2117_v51, 5  ;;  %v327_v0 = vshll.u32 %v156_v26, 16 }
  0x3f   : > { %v2114_v58 = vor.u32 %v2113_v50, %v2109_v49  ;;  %v316_v4 = vsel %vm6264_vm4, %v311_v53, %v315_v31  ;;  %v320_v5 = vrot.slane %v318_v55, 4  ;;  %v331_v7 = vshrl.u32 %v156_v26, 16  ;;  %v184_v26 = vld [vmem:[%s6238_s22 + $0x50] sm:$0x1]  ;;  %v4997_v53 = vld [vmem:[%s6238_s22 + $0x54] sm:$0xf] }
  0x40   : > { %v323_v6 = vrot.slane %v321_v56, 5  ;;  %v4805_v9 = vcombine.low %v306_v52, %v316_v4  ;;  %v2105_v17 = vrot.slane %v2104_v57, 4  ;;  %v329_v11 = vrot.slane %v327_v0, 5  ;;  %v6422_v4 = vld [vmem:[%s6238_s22 + $0x58] sm:$0xf] }
  0x41   : > { %v2115_v10 = vrot.slane %v2114_v58, 4  ;;  %v333_v13 = vrot.slane %v331_v7, 4  ;;  %v337_v14 = vshll.u32 %v183_v61, 16  ;;  %v2122_v18 = vshrl.u32 %v4994_v2, 16 }
  0x42   : > { %v324_v12 = vor.u32 %v323_v6, %v320_v5  ;;  %5502 = vmatprep.mubr.msk.bf16.mxu1 %vm631_vm3, %v4805_v9  ;;  %v2110_v19 = vsel %vm6264_vm4, %v2105_v17, %v2109_v49  ;;  %v2125_v24 = vshll.u32 %v4994_v2, 16  ;;  %v2131_v25 = vshll.u32 %v6391_v8, 16 }
  0x43   : > { %v2120_v21 = vsel %vm6264_vm4, %v2115_v10, %v2119_v59  ;;  %v334_v35 = vor.u32 %v333_v13, %v329_v11  ;;  %v339_v37 = vrot.slane %v337_v14, 5  ;;  %v2124_v38 = vrot.slane %v2122_v18, 4 }
  0x44   : > { %v5032_v29 = vcombine.low %v2110_v19, %v2120_v21  ;;  %v325_v31 = vrot.slane %v324_v12, 4  ;;  %v2127_v39 = vrot.slane %v2125_v24, 5  ;;  %v2133_v42 = vrot.slane %v2131_v25, 5  ;;  %v6428_v12 = vld [vmem:[%s6238_s22 + $0x5c] sm:$0x1] }
  0x45   : > { %v2135_v43 = vshrl.u32 %v6391_v8, 16  ;;  %v335_v45 = vrot.slane %v334_v35, 4  ;;  %v2141_v47 = vshll.u32 %v6399_v23, 16  ;;  %v342_v48 = vshrl.u32 %v6403_v27, 16  ;;  %v6432_v24 = vld [vmem:[%s6238_s22 + $0x54] sm:$0xf] }
  0x46   : > { %5638 = vmatprep.mubr.msk.bf16.mxu0 %vm631_vm3, %v5032_v29  ;;  %v330_v44 = vsel %vm6264_vm4, %v325_v31, %v329_v11  ;;  %v2128_v49 = vor.u32 %v2127_v39, %v2124_v38  ;;  %v345_v51 = vshll.u32 %v6403_v27, 16  ;;  %v351_v52 = vshll.u32 %v6406_v36, 16 }
  0x47   : > { %v2137_v50 = vrot.slane %v2135_v43, 4  ;;  %v340_v55 = vsel %vm6264_vm4, %v335_v45, %v339_v37  ;;  %v2143_v56 = vrot.slane %v2141_v47, 5  ;;  %v344_v57 = vrot.slane %v342_v48, 4  ;;  %v6438_v37 = vld [vmem:[%s6238_s22 + $0x58] sm:$0xf] }
  0x48   : > { %v355_v58 = vshrl.u32 %v6406_v36, 16  ;;  %v4806_v59 = vcombine.low %v330_v44, %v340_v55  ;;  %v2129_v61 = vrot.slane %v2128_v49, 4  ;;  %v347_v2 = vrot.slane %v345_v51, 5 }
  0x49   : > { %v2138_v0 = vor.u32 %v2137_v50, %v2133_v42  ;;  %v353_v5 = vrot.slane %v351_v52, 5  ;;  %v361_v7 = vshll.u32 %v184_v26, 16  ;;  %v2146_v9 = vshrl.u32 %v4997_v53, 16  ;;  %v185_v26 = vld [vmem:[%s6238_s22 + $0x5c] sm:$0x1] }
  0x4a   : > { %v357_v6 = vrot.slane %v355_v58, 4  ;;  %5503 = vmatmul.mubr.msk.bf16.gmra.mrb[8].mxu1 %vm631_vm3, %v4806_v59  ;;  %v2134_v17 = vsel %vm6264_vm4, %v2129_v61, %v2133_v42  ;;  %v348_v11 = vor.u32 %v347_v2, %v344_v57  ;;  %v2149_v13 = vshll.u32 %v4997_v53, 16  ;;  %v5000_v53 = vld [vmem:[%s6238_s22 + $0x60] sm:$0xf]  ;;  %v6452_v59 = vld [vmem:[%s6238_s22 + $0x64] sm:$0xf] }
  0x4b   : > { %v2139_v10 = vrot.slane %v2138_v0, 4  ;;  %v363_v18 = vrot.slane %v361_v7, 5  ;;  %v2148_v19 = vrot.slane %v2146_v9, 4  ;;  %v2155_v21 = vshll.u32 %v6422_v4, 16  ;;  %v6459_v9 = vld [vmem:[%s6238_s22 + $0x68] sm:$0x1] }
  0x4c   : > { %v358_v14 = vor.u32 %v357_v6, %v353_v5  ;;  %v349_v29 = vrot.slane %v348_v11, 4  ;;  %v2151_v31 = vrot.slane %v2149_v13, 5  ;;  %v2159_v35 = vshrl.u32 %v6422_v4, 16 }
  0x4d   : > { %v2144_v25 = vsel %vm6264_vm4, %v2139_v10, %v2143_v56  ;;  %v2157_v42 = vrot.slane %v2155_v21, 5  ;;  %v2165_v43 = vshll.u32 %v6428_v12, 16  ;;  %v366_v48 = vshrl.u32 %v6432_v24, 16 }
  0x4e   : > { %v5033_v38 = vcombine.low %v2134_v17, %v2144_v25  ;;  %v359_v39 = vrot.slane %v358_v14, 4  ;;  %v354_v44 = vsel %vm6264_vm4, %v349_v29, %v353_v5  ;;  %v2152_v45 = vor.u32 %v2151_v31, %v2148_v19  ;;  %v6463_v19 = vld [vmem:[%s6238_s22 + $0x60] sm:$0xf] }
  0x4f   : > { %v2161_v47 = vrot.slane %v2159_v35, 4  ;;  %v2167_v50 = vrot.slane %v2165_v43, 5  ;;  %v369_v51 = vshll.u32 %v6432_v24, 16  ;;  %v375_v52 = vshll.u32 %v6438_v37, 16  ;;  %v6469_v35 = vld [vmem:[%s6238_s22 + $0x64] sm:$0xf] }
  0x50   : > { %5639 = vmatmul.mubr.msk.bf16.gmra.mrb[8].mxu0 %vm631_vm3, %v5033_v38  ;;  %v364_v49 = vsel %vm6264_vm4, %v359_v39, %v363_v18  ;;  %v2153_v56 = vrot.slane %v2152_v45, 4  ;;  %v368_v58 = vrot.slane %v366_v48, 4  ;;  %v379_v2 = vshrl.u32 %v6438_v37, 16 }
  0x51   : > { %v4807_v55 = vcombine.low %v354_v44, %v364_v49  ;;  %v2162_v57 = vor.u32 %v2161_v47, %v2157_v42  ;;  %v371_v61 = vrot.slane %v369_v51, 5  ;;  %v377_v0 = vrot.slane %v375_v52, 5 }
  0x52   : > { %v385_v5 = vshll.u32 %v185_v26, 16  ;;  %v2158_v6 = vsel %vm6264_vm4, %v2153_v56, %v2157_v42  ;;  %v2170_v17 = vshrl.u32 %v5000_v53, 16  ;;  %v2173_v10 = vshll.u32 %v5000_v53, 16 }
  0x53   : > { %5506 = vmatprep.mubr.msk.bf16.mxu1 %vm631_vm3, %v4807_v55  ;;  %v2163_v7 = vrot.slane %v2162_v57, 4  ;;  %v372_v11 = vor.u32 %v371_v61, %v368_v58  ;;  %v381_v13 = vrot.slane %v379_v2, 4  ;;  %v2179_v18 = vshll.u32 %v6452_v59, 16  ;;  %v5060_v58 = vld [vmem:[%s6238_s22 + $0xc] sm:$0xe] }
  0x54   : > { %v387_v14 = vrot.slane %v385_v5, 5  ;;  %v2172_v25 = vrot.slane %v2170_v17, 4  ;;  %v2175_v29 = vrot.slane %v2173_v10, 5  ;;  %v2183_v31 = vshrl.u32 %v6452_v59, 16 }
  0x55   : > { %v2168_v21 = vsel %vm6264_vm4, %v2163_v7, %v2167_v50  ;;  %v373_v39 = vrot.slane %v372_v11, 4  ;;  %v382_v42 = vor.u32 %v381_v13, %v377_v0  ;;  %v2181_v43 = vrot.slane %v2179_v18, 5  ;;  %v186_v50 = vld [vmem:[%s6238_s22 + $0x68] sm:$0x1] }
  0x56   : > { %v5034_v38 = vcombine.low %v2158_v6, %v2168_v21  ;;  %v2176_v44 = vor.u32 %v2175_v29, %v2172_v25  ;;  %v2185_v45 = vrot.slane %v2183_v31, 4  ;;  %v2189_v47 = vshll.u32 %v6459_v9, 16  ;;  %v6497_v29 = vld [vmem:[%s6238_s22 + $0x70] sm:$0xf] }
  0x57   : > { %v390_v26 = vshrl.u32 %v6463_v19, 16  ;;  %v378_v48 = vsel %vm6264_vm4, %v373_v39, %v377_v0  ;;  %v383_v49 = vrot.slane %v382_v42, 4  ;;  %v393_v51 = vshll.u32 %v6463_v19, 16  ;;  %v6484_v0 = vld [vmem:[%s6238_s22 + $0x6c] sm:$0xf] }
  0x58   : > { %5642 = vmatprep.mubr.msk.bf16.mxu0 %vm631_vm3, %v5034_v38  ;;  %v399_v52 = vshll.u32 %v6469_v35, 16  ;;  %v2177_v53 = vrot.slane %v2176_v44, 4  ;;  %v2186_v55 = vor.u32 %v2185_v45, %v2181_v43  ;;  %v2191_v56 = vrot.slane %v2189_v47, 5 }
  0x59   : > { %v392_v57 = vrot.slane %v390_v26, 4  ;;  %v388_v61 = vsel %vm6264_vm4, %v383_v49, %v387_v14  ;;  %v395_v2 = vrot.slane %v393_v51, 5  ;;  %v403_v6 = vshrl.u32 %v6469_v35, 16  ;;  %v187_v26 = vld [vmem:[%s6238_s22 + $0x74] sm:$0x1] }
  0x5a   : > { %v401_v5 = vrot.slane %v399_v52, 5  ;;  %v4808_v7 = vcombine.low %v378_v48, %v388_v61  ;;  %v2182_v17 = vsel %vm6264_vm4, %v2177_v53, %v2181_v43  ;;  %v2187_v10 = vrot.slane %v2186_v55, 4  ;;  %v5061_v48 = vld [vmem:[%s6238_s22 + $0x18] sm:$0xe] }
  0x5b   : > { %v409_v11 = vshll.u32 %v186_v50, 16  ;;  %v396_v14 = vor.u32 %v395_v2, %v392_v57  ;;  %v405_v18 = vrot.slane %v403_v6, 4  ;;  %v5076_v21 = vrot.slane %v5060_v58, 9  ;;  %v6516_v53 = vld [vmem:[%s6238_s22 + $0x78] sm:$0xf] }
  0x5c   : > { %v2747_v25 = vrot.slane %v2745_v62, 4  ;;  %5507 = vmatmul.mubr.msk.bf16.gmra.mrb[12].mxu1 %vm631_vm3, %v4808_v7  ;;  %v2192_v31 = vsel %vm6264_vm4, %v2187_v10, %v2191_v56  ;;  %v414_v39 = vshrl.u32 %v6484_v0, 16  ;;  %v417_v42 = vshll.u32 %v6484_v0, 16  ;;  %v188_v57 = vld [vmem:[%s6238_s22 + $0x80] sm:$0x1] }
  0x5d   : > { %v411_v38 = vrot.slane %v409_v11, 5  ;;  %v5035_v43 = vcombine.low %v2182_v17, %v2192_v31  ;;  %v397_v44 = vrot.slane %v396_v14, 4  ;;  %v406_v45 = vor.u32 %v405_v18, %v401_v5  ;;  %v5062_v10 = vld [vmem:[%s6238_s22 + $0x24] sm:$0xe] }
  0x5e   : > { %v2746_v47 = vsel %vm6490_vm7, %v5076_v21, %v2745_v62  ;;  %v2749_v49 = vsel %vm6490_vm7, %v2747_v25, %v2748_v63  ;;  %v416_v50 = vrot.slane %v414_v39, 4  ;;  %v419_v51 = vrot.slane %v417_v42, 5  ;;  %v6542_v39 = vld [vmem:[%s6238_s22 + $0x84] sm:$0xf] }
  0x5f   : > { %v423_v52 = vshll.u32 %v6497_v29, 16  ;;  %5643 = vmatmul.mubr.msk.bf16.gmra.mrb[12].mxu0 %vm631_vm3, %v5035_v43  ;;  %v402_v15 = vsel %vm6264_vm4, %v397_v44, %v401_v5  ;;  %v407_v62 = vrot.slane %v406_v45, 4  ;;  %v5093_v55 = vcombine.low %v2746_v47, %v2749_v49  ;;  %v6550_v43 = vld [vmem:[%s6238_s22 + $0x88] sm:$0xf] }
  0x60   : > { %v427_v56 = vshrl.u32 %v6497_v29, 16  ;;  %v420_v63 = vor.u32 %v419_v51, %v416_v50  ;;  %v433_v61 = vshll.u32 %v187_v26, 16  ;;  %v5077_v2 = vrot.slane %v5061_v48, 9 }
  0x61   : > { %v425_v58 = vrot.slane %v423_v52, 5  ;;  %v412_v6 = vsel %vm6264_vm4, %v407_v62, %v411_v38  ;;  %5664 = vmatprep.mubr.msk.bf16.mxu0 %vm631_vm3, %v5093_v55  ;;  %v2756_v5 = vsel %vm6490_vm7, %v6307_v30, %v2755_v28  ;;  %v438_v17 = vshrl.u32 %v6516_v53, 16  ;;  %v189_v52 = vld [vmem:[%s6238_s22 + $0x8c] sm:$0x1] }
  0x62   : > { %v429_v7 = vrot.slane %v427_v56, 4  ;;  %v4809_v11 = vcombine.low %v402_v15, %v412_v6  ;;  %v421_v14 = vrot.slane %v420_v63, 4  ;;  %v435_v18 = vrot.slane %v433_v61, 5 }
  0x63   : > { %v2753_v21 = vsel %vm6490_vm7, %v5077_v2, %v2752_v22  ;;  %v440_v38 = vrot.slane %v438_v17, 4  ;;  %v441_v1 = vshll.u32 %v6516_v53, 16  ;;  %v447_v30 = vshll.u32 %v6523_v16, 16  ;;  %v6555_v22 = vld [vmem:[%s7988_s1 + $0xe] sm:$0x3] }
  0x64   : > { %v430_v25 = vor.u32 %v429_v7, %v425_v58  ;;  %v5094_v31 = vcombine.low %v2753_v21, %v2756_v5  ;;  %5510 = vmatprep.mubr.msk.bf16.mxu1 %vm631_vm3, %v4809_v11  ;;  %v426_v28 = vsel %vm6264_vm4, %v421_v14, %v425_v58  ;;  %v451_v60 = vshrl.u32 %v6523_v16, 16  ;;  %v6574_v5 = vld [vmem:[%s6238_s22 + $0x90] sm:$0xf] }
  0x65   : > { %v457_v42 = vshll.u32 %v188_v57, 16  ;;  %v443_v45 = vrot.slane %v441_v1, 5  ;;  %v5078_v47 = vrot.slane %v5062_v10, 9  ;;  %v2759_v26 = vrot.slane %v6314_v46, 5  ;;  %v5063_v57 = vld [vmem:[%s6238_s22 + $0x30] sm:$0xe] }
  0x66   : > { %v431_v44 = vrot.slane %v430_v25, 4  ;;  %v449_v48 = vrot.slane %v447_v30, 5  ;;  %v453_v49 = vrot.slane %v451_v60, 4  ;;  %v2762_v51 = vrot.slane %v6323_v54, 5  ;;  %v6586_v30 = vld [vmem:[%s6238_s22 + $0x94] sm:$0xf] }
  0x67   : > { %v459_v50 = vrot.slane %v457_v42, 5  ;;  %5665 = vmatmul.mubr.msk.bf16.vlgmr.msra.gmra.mrb[0].mxu0 %vm631_vm3, %v5094_v31  ;;  %v444_v62 = vor.u32 %v443_v45, %v440_v38  ;;  %v2760_v55 = vsel %vm6490_vm7, %v5078_v47, %v2759_v26  ;;  %v2761_v56 = vrot.slane %v2759_v26, 4  ;;  %v190_v60 = vld [vmem:[%s6238_s22 + $0x98] sm:$0x1]  ;;  %v5064_v26 = vld [vmem:[%s6238_s22 + $0x3c] sm:$0xe] }
  0x68   : > { %v436_v15 = vsel %vm6264_vm4, %v431_v44, %v435_v18  ;;  %5697 = vmatpush3.bf16.msra.mxu0 %v6274_v41  ;;  %v454_v46 = vor.u32 %v453_v49, %v449_v48  ;;  %v462_v58 = vshrl.u32 %v6542_v39, 16  ;;  %v465_v54 = vshll.u32 %v6542_v39, 16 }
  0x69   : > { %v4810_v63 = vcombine.low %v426_v28, %v436_v15  ;;  %v445_v61 = vrot.slane %v444_v62, 4  ;;  %v2763_v2 = vsel %vm6490_vm7, %v2761_v56, %v2762_v51  ;;  %v471_v6 = vshll.u32 %v6550_v43, 16  ;;  %6064 = vmatprep.subr.msk.bf16.mxu0 %vm680_vm0, %v6555_v22 }
  0x6a   : > { %v475_v7 = vshrl.u32 %v6550_v43, 16  ;;  %v455_v41 = vrot.slane %v454_v46, 4  ;;  %v5095_v17 = vcombine.low %v2760_v55, %v2763_v2  ;;  %v464_v10 = vrot.slane %v462_v58, 4  ;;  %v6606_v46 = vld [vmem:[%s6238_s22 + $0xa0] sm:$0xf] }
  0x6b   : > { %5511 = vmatmul.mubr.msk.bf16.gmra.mrb[16].mxu1 %vm631_vm3, %v4810_v63  ;;  %v467_v11 = vrot.slane %v465_v54, 5  ;;  %v450_v14 = vsel %vm6264_vm4, %v445_v61, %v449_v48  ;;  %v473_v18 = vrot.slane %v471_v6, 5  ;;  %v481_v25 = vshll.u32 %v189_v52, 16  ;;  %v6595_v52 = vld [vmem:[%s6238_s22 + $0x9c] sm:$0xf] }
  0x6c   : > { %v477_v21 = vrot.slane %v475_v7, 4  ;;  %v460_v31 = vsel %vm6264_vm4, %v455_v41, %v459_v50  ;;  %5668 = vmatprep.mubr.msk.bf16.mxu0 %vm631_vm3, %v5095_v17  ;;  %v5079_v1 = vrot.slane %v5063_v57, 9  ;;  %v2766_v28 = vrot.slane %v6343_v33, 5 }
  0x6d   : > { %v468_v38 = vor.u32 %v467_v11, %v464_v10  ;;  %v4811_v42 = vcombine.low %v450_v14, %v460_v31  ;;  %v483_v45 = vrot.slane %v481_v25, 5  ;;  %v2769_v47 = vrot.slane %v6351_v40, 5  ;;  %v191_v10 = vld [vmem:[%s6238_s22 + $0xa4] sm:$0x1]  ;;  %v5065_v11 = vld [vmem:[%s6238_s22 + $0x48] sm:$0xe] }
  0x6e   : > { %v478_v44 = vor.u32 %v477_v21, %v473_v18  ;;  %v2767_v49 = vsel %vm6490_vm7, %v5079_v1, %v2766_v28  ;;  %v2768_v50 = vrot.slane %v2766_v28, 4  ;;  %v486_v51 = vshrl.u32 %v6574_v5, 16 }
  0x6f   : > { %v469_v48 = vrot.slane %v468_v38, 4  ;;  %5514 = vmatprep.mubr.msk.bf16.mxu1 %vm631_vm3, %v4811_v42  ;;  %v489_v15 = vshll.u32 %v6574_v5, 16  ;;  %v495_v62 = vshll.u32 %v6586_v30, 16  ;;  %v499_v40 = vshrl.u32 %v6586_v30, 16 }
  0x70   : > { %v479_v33 = vrot.slane %v478_v44, 4  ;;  %v2770_v56 = vsel %vm6490_vm7, %v2768_v50, %v2769_v47  ;;  %v488_v57 = vrot.slane %v486_v51, 4  ;;  %v505_v63 = vshll.u32 %v190_v60, 16 }
  0x71   : > { %v474_v55 = vsel %vm6264_vm4, %v469_v48, %v473_v18  ;;  %v5096_v54 = vcombine.low %v2767_v49, %v2770_v56  ;;  %v491_v61 = vrot.slane %v489_v15, 5  ;;  %v497_v2 = vrot.slane %v495_v62, 5  ;;  %v6632_v56 = vld [vmem:[%s6238_s22 + $0xac] sm:$0xf] }
  0x72   : > { %v484_v58 = vsel %vm6264_vm4, %v479_v33, %v483_v45  ;;  %v501_v7 = vrot.slane %v499_v40, 4  ;;  %v507_v41 = vrot.slane %v505_v63, 5  ;;  %v5080_v17 = vrot.slane %v5064_v26, 9  ;;  %v6627_v33 = vld [vmem:[%s6238_s22 + $0xa8] sm:$0xf] }
  0x73   : > { %v4812_v6 = vcombine.low %v474_v55, %v484_v58  ;;  %5669 = vmatmul.mubr.msk.bf16.gmra.mrb[4].mxu0 %vm631_vm3, %v5096_v54  ;;  %v492_v14 = vor.u32 %v491_v61, %v488_v57  ;;  %v2773_v18 = vrot.slane %v6368_v20, 5  ;;  %v2776_v21 = vrot.slane %v6373_v34, 5  ;;  %v192_v61 = vld [vmem:[%s6238_s22 + $0xb0] sm:$0x1] }
  0x74   : > { %v510_v25 = vshrl.u32 %v6595_v52, 16  ;;  %v502_v31 = vor.u32 %v501_v7, %v497_v2  ;;  %v513_v38 = vshll.u32 %v6595_v52, 16  ;;  %v519_v1 = vshll.u32 %v6606_v46, 16 }
  0x75   : > { %5515 = vmatmul.mubr.msk.bf16.gmra.mrb[20].mxu1 %vm631_vm3, %v4812_v6  ;;  %v523_v28 = vshrl.u32 %v6606_v46, 16  ;;  %v493_v60 = vrot.slane %v492_v14, 4  ;;  %v2774_v42 = vsel %vm6490_vm7, %v5080_v17, %v2773_v18  ;;  %v2775_v20 = vrot.slane %v2773_v18, 4  ;;  %v6647_v14 = vld [vmem:[%s6238_s22 + $0xb4] sm:$0xf] }
  0x76   : > { %v512_v44 = vrot.slane %v510_v25, 4  ;;  %v503_v34 = vrot.slane %v502_v31, 4  ;;  %v515_v45 = vrot.slane %v513_v38, 5  ;;  %v521_v47 = vrot.slane %v519_v1, 5 }
  0x77   : > { %v525_v26 = vrot.slane %v523_v28, 4  ;;  %v498_v48 = vsel %vm6264_vm4, %v493_v60, %v497_v2  ;;  %v2777_v49 = vsel %vm6490_vm7, %v2775_v20, %v2776_v21  ;;  %v529_v50 = vshll.u32 %v191_v10, 16  ;;  %v5066_v2 = vld [vmem:[%s6238_s22 + $0x54] sm:$0xe] }
  0x78   : > { %v5081_v51 = vrot.slane %v5065_v11, 9  ;;  %v508_v15 = vsel %vm6264_vm4, %v503_v34, %v507_v41  ;;  %v5097_v62 = vcombine.low %v2774_v42, %v2777_v49  ;;  %v516_v40 = vor.u32 %v515_v45, %v512_v44  ;;  %v6656_v42 = vld [vmem:[%s6238_s22 + $0xb8] sm:$0xf]  ;;  %v193_v49 = vld [vmem:[%s6238_s22 + $0xbc] sm:$0x1] }
  0x79   : > { %v526_v55 = vor.u32 %v525_v26, %v521_v47  ;;  %v4813_v57 = vcombine.low %v498_v48, %v508_v15  ;;  %v531_v63 = vrot.slane %v529_v50, 5  ;;  %v2780_v58 = vrot.slane %v6391_v8, 5 }
  0x7a   : > { %v2783_v54 = vrot.slane %v6399_v23, 5  ;;  %5672 = vmatprep.mubr.msk.bf16.mxu0 %vm631_vm3, %v5097_v62  ;;  %v517_v6 = vrot.slane %v516_v40, 4  ;;  %v534_v41 = vshrl.u32 %v6627_v33, 16  ;;  %v537_v17 = vshll.u32 %v6627_v33, 16 }
  0x7b   : > { %v527_v7 = vrot.slane %v526_v55, 4  ;;  %5518 = vmatprep.mubr.msk.bf16.mxu1 %vm631_vm3, %v4813_v57  ;;  %v2781_v10 = vsel %vm6490_vm7, %v5081_v51, %v2780_v58  ;;  %v2782_v11 = vrot.slane %v2780_v58, 4  ;;  %v543_v8 = vshll.u32 %v6632_v56, 16  ;;  %v5067_v55 = vld [vmem:[%s6238_s22 + $0x60] sm:$0xe] }
  0x7c   : > { %v547_v23 = vshrl.u32 %v6632_v56, 16  ;;  %v522_v18 = vsel %vm6264_vm4, %v517_v6, %v521_v47  ;;  %v536_v25 = vrot.slane %v534_v41, 4  ;;  %v539_v31 = vrot.slane %v537_v17, 5  ;;  %v5068_v6 = vld [vmem:[%s6238_s22 + $0x6c] sm:$0xe] }
  0x7d   : > { %v532_v21 = vsel %vm6264_vm4, %v527_v7, %v531_v63  ;;  %v2784_v1 = vsel %vm6490_vm7, %v2782_v11, %v2783_v54  ;;  %v545_v28 = vrot.slane %v543_v8, 5  ;;  %v553_v34 = vshll.u32 %v192_v61, 16  ;;  %v5004_v11 = vld [vmem:[%s6238_s22 + $0x70] sm:$0xf]  ;;  %v5005_v8 = vld [vmem:[%s6238_s22 + $0x74] sm:$0x1] }
  0x7e   : > { %v4814_v38 = vcombine.low %v522_v18, %v532_v21  ;;  %v549_v60 = vrot.slane %v547_v23, 4  ;;  %v5098_v20 = vcombine.low %v2781_v10, %v2784_v1  ;;  %v540_v44 = vor.u32 %v539_v31, %v536_v25 }
  0x7f   : > { %v5082_v45 = vrot.slane %v5066_v2, 9  ;;  %v2787_v26 = vrot.slane %v6422_v4, 5  ;;  %v2790_v48 = vrot.slane %v6428_v12, 5  ;;  %v558_v50 = vshrl.u32 %v6647_v14, 16 }
  0x80   : > { %5519 = vmatmul.mubr.msk.bf16.gmra.mrb[24].mxu1 %vm631_vm3, %v4814_v38  ;;  %v550_v47 = vor.u32 %v549_v60, %v545_v28  ;;  %5673 = vmatmul.mubr.msk.bf16.gmra.mrb[8].mxu0 %vm631_vm3, %v5098_v20  ;;  %v541_v51 = vrot.slane %v540_v44, 4  ;;  %v555_v15 = vrot.slane %v553_v34, 5  ;;  %v561_v62 = vshll.u32 %v6647_v14, 16 }
  0x81   : > { %v567_v40 = vshll.u32 %v6656_v42, 16  ;;  %v2788_v4 = vsel %vm6490_vm7, %v5082_v45, %v2787_v26  ;;  %v2789_v12 = vrot.slane %v2787_v26, 4  ;;  %v560_v63 = vrot.slane %v558_v50, 4 }
  0x82   : > { %v551_v57 = vrot.slane %v550_v47, 4  ;;  %v546_v58 = vsel %vm6264_vm4, %v541_v51, %v545_v28  ;;  %v563_v54 = vrot.slane %v561_v62, 5  ;;  %v571_v2 = vshrl.u32 %v6656_v42, 16  ;;  %v5069_v47 = vld [vmem:[%s6238_s22 + $0x78] sm:$0xe] }
  0x83   : > { %v569_v61 = vrot.slane %v567_v40, 5  ;;  %v2791_v41 = vsel %vm6490_vm7, %v2789_v12, %v2790_v48  ;;  %v577_v17 = vshll.u32 %v193_v49, 16  ;;  %v5083_v10 = vrot.slane %v5067_v55, 9  ;;  %v6123_v51 = vld [vmem:[%s6238_s22] sm:$0xf] }
  0x84   : > { %v556_v7 = vsel %vm6264_vm4, %v551_v57, %v555_v15  ;;  %v5099_v18 = vcombine.low %v2788_v4, %v2791_v41  ;;  %v564_v21 = vor.u32 %v563_v54, %v560_v63  ;;  %v573_v25 = vrot.slane %v571_v2, 4  ;;  %v6694_v15 = vld [vmem:[%s6238_s22 + $0x4] sm:$0xf]  ;;  %v6698_v40 = vld [vmem:[%s6238_s22 + $0x7c] sm:$0xf] }
  0x85   : > { %v4815_v23 = vcombine.low %v546_v58, %v556_v7  ;;  %v579_v31 = vrot.slane %v577_v17, 5  ;;  %v2794_v38 = vrot.slane %v6452_v59, 5  ;;  %v2797_v1 = vrot.slane %v6459_v9, 5  ;;  %v6701_v55 = vld [vmem:[%s6238_s22 + $0x80] sm:$0x1] }
  0x86   : > { %v5084_v28 = vrot.slane %v5068_v6, 9  ;;  %5676 = vmatprep.mubr.msk.bf16.mxu0 %vm631_vm3, %v5099_v18  ;;  %v565_v60 = vrot.slane %v564_v21, 4  ;;  %v574_v20 = vor.u32 %v573_v25, %v569_v61  ;;  %v2801_v44 = vrot.slane %v5004_v11, 5  ;;  %v5010_v57 = vld [vmem:[%s6238_s22 + $0x88] sm:$0xf] }
  0x87   : > { %5522 = vmatprep.mubr.msk.bf16.mxu1 %vm631_vm3, %v4815_v23  ;;  %v2804_v34 = vrot.slane %v5005_v8, 5  ;;  %v2795_v45 = vsel %vm6490_vm7, %v5083_v10, %v2794_v38  ;;  %v2796_v59 = vrot.slane %v2794_v38, 4  ;;  %v4833_v62 = vcombine.low %v6123_v51, %v6694_v15  ;;  %v5011_v54 = vld [vmem:[%s6238_s22 + $0x8c] sm:$0x1]  ;;  %v5013_v17 = vld [vmem:[%s6238_s22 + $0x94] sm:$0xf] }
  0x88   : > { %v570_v9 = vsel %vm6264_vm4, %v565_v60, %v569_v61  ;;  %v575_v26 = vrot.slane %v574_v20, 4  ;;  %v2802_v48 = vsel %vm6490_vm7, %v5084_v28, %v2801_v44  ;;  %v2803_v49 = vrot.slane %v2801_v44, 4  ;;  %v5070_v61 = vld [vmem:[%s6238_s22 + $0x84] sm:$0xe]  ;;  %v5071_v23 = vld [vmem:[%s6238_s22 + $0x90] sm:$0xe] }
  0x89   : > { %v2798_v50 = vsel %vm6490_vm7, %v2796_v59, %v2797_v1  ;;  %v5085_v58 = vrot.slane %v5069_v47, 9  ;;  %v2808_v7 = vrot.slane %v6698_v40, 5  ;;  %v2811_v41 = vrot.slane %v6701_v55, 5  ;;  %v5014_v25 = vld [vmem:[%s6238_s22 + $0x98] sm:$0x1] }
  0x8a   : > { %v580_v4 = vsel %vm6264_vm4, %v575_v26, %v579_v31  ;;  %v5100_v12 = vcombine.low %v2795_v45, %v2798_v50  ;;  %v2805_v63 = vsel %vm6490_vm7, %v2803_v49, %v2804_v34  ;;  %v5086_v10 = vrot.slane %v5070_v61, 9  ;;  %v5016_v31 = vld [vmem:[%s6238_s22 + $0xa0] sm:$0xf]  ;;  %v5017_v60 = vld [vmem:[%s6238_s22 + $0xa4] sm:$0x1] }
  0x8b   : > { %v4816_v2 = vcombine.low %v570_v9, %v580_v4  ;;  %v5101_v6 = vcombine.low %v2802_v48, %v2805_v63  ;;  %v2815_v11 = vrot.slane %v5010_v57, 5  ;;  %v2818_v8 = vrot.slane %v5011_v54, 5  ;;  %v5072_v20 = vld [vmem:[%s6238_s22 + $0x9c] sm:$0xe]  ;;  %v6125_v44 = vld [vmem:[%s6238_s22 + $0xc] sm:$0xf] }
  0x8c   : > { %5677 = vmatmul.mubr.msk.bf16.gmra.mrb[12].mxu0 %vm631_vm3, %v5100_v12  ;;  %v2809_v18 = vsel %vm6490_vm7, %v5085_v58, %v2808_v7  ;;  %v2810_v21 = vrot.slane %v2808_v7, 4  ;;  %v2822_v28 = vrot.slane %v5013_v17, 5  ;;  %v6728_v34 = vld [vmem:[%s6238_s22 + $0x10] sm:$0xf]  ;;  %v6127_v47 = vld [vmem:[%s6238_s22 + $0x18] sm:$0xf] }
  0x8d   : > { %5523 = vmatmul.mubr.msk.bf16.gmra.mrb[28].mxu1 %vm631_vm3, %v4816_v2  ;;  %5680 = vmatprep.mubr.msk.bf16.mxu0 %vm631_vm3, %v5101_v6  ;;  %v2816_v38 = vsel %vm6490_vm7, %v5086_v10, %v2815_v11  ;;  %v2817_v1 = vrot.slane %v2815_v11, 4  ;;  %v4834_v45 = vcombine.low %v6125_v44, %v6728_v34  ;;  %v6735_v9 = vld [vmem:[%s6238_s22 + $0x1c] sm:$0xf]  ;;  %v5087_v48 = vrot.slane %v5071_v23, 9  ;;  %v5019_v57 = vld [vmem:[%s6238_s22 + $0xac] sm:$0xf] }
  0x8e   : > { %5528 = vmatprep.mubr.msk.bf16.mxu1 %vm631_vm3, %v4833_v62  ;;  %v2812_v59 = vsel %vm6490_vm7, %v2810_v21, %v2811_v41  ;;  %v4835_v26 = vcombine.low %v6127_v47, %v6735_v9  ;;  %v2824_v51 = vrot.slane %v2822_v28, 4  ;;  %v2825_v62 = vrot.slane %v5014_v25, 5  ;;  %v6129_v54 = vld [vmem:[%s7988_s1 + $0x4] sm:$0x3]  ;;  %v5022_v2 = vld [vmem:[%s6238_s22 + $0xb8] sm:$0xf] }
  0x8f   : > { %v5102_v49 = vcombine.low %v2809_v18, %v2812_v59  ;;  %v2819_v50 = vsel %vm6490_vm7, %v2817_v1, %v2818_v8  ;;  %v5088_v12 = vrot.slane %v5072_v20, 9  ;;  %v2829_v63 = vrot.slane %v5016_v31, 5  ;;  %v6750_v7 = vld [vmem:[%s7988_s1 + $0x6] sm:$0x3]  ;;  %v5020_v10 = vld [vmem:[%s6238_s22 + $0xb0] sm:$0x1] }
  0x90   : > { %v5103_v4 = vcombine.low %v2816_v38, %v2819_v50  ;;  %v2832_v58 = vrot.slane %v5017_v60, 5  ;;  %v1399_v61 = vsel %vm680_vm0, %v6129_v54, 0  ;;  %v2823_v41 = vsel %vm6490_vm7, %v5087_v48, %v2822_v28  ;;  %v5073_v11 = vld [vmem:[%s6238_s22 + $0xa8] sm:$0xe]  ;;  %v5023_v25 = vld [vmem:[%s6238_s22 + $0xbc] sm:$0x1] }
  0x91   : > { %v2831_v6 = vrot.slane %v2829_v63, 4  ;;  %v2826_v17 = vsel %vm6490_vm7, %v2824_v51, %v2825_v62  ;;  %v2836_v8 = vrot.slane %v5019_v57, 5  ;;  %v2830_v23 = vsel %vm6490_vm7, %v5088_v12, %v2829_v63  ;;  %v5074_v31 = vld [vmem:[%s6238_s22 + $0xb4] sm:$0xe]  ;;  %v6130_v38 = vld [vmem:[%s6238_s22 + $0x24] sm:$0xf] }
  0x92   : > { %v2843_v21 = vrot.slane %v5022_v2, 5  ;;  %v6771_v1 = vld [vmem:[%s6238_s22 + $0x28] sm:$0xf]  ;;  %v5104_v60 = vcombine.low %v2823_v41, %v2826_v17  ;;  %v5089_v44 = vrot.slane %v5073_v11, 9  ;;  %v2839_v59 = vrot.slane %v5020_v10, 5 }
  0x93   : > { %v2833_v18 = vsel %vm6490_vm7, %v2831_v6, %v2832_v58  ;;  %v4836_v28 = vcombine.low %v6130_v38, %v6771_v1  ;;  %v6132_v47 = vld [vmem:[%s6238_s22 + $0x30] sm:$0xf]  ;;  %v2846_v51 = vrot.slane %v5023_v25, 5  ;;  %v5025_v62 = vld [vmem:[%s6238_s22 + $0xc4] sm:$0xf]  ;;  %v2231_v25 = vshrl.u32 %v6698_v40, 16 }
  0x94   : > { %5681 = vmatmul.mubr.msk.bf16.gmra.mrb[16].mxu0 %vm631_vm3, %v5102_v49  ;;  %v5105_v20 = vcombine.low %v2830_v23, %v2833_v18  ;;  %v5090_v49 = vrot.slane %v5074_v31, 9  ;;  %v2845_v50 = vrot.slane %v2843_v21, 4  ;;  %v2837_v57 = vsel %vm6490_vm7, %v5089_v44, %v2836_v8  ;;  %v5075_v12 = vld [vmem:[%s6238_s22 + $0xc0] sm:$0xe]  ;;  %v6134_v41 = vld [vmem:[%s6238_s22 + $0x3c] sm:$0xf] }
  0x95   : > { %5529 = vmatmul.mubr.msk.bf16.vlgmr.msra.gmra.mrb[0].mxu1 %vm631_vm3, %v4834_v45  ;;  %5684 = vmatprep.mubr.msk.bf16.mxu0 %vm631_vm3, %v5103_v4  ;;  %v2838_v45 = vrot.slane %v2836_v8, 4  ;;  %v2850_v63 = vrot.slane %v5025_v62, 5  ;;  %v5091_v6 = vrot.slane %v5075_v12, 9  ;;  %v6796_v17 = vld [vmem:[%s6238_s22 + $0x40] sm:$0xf]  ;;  %v4839_v18 = vcombine.low %v6403_v27, %v6406_v36  ;;  %v6086_v62 = vld [vmem:[%s6238_s22 + $0x24] sm:$0xff]  }
  0x96   : > { %5561 = vmatpush3.bf16.msra.mxu1 %v1399_v61  ;;  %5532 = vmatprep.mubr.msk.bf16.mxu1 %vm631_vm3, %v4835_v26  ;;  %v6776_v26 = vld [vmem:[%s6238_s22 + $0x34] sm:$0xf]  ;;  %v2844_v58 = vsel %vm6490_vm7, %v5090_v49, %v2843_v21  ;;  %v2847_v54 = vsel %vm6490_vm7, %v2845_v50, %v2846_v51  ;;  %v5026_v61 = vld [vmem:[%s6238_s22 + $0xc8] sm:$0x1]  ;;  %v4838_v10 = vcombine.low %v6134_v41, %v6796_v17  ;;  %v2227_v21 = vshll.u32 %v6698_v40, 16 }
  0x97   : > { %6059 = vmatprep.subr.msk.bf16.mxu1 %vm680_vm0, %v6750_v7  ;;  %v4837_v48 = vcombine.low %v6132_v47, %v6776_v26  ;;  %v2840_v4 = vsel %vm6490_vm7, %v2838_v45, %v2839_v59  ;;  %v5107_v11 = vcombine.low %v2844_v58, %v2847_v54  ;;  %v2852_v8 = vrot.slane %v2850_v63, 4  ;;  %v1137_v45 = vld [vmem:[%s6238_s22] sm:$0xe]  ;;  %v1138_v59 = vld [vmem:[%s6238_s22 + $0xc] sm:$0xe] }
  0x98   : > { %v5106_v2 = vcombine.low %v2837_v57, %v2840_v4  ;;  %v2853_v23 = vrot.slane %v5026_v61, 5  ;;  %v2851_v31 = vsel %vm6490_vm7, %v5091_v6, %v2850_v63  ;;  %v6811_v27 = vrot.slane %v2227_v21, 5  ;;  %v1141_v41 = vld [vmem:[%s6238_s22 + $0x30] sm:$0xe] }
  0x99   : > { %v2233_v36 = vrot.slane %v2231_v25, 4  ;;  %v4841_v44 = vcombine.low %v6463_v19, %v6469_v35  ;;  %v2237_v47 = vshll.u32 %v6701_v55, 16  ;;  %v4865_v19 = vrot.slane %v1137_v45, 9 }
  0x9a   : > { %v2854_v38 = vsel %vm6490_vm7, %v2852_v8, %v2853_v23  ;;  %8008 = vst [vmem:[#allocation3_spill] sm:$0xff] %v6811_v27  ;;  %v4866_v35 = vrot.slane %v1138_v59, 9  ;;  %v1204_v4 = vrot.slane %v6735_v9, 5  ;;  %v1211_v12 = vrot.slane %v6771_v1, 5  ;;  %v1142_v8 = vld [vmem:[%s6238_s22 + $0x3c] sm:$0xe] }
  0x9b   : > { %v5108_v40 = vcombine.low %v2851_v31, %v2854_v38  ;;  %v2234_v49 = vor.u32 %v2233_v36, %v6811_v27  ;;  %v6831_v51 = vrot.slane %v2237_v47, 5  ;;  %v4842_v58 = vcombine.low %v6484_v0, %v6497_v29  ;;  %v1143_v31 = vld [vmem:[%s6238_s22 + $0x48] sm:$0xe]  ;;  %v6140_v59 = vld [vmem:[%s6238_s22 + $0x38] sm:$0x1] }
  0x9c   : > { %5685 = vmatmul.mubr.msk.bf16.gmra.mrb[20].mxu0 %vm631_vm3, %v5104_v60  ;;  %v4840_v60 = vcombine.low %v6432_v24, %v6438_v37  ;;  %v6137_v24 = vld [vmem:[%s6238_s22 + $0x14] sm:$0x1]  ;;  %v4039_v54 = vsel %vm680_vm0, %v6555_v22, 0  ;;  %v4843_v61 = vcombine.low %v6516_v53, %v6523_v16  ;;  %v4844_v6 = vcombine.low %v6542_v39, %v6550_v43  ;;  %v6138_v16 = vld [vmem:[%s6238_s22 + $0x20] sm:$0x1] }
  0x9d   : > { %5533 = vmatmul.mubr.msk.bf16.gmra.mrb[4].mxu1 %vm631_vm3, %v4836_v28  ;;  %5688 = vmatprep.mubr.msk.bf16.mxu0 %vm631_vm3, %v5105_v20  ;;  %v1197_v28 = vrot.slane %v6728_v34, 5  ;;  %v6084_v20 = vld [vmem:[%s6238_s22 + $0x18] sm:$0xff]   ;;  %v6136_v34 = vld [vmem:[%s6238_s22 + $0x8] sm:$0x1]  ;;  %v1200_v37 = vrot.slane %v6137_v24, 5  ;;  %8009 = vst [vmem:[#allocation4_spill] sm:$0xff] %v6831_v51  ;;  %v4845_v9 = vcombine.low %v6574_v5, %v6586_v30 }
  0x9e   : > { %5536 = vmatprep.mubr.msk.bf16.mxu1 %vm631_vm3, %v4837_v48  ;;  %v1190_v48 = vrot.slane %v6694_v15, 5  ;;  %v1193_v50 = vrot.slane %v6136_v34, 5  ;;  %v1139_v15 = vld [vmem:[%s6238_s22 + $0x18] sm:$0xe]  ;;  %v6836_v63 = vrot.slane %v2234_v49, 4  ;;  %v1207_v22 = vrot.slane %v6138_v16, 5 }
  0x9f   : > { %v1199_v55 = vrot.slane %v1197_v28, 4  ;;  %v4867_v1 = vrot.slane %v1139_v15, 9  ;;  %v6858_v29 = vsel %vm6490_vm7, %v4866_v35, %v1197_v28  ;;  %v1213_v25 = vrot.slane %v1211_v12, 4  ;;  %v5190_v24 = vld [vmem:[%s6238_s22 + $0x18] sm:$0xf] }
  0xa0   : > { %v1192_v57 = vrot.slane %v1190_v48, 4  ;;  %8010 = vst [vmem:[#allocation5_spill] sm:$0xff] %v6836_v63  ;;  %v6854_v0 = vsel %vm6490_vm7, %v4865_v19, %v1190_v48  ;;  %v1221_v47 = vrot.slane %v6140_v59, 5  ;;  %v6895_v49 = vsel %vm680_vm0, %v6750_v7, 0  ;;  %v5191_v7 = vld [vmem:[%s6238_s22 + $0x1c] sm:$0xf] }
  0xa1   : > { %v6862_v53 = vsel %vm6490_vm7, %v1199_v55, %v1200_v37  ;;  %v6899_v34 = vsel %vm6490_vm7, %v4867_v1, %v1204_v4  ;;  %v6090_v37 = vld [vmem:[%s6238_s22 + $0x3c] sm:$0xff]   ;;  %v4870_v35 = vrot.slane %v1142_v8, 9  ;;  %v6141_v55 = vld [vmem:[%s6238_s22 + $0x44] sm:$0x1]  ;;  %v3560_v8 = vshll.u32 %v5190_v24, 16 }
  0xa2   : > { %v6873_v23 = vsel %vm6490_vm7, %v1192_v57, %v1193_v50  ;;  %v1144_v50 = vld [vmem:[%s6238_s22 + $0x54] sm:$0xe]  ;;  %v1228_v15 = vrot.slane %v6141_v55, 5  ;;  %v5194_v39 = vld [vmem:[%s6238_s22 + $0x28] sm:$0xf] }
  0xa3   : > { %v6148_v5 = vld [vmem:[%s6238_s22 + $0x70] sm:$0xf] }
  0xa4   : > { %5689 = vmatmul.mubr.msk.bf16.gmra.mrb[24].mxu0 %vm631_vm3, %v5106_v2  ;;  %v1140_v2 = vld [vmem:[%s6238_s22 + $0x24] sm:$0xe]  ;;  %v1253_v30 = vrot.slane %v6148_v5, 5 }
  0xa5   : > { %5537 = vmatmul.mubr.msk.bf16.gmra.mrb[8].mxu1 %vm631_vm3, %v4838_v10  ;;  %5692 = vmatprep.mubr.msk.bf16.mxu0 %vm631_vm3, %v5107_v11  ;;  %v1218_v10 = vrot.slane %v6776_v26, 5  ;;  %v6088_v11 = vld [vmem:[%s6238_s22 + $0x30] sm:$0xff]   ;;  %v4868_v21 = vrot.slane %v1140_v2, 9 }
  0xa6   : > { %5540 = vmatprep.mubr.msk.bf16.mxu1 %vm631_vm3, %v4839_v18  ;;  %v6869_v26 = vld [vmem:[%s7988_s1 + $0x10] sm:$0x3]  ;;  %v1206_v18 = vrot.slane %v1204_v4, 4  ;;  %v1255_v48 = vrot.slane %v1253_v30, 4 }
  0xa7   : > { %v1220_v45 = vrot.slane %v1218_v10, 4  ;;  %v6906_v19 = vsel %vm6490_vm7, %v4868_v21, %v1211_v12  ;;  %v3570_v21 = vshrl.u32 %v5191_v7, 16 }
  0xa8   : > { %v6915_v4 = vsel %vm6490_vm7, %v1206_v18, %v1207_v22  ;;  %v3557_v22 = vshrl.u32 %v5190_v24, 16  ;;  %v3566_v18 = vshll.u32 %v5191_v7, 16  ;;  %v5193_v24 = vld [vmem:[%s6238_s22 + $0x24] sm:$0xf] }
  0xa9   : > { %v6928_v1 = vsel %vm6490_vm7, %v1220_v45, %v1221_v47 }
  0xaa   : > { %v3559_v43 = vrot.slane %v3557_v22, 4  ;;  %v6970_v7 = vrot.slane %v3566_v18, 5  ;;  %v3584_v22 = vshll.u32 %v5193_v24, 16  ;;  %v3594_v18 = vshrl.u32 %v5194_v39, 16 }
  0xac   : > { %5693 = vmatmul.mubr.msk.bf16.gmra.mrb[28].mxu0 %vm631_vm3, %v5108_v40  ;;  %v6139_v40 = vld [vmem:[%s6238_s22 + $0x2c] sm:$0x1]  ;;  %v3586_v27 = vrot.slane %v3584_v22, 5 }
  0xad   : > { %5541 = vmatmul.mubr.msk.bf16.gmra.mrb[12].mxu1 %vm631_vm3, %v4840_v60  ;;  %5698 = vmatprep.mubr.msk.bf16.mxu0 %vm631_vm3, %v6084_v20  ;;  %v1214_v28 = vrot.slane %v6139_v40, 5  ;;  %v1225_v60 = vrot.slane %v6796_v17, 5  ;;  %v6144_v40 = vld [vmem:[%s6238_s22 + $0x50] sm:$0x1]  ;;  %v6149_v17 = vld [vmem:[%s6238_s22 + $0x74] sm:$0x1] }
  0xae   : > { %5544 = vmatprep.mubr.msk.bf16.mxu1 %vm631_vm3, %v4841_v44  ;;  %v4869_v44 = vrot.slane %v1141_v41, 9  ;;  %v4872_v41 = vrot.slane %v1144_v50, 9  ;;  %v1145_v50 = vld [vmem:[%s6238_s22 + $0x60] sm:$0xe]  ;;  %v5195_v20 = vld [vmem:[%s6238_s22 + $0x2c] sm:$0x1] }
  0xaf   : > { %v1227_v12 = vrot.slane %v1225_v60, 4  ;;  %v6941_v45 = vsel %vm6490_vm7, %v4870_v35, %v1225_v60  ;;  %v6145_v35 = vld [vmem:[%s6238_s22 + $0x5c] sm:$0x1] }
  0xb0   : > { %v6924_v2 = vsel %vm6490_vm7, %v4869_v44, %v1218_v10  ;;  %v1242_v55 = vrot.slane %v6145_v35, 5  ;;  %v1146_v35 = vld [vmem:[%s6238_s22 + $0x6c] sm:$0xe] }
  0xb1   : > { %v6945_v59 = vsel %vm6490_vm7, %v1227_v12, %v1228_v15  ;;  %v6146_v15 = vld [vmem:[%s6238_s22 + $0x64] sm:$0xf]  ;;  %v3572_v12 = vrot.slane %v3570_v21, 4  ;;  %v4874_v5 = vrot.slane %v1146_v35, 9 }
  0xb2   : > { %v6096_v21 = vld [vmem:[%s6238_s22 + $0x60] sm:$0xff]  }
  0xb4   : > { %5699 = vmatmul.mubr.msk.bf16.vlgmr.msra.gmra.mrb[0].mxu0 %vm631_vm3, %v6086_v62  ;;  %v6142_v62 = vld [vmem:[%s6238_s22 + $0x4c] sm:$0xf] }
  0xb5   : > { %5545 = vmatmul.mubr.msk.bf16.gmra.mrb[16].mxu1 %vm631_vm3, %v4842_v58  ;;  %5731 = vmatpush3.bf16.msra.mxu0 %v4039_v54  ;;  %v1232_v57 = vrot.slane %v6142_v62, 5  ;;  %v6919_v58 = vsel %vm6490_vm7, %v1213_v25, %v1214_v28  ;;  %v4871_v54 = vrot.slane %v1143_v31, 9  ;;  %v1235_v28 = vrot.slane %v6144_v40, 5 }
  0xb6   : > { %5548 = vmatprep.mubr.msk.bf16.mxu1 %vm631_vm3, %v4843_v61  ;;  %5702 = vmatprep.mubr.msk.bf16.mxu0 %vm631_vm3, %v6088_v11  ;;  %v6092_v61 = vld [vmem:[%s6238_s22 + $0x48] sm:$0xff]   ;;  %v6143_v11 = vld [vmem:[%s6238_s22 + $0x58] sm:$0xf]  ;;  %v1246_v62 = vrot.slane %v6146_v15, 5  ;;  %v5197_v15 = vld [vmem:[%s6238_s22 + $0x34] sm:$0xf] }
  0xb7   : > { %6065 = vmatprep.subr.msk.bf16.mxu0 %vm680_vm0, %v6869_v26  ;;  %v1239_v16 = vrot.slane %v6143_v11, 5  ;;  %v1234_v31 = vrot.slane %v1232_v57, 4  ;;  %v6949_v47 = vsel %vm6490_vm7, %v4871_v54, %v1232_v57  ;;  %v5192_v57 = vld [vmem:[%s6238_s22 + $0x20] sm:$0x1]  ;;  %v5196_v54 = vld [vmem:[%s6238_s22 + $0x30] sm:$0xf] }
  0xb8   : > { %v4873_v11 = vrot.slane %v1145_v50, 9  ;;  %v3608_v50 = vshll.u32 %v5196_v54, 16  ;;  %v3576_v25 = vshll.u32 %v5192_v57, 16  ;;  %v3614_v36 = vshll.u32 %v5197_v15, 16 }
  0xb9   : > { %v6960_v60 = vsel %vm6490_vm7, %v4872_v41, %v1239_v16  ;;  %v6976_v41 = vsel %vm6490_vm7, %v1234_v31, %v1235_v28  ;;  %v1248_v31 = vrot.slane %v1246_v62, 4  ;;  %v3605_v28 = vshrl.u32 %v5196_v54, 16 }
  0xba   : > { %v7018_v35 = vrot.slane %v3614_v36, 5 }
  0xbc   : > { %5703 = vmatmul.mubr.msk.bf16.gmra.mrb[4].mxu0 %vm631_vm3, %v6090_v37  ;;  %v1241_v37 = vrot.slane %v1239_v16, 4  ;;  %v6147_v16 = vld [vmem:[%s6238_s22 + $0x68] sm:$0x1] }
  0xbd   : > { %5549 = vmatmul.mubr.msk.bf16.gmra.mrb[20].mxu1 %vm631_vm3, %v4844_v6  ;;  %5706 = vmatprep.mubr.msk.bf16.mxu0 %vm631_vm3, %v6092_v61  ;;  %v3562_v6 = vrot.slane %v3560_v8, 5  ;;  %v6094_v61 = vld [vmem:[%s6238_s22 + $0x54] sm:$0xff]   ;;  %v1249_v40 = vrot.slane %v6147_v16, 5  ;;  %v3590_v8 = vshll.u32 %v5194_v39, 16  ;;  %v3573_v16 = vor.u32 %v3572_v12, %v6970_v7 }
  0xbe   : > { %5552 = vmatprep.mubr.msk.bf16.mxu1 %vm631_vm3, %v4845_v9  ;;  %v3581_v9 = vshrl.u32 %v5193_v24, 16  ;;  %v6985_v44 = vsel %vm6490_vm7, %v1241_v37, %v1242_v55  ;;  %v1256_v24 = vrot.slane %v6149_v17, 5  ;;  %v3618_v39 = vshrl.u32 %v5197_v15, 16 }
  0xbf   : > { %v3563_v10 = vor.u32 %v3562_v6, %v3559_v43  ;;  %v6991_v37 = vrot.slane %v3590_v8, 5  ;;  %v3596_v55 = vrot.slane %v3594_v18, 4  ;;  %v8011_v43 = vcombine.low %v6595_v52, %v6606_v46  ;;  %v6150_v8 = vld [vmem:[%s6238_s22 + $0x7c] sm:$0xf]  ;;  %v7027_v18 = vld [vmem:[%s6238_s22 + $0x38] sm:$0x1] }
  0xc0   : > { %v3583_v38 = vrot.slane %v3581_v9, 4  ;;  %v7000_v17 = vsel %vm6490_vm7, %v4873_v11, %v1246_v62  ;;  %v7004_v57 = vsel %vm6490_vm7, %v1248_v31, %v1249_v40  ;;  %v3607_v6 = vrot.slane %v3605_v28, 4  ;;  %8013 = vst [vmem:[#allocation6_spill] sm:$0xff] %v7027_v18 }
  0xc1   : > { %v3610_v12 = vrot.slane %v3608_v50, 5  ;;  %v8012_v52 = vcombine.low %v6627_v33, %v6632_v56  ;;  %v3564_v46 = vrot.slane %v3563_v10, 4  ;;  %v3574_v54 = vrot.slane %v3573_v16, 4  ;;  %v6098_v33 = vld [vmem:[%s6238_s22 + $0x6c] sm:$0xff]   ;;  %v1148_v16 = vld [vmem:[%s6238_s22 + $0x84] sm:$0xe] }
  0xc2   : > { %v3600_v62 = vshll.u32 %v5195_v20, 16  ;;  %v7012_v11 = vsel %vm6490_vm7, %v4874_v5, %v1253_v30  ;;  %v7016_v40 = vsel %vm6490_vm7, %v1255_v48, %v1256_v24  ;;  %v3620_v9 = vrot.slane %v3618_v39, 4  ;;  %v6099_v48 = vld [vmem:[%s6238_s22 + $0x78] sm:$0xff]  }
  0xc3   : > { %v3587_v10 = vor.u32 %v3586_v27, %v3583_v38  ;;  %v3597_v20 = vor.u32 %v3596_v55, %v6991_v37  ;;  %v1260_v30 = vrot.slane %v6150_v8, 5  ;;  %v3611_v38 = vor.u32 %v3610_v12, %v3607_v6  ;;  %v5199_v5 = vld [vmem:[%s6238_s22 + $0x3c] sm:$0xf] }
  0xc4   : > { %5707 = vmatmul.mubr.msk.bf16.gmra.mrb[8].mxu0 %vm631_vm3, %v6094_v61  ;;  %v3578_v61 = vrot.slane %v3576_v25, 5  ;;  %v1147_v25 = vld [vmem:[%s6238_s22 + $0x78] sm:$0xe]  ;;  %v7043_v50 = vrot.slane %v3600_v62, 5  ;;  %v3621_v39 = vor.u32 %v3620_v9, %v7018_v35  ;;  %v3624_v55 = vshll.u32 %v7027_v18, 16 }
  0xc5   : > { %5553 = vmatmul.mubr.msk.bf16.gmra.mrb[24].mxu1 %vm631_vm3, %v8011_v43  ;;  %5710 = vmatprep.mubr.msk.bf16.mxu0 %vm631_vm3, %v6096_v21  ;;  %v3569_v21 = vsel %vm6264_vm4, %v3564_v46, %v6970_v7  ;;  %v4875_v24 = vrot.slane %v1147_v25, 9  ;;  %v6151_v43 = vld [vmem:[%s6238_s22 + $0x88] sm:$0xf]  ;;  %v7051_v7 = vld [vmem:[%s6238_s22 + $0x40] sm:$0xf]  ;;  %v3588_v12 = vrot.slane %v3587_v10, 4  ;;  %v8015_v62 = vcombine.low %v6647_v14, %v6656_v42 }
  0xc6   : > { %5556 = vmatprep.mubr.msk.bf16.mxu1 %vm631_vm3, %v8012_v52  ;;  %v3579_v31 = vsel %vm6264_vm4, %v3574_v54, %v3578_v61  ;;  %v1267_v6 = vrot.slane %v6151_v43, 5  ;;  %8014 = vst [vmem:[#allocation7_spill] sm:$0xff] %v7051_v7  ;;  %v3598_v52 = vrot.slane %v3597_v20, 4  ;;  %v1262_v46 = vrot.slane %v1260_v30, 4  ;;  %v6152_v54 = vld [vmem:[%s6238_s22 + $0x80] sm:$0x1] }
  0xc7   : > { %v1263_v61 = vrot.slane %v6152_v54, 5  ;;  %v3612_v9 = vrot.slane %v3611_v38, 4  ;;  %v4876_v25 = vrot.slane %v1148_v16, 9  ;;  %v3629_v8 = vshrl.u32 %v5199_v5, 16  ;;  %v6100_v10 = vld [vmem:[%s6238_s22 + $0x84] sm:$0xff]  }
  0xc8   : > { %v3632_v43 = vshll.u32 %v5199_v5, 16  ;;  %v7065_v20 = vcombine.low %v3569_v21, %v3579_v31  ;;  %v7069_v14 = vsel %vm680_vm0, %v6869_v26, 0  ;;  %v3642_v38 = vshrl.u32 %v7051_v7, 16  ;;  %v6101_v21 = vld [vmem:[%s6238_s22 + $0x90] sm:$0xff]   ;;  %v6157_v18 = vld [vmem:[%s6238_s22 + $0xa0] sm:$0xf] }
  0xc9   : > { %v3622_v16 = vrot.slane %v3621_v39, 4  ;;  %v3626_v5 = vrot.slane %v3624_v55, 5  ;;  %v1269_v54 = vrot.slane %v1267_v6, 4  ;;  %v3593_v31 = vsel %vm6264_vm4, %v3588_v12, %v6991_v37 }
  0xca   : > { %v3603_v26 = vsel %vm6264_vm4, %v3598_v52, %v7043_v50  ;;  %v7084_v39 = vsel %vm6490_vm7, %v4875_v24, %v1260_v30  ;;  %v7088_v55 = vsel %vm6490_vm7, %v1262_v46, %v1263_v61  ;;  %v3617_v37 = vsel %vm6264_vm4, %v3612_v9, %v7018_v35  ;;  %v5205_v30 = vld [vmem:[%s6238_s22 + $0x54] sm:$0xf]  ;;  %v7105_v24 = vld [vmem:[%s6238_s22 + $0x58] sm:$0xf]  ;;  %v7110_v61 = vld [vmem:[%s6238_s22 + $0x90] sm:$0xe] }
  0xcb   : > { %v7101_v12 = vsel %vm6490_vm7, %v4876_v25, %v1267_v6  ;;  %v3631_v50 = vrot.slane %v3629_v8, 4  ;;  %v3634_v52 = vrot.slane %v3632_v43, 5  ;;  %v3644_v46 = vrot.slane %v3642_v38, 4 }
  0xcc   : > { %5711 = vmatmul.mubr.msk.bf16.gmra.mrb[12].mxu0 %vm631_vm3, %v6098_v33  ;;  %v8016_v33 = vcombine.low %v6854_v0, %v6873_v23  ;;  %v6153_v0 = vld [vmem:[%s6238_s22 + $0x8c] sm:$0x1]  ;;  %v3627_v36 = vsel %vm6264_vm4, %v3622_v16, %v3626_v5  ;;  %v3677_v25 = vshrl.u32 %v5205_v30, 16  ;;  %v3680_v8 = vshll.u32 %v5205_v30, 16 }
  0xcd   : > { %5557 = vmatmul.mubr.msk.bf16.gmra.mrb[28].mxu1 %vm631_vm3, %v8015_v62  ;;  %5714 = vmatprep.mubr.msk.bf16.mxu0 %vm631_vm3, %v6099_v48  ;;  %v3638_v48 = vshll.u32 %v7051_v7, 16  ;;  %v1270_v23 = vrot.slane %v6153_v0, 5  ;;  %v5202_v62 = vld [vmem:[%s6238_s22 + $0x48] sm:$0xf]  ;;  %v7094_v0 = vld [vmem:[%s6238_s22 + $0x4c] sm:$0xf]  ;;  %v8018_v38 = vcombine.low %v6858_v29, %v6862_v53  ;;  %v7128_v16 = vcombine.low %v3593_v31, %v3603_v26 }
  0xce   : > { %5562 = vmatprep.mubr.msk.bf16.mxu1 %vm631_vm3, %v8016_v33  ;;  %v7091_v33 = vld [vmem:[%s6238_s22 + $0x44] sm:$0x1]  ;;  %v3653_v27 = vshrl.u32 %v5202_v62, 16  ;;  %v3656_v15 = vshll.u32 %v5202_v62, 16  ;;  %v3662_v6 = vshll.u32 %v7094_v0, 16  ;;  %v3666_v9 = vshrl.u32 %v7094_v0, 16 }
  0xcf   : > { %8017 = vst [vmem:[#allocation8_spill] sm:$0xff] %v7091_v33  ;;  %v7107_v28 = vrot.slane %v3638_v48, 5  ;;  %v7116_v35 = vsel %vm6490_vm7, %v1269_v54, %v1270_v23  ;;  %v3686_v43 = vshll.u32 %v7105_v24, 16  ;;  %v3690_v48 = vshrl.u32 %v7105_v24, 16  ;;  %v5208_v31 = vld [vmem:[%s6238_s22 + $0x60] sm:$0xf] }
  0xd0   : > { %v3648_v5 = vshll.u32 %v7091_v33, 16  ;;  %v4877_v54 = vrot.slane %v7110_v61, 9  ;;  %v8019_v23 = vcombine.low %v6899_v34, %v6915_v4  ;;  %v7139_v29 = vcombine.low %v3617_v37, %v3627_v36  ;;  %v6102_v26 = vld [vmem:[%s6238_s22 + $0x9c] sm:$0xff]   ;;  %v6103_v30 = vld [vmem:[%s6238_s22 + $0xa8] sm:$0xff]  }
  0xd1   : > { %v3635_v53 = vor.u32 %v3634_v52, %v3631_v50  ;;  %v3655_v62 = vrot.slane %v3653_v27, 4  ;;  %v7150_v34 = vrot.slane %v3662_v6, 5  ;;  %v3668_v4 = vrot.slane %v3666_v9, 4  ;;  %v6154_v36 = vld [vmem:[%s7988_s1 + $0x8] sm:$0x3] }
  0xd2   : > { %v3679_v27 = vrot.slane %v3677_v25, 4  ;;  %v3682_v37 = vrot.slane %v3680_v8, 5  ;;  %v7159_v50 = vrot.slane %v3686_v43, 5  ;;  %v3692_v52 = vrot.slane %v3690_v48, 4  ;;  %v6155_v6 = vld [vmem:[%s6238_s22 + $0x94] sm:$0xf] }
  0xd3   : > { %v7165_v9 = vld [vmem:[%s6238_s22 + $0x64] sm:$0xf]  ;;  %v3701_v61 = vshrl.u32 %v5208_v31, 16  ;;  %v7167_v22 = vrot.slane %v3635_v53, 4  ;;  %v1281_v25 = vrot.slane %v6157_v18, 5  ;;  %v3669_v43 = vor.u32 %v3668_v4, %v7150_v34 }
  0xd4   : > { %5715 = vmatmul.mubr.msk.bf16.gmra.mrb[16].mxu0 %vm631_vm3, %v6100_v10  ;;  %8020 = vst [vmem:[#allocation9_spill] sm:$0xff] %v7165_v9  ;;  %v3704_v10 = vshll.u32 %v5208_v31, 16  ;;  %v3683_v31 = vor.u32 %v3682_v37, %v3679_v27  ;;  %v3693_v53 = vor.u32 %v3692_v52, %v7159_v50  ;;  %v8021_v18 = vcombine.low %v6906_v19, %v6919_v58  ;;  %v6104_v37 = vld [vmem:[%s6238_s22 + $0xb4] sm:$0xff]  }
  0xd5   : > { %5563 = vmatmul.mubr.msk.bf16.vlgmr.msra.gmra.mrb[0].mxu1 %vm631_vm3, %v8018_v38  ;;  %5718 = vmatprep.mubr.msk.bf16.mxu0 %vm631_vm3, %v6101_v21  ;;  %v3658_v21 = vrot.slane %v3656_v15, 5  ;;  %v7148_v38 = vld [vmem:[%s6238_s22 + $0x50] sm:$0x1]  ;;  %v7157_v15 = vld [vmem:[%s6238_s22 + $0x5c] sm:$0x1]  ;;  %v8022_v27 = vcombine.low %v6924_v2, %v6928_v1  ;;  %v1283_v52 = vrot.slane %v1281_v25, 4 }
  0xd6   : > { %5595 = vmatpush3.bf16.msra.mxu1 %v6895_v49  ;;  %5566 = vmatprep.mubr.msk.bf16.mxu1 %vm631_vm3, %v8019_v23  ;;  %v3645_v49 = vor.u32 %v3644_v46, %v7107_v28  ;;  %v7161_v46 = vrot.slane %v3648_v5, 5  ;;  %v1274_v23 = vrot.slane %v6155_v6, 5  ;;  %v3672_v48 = vshll.u32 %v7148_v38, 16  ;;  %v1150_v5 = vld [vmem:[%s6238_s22 + $0x9c] sm:$0xe] }
  0xd7   : > { %6061 = vmatprep.subr.msk.bf16.mxu1 %vm680_vm0, %v6154_v36  ;;  %v6156_v36 = vld [vmem:[%s6238_s22 + $0x98] sm:$0x1]  ;;  %v3659_v7 = vor.u32 %v3658_v21, %v3655_v62  ;;  %v3696_v6 = vshll.u32 %v7157_v15, 16  ;;  %v3714_v62 = vshrl.u32 %v7165_v9, 16  ;;  %v3706_v4 = vrot.slane %v3704_v10, 5 }
  0xd8   : > { %v1277_v33 = vrot.slane %v6156_v36, 5  ;;  %v3646_v8 = vrot.slane %v3645_v49, 4  ;;  %v3710_v36 = vshll.u32 %v7165_v9, 16  ;;  %v7186_v21 = vsel %vm6490_vm7, %v4877_v54, %v1274_v23  ;;  %v7197_v2 = vld [vmem:[%s6238_s22 + $0x68] sm:$0x1] }
  0xd9   : > { %v3703_v49 = vrot.slane %v3701_v61, 4  ;;  %v3660_v19 = vrot.slane %v3659_v7, 4  ;;  %v4878_v58 = vrot.slane %v1150_v5, 9  ;;  %v3670_v3 = vrot.slane %v3669_v43, 4  ;;  %8023 = vst [vmem:[#allocation10_spill] sm:$0xff] %v7197_v2  ;;  %v6105_v5 = vld [vmem:[%s6238_s22 + $0xc0] sm:$0xff]  }
  0xda   : > { %v3674_v54 = vrot.slane %v3672_v48, 5  ;;  %v3698_v63 = vrot.slane %v3696_v6, 5  ;;  %v1288_v61 = vrot.slane %v6632_v56, 5  ;;  %v3684_v10 = vrot.slane %v3683_v31, 4  ;;  %v1152_v31 = vld [vmem:[%s6238_s22 + $0xb4] sm:$0xe] }
  0xdb   : > { %v3694_v51 = vrot.slane %v3693_v53, 4  ;;  %v7199_v1 = vrot.slane %v3710_v36, 5  ;;  %v3716_v7 = vrot.slane %v3714_v62, 4  ;;  %v3641_v43 = vsel %vm6264_vm4, %v7167_v22, %v7107_v28  ;;  %v6159_v62 = vld [vmem:[%s6238_s22 + $0xb0] sm:$0x1] }
  0xdc   : > { %5719 = vmatmul.mubr.msk.bf16.gmra.mrb[20].mxu0 %vm631_vm3, %v6102_v26  ;;  %v1276_v26 = vrot.slane %v1274_v23, 4  ;;  %v1151_v23 = vld [vmem:[%s6238_s22 + $0xa8] sm:$0xe]  ;;  %v3651_v48 = vsel %vm6264_vm4, %v3646_v8, %v7161_v46  ;;  %v3707_v6 = vor.u32 %v3706_v4, %v3703_v49  ;;  %v3665_v53 = vsel %vm6264_vm4, %v3660_v19, %v7150_v34  ;;  %v5211_v46 = vld [vmem:[%s6238_s22 + $0x6c] sm:$0xf] }
  0xdd   : > { %5567 = vmatmul.mubr.msk.bf16.gmra.mrb[4].mxu1 %vm631_vm3, %v8021_v18  ;;  %5722 = vmatprep.mubr.msk.bf16.mxu0 %vm631_vm3, %v6103_v30  ;;  %v6158_v18 = vld [vmem:[%s6238_s22 + $0xa4] sm:$0x1]  ;;  %v7219_v36 = vsel %vm6490_vm7, %v4878_v58, %v1281_v25  ;;  %v4879_v28 = vrot.slane %v1151_v23, 9  ;;  %v1290_v8 = vrot.slane %v1288_v61, 4  ;;  %v3720_v49 = vshll.u32 %v7197_v2, 16 }
  0xde   : > { %5570 = vmatprep.mubr.msk.bf16.mxu1 %vm631_vm3, %v8022_v27  ;;  %v1284_v30 = vrot.slane %v6158_v18, 5  ;;  %v7211_v56 = vsel %vm6490_vm7, %v1276_v26, %v1277_v33  ;;  %v3675_v33 = vsel %vm6264_vm4, %v3670_v3, %v3674_v54  ;;  %v1291_v26 = vrot.slane %v6159_v62, 5  ;;  %v5214_v18 = vld [vmem:[%s6238_s22 + $0x78] sm:$0xf]  ;;  %v7274_v54 = vld [vmem:[%s6238_s22 + $0xbc] sm:$0x1] }
  0xdf   : > { %v3689_v34 = vsel %vm6264_vm4, %v3684_v10, %v7159_v50  ;;  %v3699_v25 = vsel %vm6264_vm4, %v3694_v51, %v3698_v63  ;;  %v3717_v4 = vor.u32 %v3716_v7, %v7199_v1  ;;  %v4880_v27 = vrot.slane %v1152_v31, 9  ;;  %v7248_v51 = vld [vmem:[%s6238_s22 + $0x70] sm:$0xf]  ;;  %v7278_v10 = vld [vmem:[%s6238_s22 + $0x7c] sm:$0xf] }
  0xe0   : > { %v7223_v22 = vsel %vm6490_vm7, %v1283_v52, %v1284_v30  ;;  %v8025_v3 = vcombine.low %v6941_v45, %v6945_v59  ;;  %v7244_v19 = vrot.slane %v3707_v6, 4  ;;  %v1295_v50 = vrot.slane %v6656_v42, 5  ;;  %8026 = vst [vmem:[#allocation12_spill] sm:$0xff] %v7248_v51  ;;  %8028 = vst [vmem:[#allocation13_spill] sm:$0xff] %v7278_v10  ;;  %v5217_v7 = vld [vmem:[%s6238_s22 + $0x84] sm:$0xf] }
  0xe1   : > { %8024 = vst [vmem:[#allocation11_spill] sm:$0xff] %v7223_v22  ;;  %v3725_v63 = vshrl.u32 %v5211_v46, 16  ;;  %v8027_v45 = vcombine.low %v6949_v47, %v6976_v41  ;;  %v7256_v58 = vcombine.low %v3665_v53, %v3675_v33  ;;  %v7262_v42 = vsel %vm6490_vm7, %v4879_v28, %v1288_v61  ;;  %v6106_v61 = vld [vmem:[%s6238_s22 + $0xcc] sm:$0xff]   ;;  %v7290_v31 = vld [vmem:[%s6238_s22 + $0x88] sm:$0xf] }
  0xe2   : > { %v7265_v30 = vcombine.low %v3689_v34, %v3699_v25  ;;  %v7269_v47 = vsel %vm6490_vm7, %v1290_v8, %v1291_v26  ;;  %v7271_v41 = vrot.slane %v3720_v49, 5  ;;  %v3734_v6 = vshll.u32 %v7248_v51, 16  ;;  %8029 = vst [vmem:[#allocation14_spill] sm:$0xff] %v7290_v31  ;;  %v5220_v62 = vld [vmem:[%s6238_s22 + $0x90] sm:$0xf] }
  0xe3   : > { %v7296_v28 = vrot.slane %v1295_v50, 4  ;;  %v7298_v33 = vrot.slane %v3725_v63, 4  ;;  %v3738_v8 = vshrl.u32 %v7248_v51, 16  ;;  %v3749_v26 = vshrl.u32 %v5214_v18, 16  ;;  %v7305_v25 = vld [vmem:[%s6238_s22 + $0x94] sm:$0xf] }
  0xe4   : > { %5723 = vmatmul.mubr.msk.bf16.gmra.mrb[24].mxu0 %vm631_vm3, %v6104_v37  ;;  %v7242_v37 = vcombine.low %v3641_v43, %v3651_v48  ;;  %v7286_v43 = vsel %vm6490_vm7, %v4880_v27, %v1295_v50  ;;  %v3728_v48 = vshll.u32 %v5211_v46, 16  ;;  %v3752_v49 = vshll.u32 %v5214_v18, 16  ;;  %8030 = vst [vmem:[#allocation15_spill] sm:$0xff] %v7305_v25  ;;  %v7343_v2 = vld [vmem:[%s6238_s22 + $0x8c] sm:$0x1] }
  0xe5   : > { %5571 = vmatmul.mubr.msk.bf16.gmra.mrb[8].mxu1 %vm631_vm3, %v8025_v3  ;;  %5726 = vmatprep.mubr.msk.bf16.mxu0 %vm631_vm3, %v6105_v5  ;;  %v7282_v5 = vrot.slane %v3717_v4, 4  ;;  %v3758_v46 = vshll.u32 %v7278_v10, 16  ;;  %v3762_v34 = vshrl.u32 %v7278_v10, 16  ;;  %v3773_v4 = vshrl.u32 %v5217_v7, 16 }
  0xe6   : > { %5574 = vmatprep.mubr.msk.bf16.mxu1 %vm631_vm3, %v8027_v45  ;;  %v3776_v27 = vshll.u32 %v5217_v7, 16  ;;  %v3782_v3 = vshll.u32 %v7290_v31, 16  ;;  %v3786_v50 = vshrl.u32 %v7290_v31, 16  ;;  %v7315_v45 = vld [vmem:[%s6238_s22 + $0x74] sm:$0x1]  ;;  %v3730_v18 = vrot.slane %v3728_v48, 5 }
  0xe7   : > { %v3797_v52 = vshrl.u32 %v5220_v62, 16  ;;  %v3800_v53 = vshll.u32 %v5220_v62, 16  ;;  %v8031_v7 = vcombine.low %v6960_v60, %v6985_v44  ;;  %v3740_v59 = vrot.slane %v3738_v8, 4  ;;  %v5223_v48 = vld [vmem:[%s6238_s22 + $0x9c] sm:$0xf] }
  0xe8   : > { %v3806_v63 = vshll.u32 %v7305_v25, 16  ;;  %v3810_v23 = vshrl.u32 %v7305_v25, 16  ;;  %v8032_v62 = vcombine.low %v7000_v17, %v7004_v57  ;;  %v7333_v44 = vld [vmem:[%s6238_s22 + $0x80] sm:$0x1]  ;;  %v3751_v60 = vrot.slane %v3749_v26, 4 }
  0xe9   : > { %8033 = vst [vmem:[#allocation16_spill] sm:$0xff] %v7333_v44  ;;  %v3775_v31 = vrot.slane %v3773_v4, 4  ;;  %v3778_v8 = vrot.slane %v3776_v27, 5  ;;  %v7337_v10 = vrot.slane %v3782_v3, 5  ;;  %v3788_v51 = vrot.slane %v3786_v50, 4 }
  0xea   : > { %v7340_v25 = vld [vmem:[%s6238_s22 + $0xa0] sm:$0xf]  ;;  %v3799_v17 = vrot.slane %v3797_v52, 4  ;;  %v3802_v57 = vrot.slane %v3800_v53, 5  ;;  %v3824_v9 = vshll.u32 %v5223_v48, 16  ;;  %v3731_v26 = vor.u32 %v3730_v18, %v7298_v33 }
  0xeb   : > { %v3768_v27 = vshll.u32 %v7333_v44, 16  ;;  %v7352_v3 = vld [vmem:[%s6238_s22 + $0x98] sm:$0x1]  ;;  %v3830_v50 = vshll.u32 %v7340_v25, 16  ;;  %v3834_v52 = vshrl.u32 %v7340_v25, 16  ;;  %v3779_v22 = vor.u32 %v3778_v8, %v3775_v31 }
  0xec   : > { %5727 = vmatmul.mubr.msk.bf16.gmra.mrb[28].mxu0 %vm631_vm3, %v6106_v61  ;;  %v7323_v61 = vrot.slane %v3734_v6, 5  ;;  %v3764_v6 = vrot.slane %v3762_v34, 4  ;;  %v3812_v34 = vrot.slane %v3810_v23, 4  ;;  %v3792_v33 = vshll.u32 %v7343_v2, 16 }
  0xed   : > { %5575 = vmatmul.mubr.msk.bf16.gmra.mrb[12].mxu1 %vm631_vm3, %v8031_v7  ;;  %5732 = vmatprep.mubr.msk.bf16.mxu0 %vm631_vm3, %v7065_v20  ;;  %v3754_v7 = vrot.slane %v3752_v49, 5  ;;  %v7335_v20 = vrot.slane %v3758_v46, 5  ;;  %v3744_v49 = vshll.u32 %v7315_v45, 16  ;;  %v7347_v46 = vrot.slane %v3806_v63, 5 }
  0xee   : > { %5578 = vmatprep.mubr.msk.bf16.mxu1 %vm631_vm3, %v8032_v62  ;;  %v3821_v62 = vshrl.u32 %v5223_v48, 16  ;;  %v3741_v4 = vor.u32 %v3740_v59, %v7323_v61  ;;  %v3789_v23 = vor.u32 %v3788_v51, %v7337_v10  ;;  %v3803_v59 = vor.u32 %v3802_v57, %v3799_v17  ;;  %v7385_v57 = vld [vmem:[%s6238_s22 + $0xa4] sm:$0x1] }
  0xef   : > { %v3755_v53 = vor.u32 %v3754_v7, %v3751_v60  ;;  %v3765_v48 = vor.u32 %v3764_v6, %v7335_v20  ;;  %v3826_v18 = vrot.slane %v3824_v9, 5  ;;  %v8034_v44 = vcombine.low %v7012_v11, %v7016_v40 }
  0xf0   : > { %v3823_v63 = vrot.slane %v3821_v62, 4  ;;  %v8035_v31 = vrot.slane %v7274_v54, 5  ;;  %v3746_v51 = vrot.slane %v3744_v49, 5  ;;  %v3813_v60 = vor.u32 %v3812_v34, %v7347_v46  ;;  %v7388_v34 = vld [vmem:[%s6238_s22 + $0xac] sm:$0xf] }
  0xf1   : > { %v3816_v9 = vshll.u32 %v7352_v3, 16  ;;  %v8036_v11 = vcombine.low %v7084_v39, %v7088_v55  ;;  %v3732_v40 = vrot.slane %v3731_v26, 4  ;;  %v7381_v54 = vrot.slane %v3830_v50, 5 }
  0xf2   : > { %v3756_v7 = vrot.slane %v3755_v53, 4  ;;  %v3766_v6 = vrot.slane %v3765_v48, 4  ;;  %v3770_v8 = vrot.slane %v3768_v27, 5  ;;  %v3794_v17 = vrot.slane %v3792_v33, 5  ;;  %v7398_v48 = vld [vmem:[%s6238_s22 + $0xb0] sm:$0x1] }
  0xf3   : > { %v3780_v39 = vrot.slane %v3779_v22, 4  ;;  %v3790_v55 = vrot.slane %v3789_v23, 4  ;;  %v3804_v62 = vrot.slane %v3803_v59, 4  ;;  %v3827_v49 = vor.u32 %v3826_v18, %v3823_v63 }
  0xf4   : > { %5733 = vmatmul.mubr.msk.bf16.vlgmr.msra.gmra.mrb[0].mxu0 %vm631_vm3, %v7128_v16  ;;  %v7371_v16 = vsel %vm6490_vm7, %v7296_v28, %v8035_v31  ;;  %v3836_v28 = vrot.slane %v3834_v52, 4  ;;  %v3818_v26 = vrot.slane %v3816_v9, 5  ;;  %v3737_v52 = vsel %vm6264_vm4, %v3732_v40, %v7323_v61 }
  0xf5   : > { %5579 = vmatmul.mubr.msk.bf16.gmra.mrb[16].mxu1 %vm631_vm3, %v8034_v44  ;;  %5765 = vmatpush3.bf16.msra.mxu0 %v7069_v14  ;;  %v3742_v14 = vrot.slane %v3741_v4, 4  ;;  %v5226_v44 = vld [vmem:[%s6238_s22 + $0xa8] sm:$0xf]  ;;  %v3840_v22 = vshll.u32 %v7385_v57, 16  ;;  %v3761_v33 = vsel %vm6264_vm4, %v3756_v7, %v7335_v20  ;;  %v3771_v23 = vsel %vm6264_vm4, %v3766_v6, %v3770_v8 }
  0xf6   : > { %5582 = vmatprep.mubr.msk.bf16.mxu1 %vm631_vm3, %v8036_v11  ;;  %5736 = vmatprep.mubr.msk.bf16.mxu0 %vm631_vm3, %v7139_v29  ;;  %v3814_v29 = vrot.slane %v3813_v60, 4  ;;  %v3845_v4 = vshrl.u32 %v5226_v44, 16  ;;  %v3848_v50 = vshll.u32 %v5226_v44, 16  ;;  %v3837_v53 = vor.u32 %v3836_v28, %v7381_v54  ;;  %v5275_v11 = vld [vmem:[%s6238_s22 + $0x48] sm:$0xe] }
  0xf7   : > { %v3747_v27 = vsel %vm6264_vm4, %v3742_v14, %v3746_v51  ;;  %v3854_v59 = vshll.u32 %v7388_v34, 16  ;;  %v3858_v61 = vshrl.u32 %v7388_v34, 16  ;;  %v3785_v63 = vsel %vm6264_vm4, %v3780_v39, %v7337_v10  ;;  %v7463_v39 = vld [vmem:[%s6238_s22 + $0xb8] sm:$0xf] }
  0xf8   : > { %v3795_v18 = vsel %vm6264_vm4, %v3790_v55, %v3794_v17  ;;  %v3809_v20 = vsel %vm6264_vm4, %v3804_v62, %v7347_v46  ;;  %v3828_v31 = vrot.slane %v3827_v49, 4  ;;  %v8037_v51 = vcombine.low %v7101_v12, %v7116_v35 }
  0xf9   : > { %v3847_v10 = vrot.slane %v3845_v4, 4  ;;  %v3850_v60 = vrot.slane %v3848_v50, 5  ;;  %v3864_v9 = vshll.u32 %v7398_v48, 16  ;;  %v8038_v46 = vcombine.low %v7186_v21, %v7211_v56  ;;  %v5229_v21 = vld [vmem:[%s6238_s22 + $0xb4] sm:$0xf] }
  0xfa   : > { %v4896_v12 = vcombine.low %v7262_v42, %v7269_v47  ;;  %v8039_v35 = vsel %vm6264_vm4, %v7282_v5, %v7271_v41  ;;  %v3838_v14 = vrot.slane %v3837_v53, 4  ;;  %v3842_v28 = vrot.slane %v3840_v22, 5  ;;  %v5277_v4 = vld [vmem:[%s6238_s22 + $0x60] sm:$0xe]  ;;  %v5278_v53 = vld [vmem:[%s6238_s22 + $0x6c] sm:$0xe] }
  0xfb   : > { %v4897_v56 = vcombine.low %v7286_v43, %v7371_v16  ;;  %v7446_v44 = vcombine.low %v3737_v52, %v3747_v27  ;;  %v7448_v42 = vrot.slane %v3854_v59, 5  ;;  %v3860_v47 = vrot.slane %v3858_v61, 4  ;;  %v8048_v16 = vld [vmem:[#allocation4_spill] sm:$0xff] }
  0xfc   : > { %5737 = vmatmul.mubr.msk.bf16.gmra.mrb[4].mxu0 %vm631_vm3, %v7242_v37  ;;  %v3819_v37 = vsel %vm6264_vm4, %v3814_v29, %v3818_v26  ;;  %v7450_v41 = vcombine.low %v3761_v33, %v3771_v23  ;;  %v7452_v5 = vcombine.low %v3785_v63, %v3795_v18  ;;  %v3833_v6 = vsel %vm6264_vm4, %v3828_v31, %v7381_v54  ;;  %v8041_v23 = vld [vmem:[#allocation11_spill] sm:$0xff]  ;;  %v5232_v63 = vld [vmem:[%s6238_s22 + $0xc0] sm:$0xf]  ;;  %v8043_v18 = vld [vmem:[#allocation9_spill] sm:$0xff] }
  0xfd   : > { %5583 = vmatmul.mubr.msk.bf16.gmra.mrb[20].mxu1 %vm631_vm3, %v8037_v51  ;;  %5740 = vmatprep.mubr.msk.bf16.mxu0 %vm631_vm3, %v7256_v58  ;;  %v8040_v58 = vsel %vm6264_vm4, %v7244_v19, %v7199_v1  ;;  %v7454_v7 = vcombine.low %v3809_v20, %v3819_v37  ;;  %v5291_v1 = vrot.slane %v5275_v11, 9  ;;  %v5276_v19 = vld [vmem:[%s6238_s22 + $0x54] sm:$0xe]  ;;  %v3851_v8 = vor.u32 %v3850_v60, %v3847_v10  ;;  %v8044_v31 = vld [vmem:[#allocation10_spill] sm:$0xff] }
  0xfe   : > { %5586 = vmatprep.mubr.msk.bf16.mxu1 %vm631_vm3, %v8038_v46  ;;  %v5245_v40 = vcombine.low %v8040_v58, %v8039_v35  ;;  %v7460_v17 = vrot.slane %v3864_v9, 5  ;;  %v3869_v55 = vshrl.u32 %v5229_v21, 16  ;;  %v3843_v62 = vsel %vm6264_vm4, %v3838_v14, %v3842_v28  ;;  %v8045_v9 = vld [vmem:[#allocation12_spill] sm:$0xff]  ;;  %v7512_v35 = vld [vmem:[%s6238_s22 + $0xbc] sm:$0x1] }
  0xff   : > { %v3872_v49 = vshll.u32 %v5229_v21, 16  ;;  %v4328_v29 = vrot.slane %v7094_v0, 5  ;;  %v4331_v26 = vrot.slane %v7148_v38, 5  ;;  %v3861_v50 = vor.u32 %v3860_v47, %v7448_v42  ;;  %v7515_v58 = vld [vmem:[%s6238_s22 + $0xc4] sm:$0xf] }
 0x100   : > { %v5292_v52 = vrot.slane %v5276_v19, 9  ;;  %v4335_v54 = vrot.slane %v7105_v24, 5  ;;  %v4338_v27 = vrot.slane %v7157_v15, 5  ;;  %v3878_v22 = vshll.u32 %v7463_v39, 16  ;;  %v5279_v19 = vld [vmem:[%s6238_s22 + $0x78] sm:$0xe] }
 0x101   : > { %v3882_v33 = vshrl.u32 %v7463_v39, 16  ;;  %v7480_v0 = vsel %vm6490_vm7, %v5291_v1, %v4328_v29  ;;  %v4330_v38 = vrot.slane %v4328_v29, 4  ;;  %v8042_v59 = vcombine.low %v7219_v36, %v8041_v23  ;;  %v8046_v23 = vld [vmem:[#allocation13_spill] sm:$0xff] }
 0x102   : > { %v7487_v24 = vcombine.low %v3833_v6, %v3843_v62  ;;  %v7491_v15 = vsel %vm6490_vm7, %v5292_v52, %v4335_v54  ;;  %v5293_v61 = vrot.slane %v5277_v4, 9  ;;  %v4342_v20 = vrot.slane %v8043_v18, 5  ;;  %v6107_v6 = vld [vmem:[%s6238_s22 + $0xc] sm:$0xff]  }
 0x103   : > { %v7497_v36 = vsel %vm6490_vm7, %v4330_v38, %v4331_v26  ;;  %v4345_v51 = vrot.slane %v8044_v31, 5  ;;  %v5294_v37 = vrot.slane %v5278_v53, 9  ;;  %v4349_v11 = vrot.slane %v8045_v9, 5 }
 0x104   : > { %5741 = vmatmul.mubr.msk.bf16.gmra.mrb[8].mxu0 %vm631_vm3, %v7265_v30  ;;  %v4337_v30 = vrot.slane %v4335_v54, 4  ;;  %v5308_v10 = vcombine.low %v7480_v0, %v7497_v36  ;;  %v4352_v46 = vrot.slane %v7315_v45, 5  ;;  %v7521_v14 = vsel %vm6490_vm7, %v5293_v61, %v4342_v20 }
 0x105   : > { %5587 = vmatmul.mubr.msk.bf16.gmra.mrb[24].mxu1 %vm631_vm3, %v8042_v59  ;;  %5744 = vmatprep.mubr.msk.bf16.mxu0 %vm631_vm3, %v5245_v40  ;;  %v4344_v28 = vrot.slane %v4342_v20, 4  ;;  %v7523_v21 = vrot.slane %v3869_v55, 4  ;;  %v3893_v47 = vshrl.u32 %v5232_v63, 16  ;;  %v7527_v45 = vsel %vm6490_vm7, %v5294_v37, %v4349_v11  ;;  %v5006_v55 = vld [vmem:[%s6238_s22 + $0x78] sm:$0xf]  ;;  %v8047_v59 = vld [vmem:[#allocation16_spill] sm:$0xff] }
 0x106   : > { %5590 = vmatprep.mubr.msk.bf16.mxu1 %vm631_vm3, %v4896_v12  ;;  %v7505_v60 = vsel %vm6490_vm7, %v4337_v30, %v4338_v27  ;;  %v7509_v12 = vrot.slane %v3851_v8, 4  ;;  %v4351_v1 = vrot.slane %v4349_v11, 4  ;;  %v7531_v8 = vrot.slane %v3861_v50, 4 }
 0x107   : > { %v5309_v40 = vcombine.low %v7491_v15, %v7505_v60  ;;  %v7533_v62 = vrot.slane %v3872_v49, 5  ;;  %v3896_v29 = vshll.u32 %v5232_v63, 16  ;;  %v7537_v26 = vsel %vm6490_vm7, %v4344_v28, %v4345_v51  ;;  %v8050_v28 = vld [vmem:[#allocation14_spill] sm:$0xff] }
 0x108   : > { %v7540_v4 = vrot.slane %v3878_v22, 5  ;;  %v7542_v52 = vrot.slane %v3882_v33, 4  ;;  %v5310_v54 = vcombine.low %v7521_v14, %v7537_v26  ;;  %v7548_v27 = vsel %vm6490_vm7, %v4351_v1, %v4352_v46  ;;  %v5280_v33 = vld [vmem:[%s6238_s22 + $0x84] sm:$0xe]  ;;  %v6108_v1 = vld [vmem:[%s6238_s22 + $0x18] sm:$0xff]  }
 0x109   : > { %v3888_v49 = vshll.u32 %v7512_v35, 16  ;;  %v3902_v50 = vshll.u32 %v7515_v58, 16  ;;  %v5311_v53 = vcombine.low %v7527_v45, %v7548_v27  ;;  %v5295_v22 = vrot.slane %v5279_v19, 9  ;;  %v6170_v60 = vld [vmem:[%s6238_s22 + $0xa0] sm:$0xf] }
 0x10a   : > { %v3895_v38 = vrot.slane %v3893_v47, 4  ;;  %v4359_v30 = vrot.slane %v8047_v59, 5  ;;  %v2218_v61 = vshrl.u32 %v5006_v55, 16  ;;  %v3898_v63 = vrot.slane %v3896_v29, 5  ;;  %v5235_v29 = vld [vmem:[%s6238_s22 + $0xcc] sm:$0xf] }
 0x10b   : > { %v3906_v18 = vshrl.u32 %v7515_v58, 16  ;;  %v2221_v43 = vshll.u32 %v5006_v55, 16  ;;  %v5296_v37 = vrot.slane %v5280_v33, 9  ;;  %v3857_v9 = vsel %vm6264_vm4, %v7509_v12, %v7448_v42  ;;  %v7591_v55 = vld [vmem:[%s6238_s22 + $0xd0] sm:$0xf] }
 0x10c   : > { %5745 = vmatmul.mubr.msk.bf16.gmra.mrb[12].mxu0 %vm631_vm3, %v7446_v44  ;;  %v4356_v44 = vrot.slane %v8046_v23, 5  ;;  %v2220_v51 = vrot.slane %v2218_v61, 4  ;;  %v3875_v11 = vor.u32 %v7533_v62, %v7523_v21  ;;  %v4363_v47 = vrot.slane %v8050_v28, 5  ;;  %v6109_v21 = vld [vmem:[%s6238_s22 + $0x24] sm:$0xff]   ;;  %v6174_v27 = vld [vmem:[%s6238_s22 + $0xac] sm:$0xf] }
 0x10d   : > { %5591 = vmatmul.mubr.msk.bf16.gmra.mrb[28].mxu1 %vm631_vm3, %v4897_v56  ;;  %5748 = vmatprep.mubr.msk.bf16.mxu0 %vm631_vm3, %v7450_v41  ;;  %v8049_v56 = vld [vmem:[#allocation5_spill] sm:$0xff]  ;;  %v2223_v46 = vrot.slane %v2221_v43, 5  ;;  %v3867_v19 = vsel %vm6264_vm4, %v7531_v8, %v7460_v17  ;;  %v4366_v12 = vrot.slane %v7343_v2, 5  ;;  %v7599_v62 = vrot.slane %v3902_v50, 5  ;;  %v5281_v8 = vld [vmem:[%s6238_s22 + $0x90] sm:$0xe] }
 0x10e   : > { %5596 = vmatprep.mubr.msk.bf16.mxu1 %vm631_vm3, %v6107_v6  ;;  %v2240_v41 = vsel %vm6264_vm4, %v8049_v56, %v8048_v16  ;;  %v7573_v20 = vsel %vm6490_vm7, %v5295_v22, %v4356_v44  ;;  %v4358_v31 = vrot.slane %v4356_v44, 4  ;;  %v3885_v6 = vor.u32 %v7542_v52, %v7540_v4  ;;  %v7605_v52 = vld [vmem:[%s6238_s22 + $0xc8] sm:$0x1]  ;;  %v8052_v16 = vld [vmem:[#allocation2_spill] sm:$0xff] }
 0x10f   : > { %v3908_v22 = vrot.slane %v3906_v18, 4  ;;  %v2224_v17 = vor.u32 %v2223_v46, %v2220_v51  ;;  %v3890_v23 = vrot.slane %v3888_v49, 5  ;;  %v3899_v44 = vor.u32 %v3898_v63, %v3895_v38  ;;  %v8053_v51 = vld [vmem:[#allocation3_spill] sm:$0xff] }
 0x110   : > { %v7595_v42 = vsel %vm6490_vm7, %v4358_v31, %v4359_v30  ;;  %v7609_v59 = vsel %vm6490_vm7, %v5296_v37, %v4363_v47  ;;  %v4365_v30 = vrot.slane %v4363_v47, 4  ;;  %v3917_v2 = vshrl.u32 %v5235_v29, 16 }
 0x111   : > { %v5312_v33 = vcombine.low %v7573_v20, %v7595_v42  ;;  %v3920_v50 = vshll.u32 %v5235_v29, 16  ;;  %v3926_v61 = vshll.u32 %v7591_v55, 16  ;;  %v2225_v18 = vrot.slane %v2224_v17, 4  ;;  %v6110_v29 = vld [vmem:[%s6238_s22 + $0x30] sm:$0xff]  }
 0x112   : > { %v3930_v49 = vshrl.u32 %v7591_v55, 16  ;;  %v7620_v38 = vsel %vm6490_vm7, %v4365_v30, %v4366_v12  ;;  %v5297_v63 = vrot.slane %v5281_v8, 9  ;;  %v3909_v56 = vor.u32 %v3908_v22, %v7599_v62 }
 0x113   : > { %v3912_v31 = vshll.u32 %v7605_v52, 16  ;;  %v5313_v37 = vcombine.low %v7609_v59, %v7620_v38  ;;  %v5251_v46 = vcombine.low %v3857_v9, %v3867_v19  ;;  %v3876_v28 = vrot.slane %v3875_v11, 4  ;;  %v5282_v11 = vld [vmem:[%s6238_s22 + $0x9c] sm:$0xe] }
 0x114   : > { %5749 = vmatmul.mubr.msk.bf16.gmra.mrb[16].mxu0 %vm631_vm3, %v7452_v5  ;;  %v8051_v5 = vld [vmem:[#allocation15_spill] sm:$0xff]  ;;  %v3886_v47 = vrot.slane %v3885_v6, 4  ;;  %v3900_v12 = vrot.slane %v3899_v44, 4  ;;  %v4373_v8 = vrot.slane %v7352_v3, 5  ;;  %v3919_v30 = vrot.slane %v3917_v2, 4  ;;  %v6111_v19 = vld [vmem:[%s6238_s22 + $0x3c] sm:$0xff]  }
 0x115   : > { %5597 = vmatmul.mubr.msk.bf16.vlgmr.msra.gmra.mrb[0].mxu1 %vm631_vm3, %v6108_v1  ;;  %5752 = vmatprep.mubr.msk.bf16.mxu0 %vm631_vm3, %v7454_v7  ;;  %v4370_v43 = vrot.slane %v8051_v5, 5  ;;  %v2230_v7 = vsel %vm6264_vm4, %v2225_v18, %v8053_v51  ;;  %v3922_v18 = vrot.slane %v3920_v50, 5  ;;  %v7643_v5 = vrot.slane %v3926_v61, 5 }
 0x116   : > { %5799 = vmatpush3.bf16.msra.mxu1 %v8052_v16  ;;  %5600 = vmatprep.mubr.msk.bf16.mxu1 %vm631_vm3, %v6109_v21  ;;  %v7632_v1 = vcombine.low %v2230_v7, %v2240_v41  ;;  %v7636_v21 = vld [vmem:[%s6238_s22 + $0xd4] sm:$0x1]  ;;  %v3932_v9 = vrot.slane %v3930_v49, 4  ;;  %v3910_v41 = vrot.slane %v3909_v56, 4  ;;  %v3914_v6 = vrot.slane %v3912_v31, 5 }
 0x117   : > { %v7640_v22 = vsel %vm6490_vm7, %v5297_v63, %v4370_v43  ;;  %v4372_v17 = vrot.slane %v4370_v43, 4  ;;  %v3881_v63 = vsel %vm6264_vm4, %v3876_v28, %v7540_v4  ;;  %v3891_v2 = vsel %vm6264_vm4, %v3886_v47, %v3890_v23  ;;  %v6161_v16 = vld [vmem:[%s6238_s22 + $0x1c] sm:$0xf]  ;;  %v5283_v28 = vld [vmem:[%s6238_s22 + $0xa8] sm:$0xe] }
 0x118   : > { %v3936_v50 = vshll.u32 %v7636_v21, 16  ;;  %v5298_v61 = vrot.slane %v5282_v11, 9  ;;  %v4377_v49 = vrot.slane %v7340_v25, 5  ;;  %v3905_v4 = vsel %vm6264_vm4, %v3900_v12, %v7599_v62  ;;  %v5271_v62 = vld [vmem:[%s6238_s22 + $0x18] sm:$0xe]  ;;  %v6112_v47 = vld [vmem:[%s6238_s22 + $0x48] sm:$0xff]  }
 0x119   : > { %v7649_v44 = vsel %vm6490_vm7, %v4372_v17, %v4373_v8  ;;  %v3933_v43 = vor.u32 %v3932_v9, %v7643_v5  ;;  %v4380_v23 = vrot.slane %v7385_v57, 5  ;;  %v3915_v25 = vsel %vm6264_vm4, %v3910_v41, %v3914_v6  ;;  %v6162_v11 = vld [vmem:[%s6238_s22 + $0x20] sm:$0x1] }
 0x11a   : > { %v5314_v3 = vcombine.low %v7640_v22, %v7649_v44  ;;  %v4300_v56 = vrot.slane %v6161_v16, 5  ;;  %v7675_v31 = vsel %vm6490_vm7, %v5298_v61, %v4377_v49  ;;  %v4379_v51 = vrot.slane %v4377_v49, 4  ;;  %v5284_v49 = vld [vmem:[%s6238_s22 + $0xb4] sm:$0xe] }
 0x11b   : > { %v5252_v7 = vcombine.low %v3881_v63, %v3891_v2  ;;  %v3934_v17 = vrot.slane %v3933_v43, 4  ;;  %v5299_v41 = vrot.slane %v5283_v28, 9  ;;  %v4384_v6 = vrot.slane %v7388_v34, 5  ;;  %v5272_v2 = vld [vmem:[%s6238_s22 + $0x24] sm:$0xe] }
 0x11c   : > { %5753 = vmatmul.mubr.msk.bf16.gmra.mrb[20].mxu0 %vm631_vm3, %v7487_v24  ;;  %v3923_v24 = vor.u32 %v3922_v18, %v3919_v30  ;;  %v7680_v57 = vsel %vm6490_vm7, %v4379_v51, %v4380_v23  ;;  %v6113_v30 = vld [vmem:[%s6238_s22 + $0x54] sm:$0xff]   ;;  %v5287_v18 = vrot.slane %v5271_v62, 9  ;;  %v4302_v9 = vrot.slane %v4300_v56, 4  ;;  %v6165_v28 = vld [vmem:[%s6238_s22 + $0x2c] sm:$0x1] }
 0x11d   : > { %5601 = vmatmul.mubr.msk.bf16.gmra.mrb[4].mxu1 %vm631_vm3, %v6110_v29  ;;  %5756 = vmatprep.mubr.msk.bf16.mxu0 %vm631_vm3, %v5251_v46  ;;  %v3938_v46 = vrot.slane %v3936_v50, 5  ;;  %v5253_v29 = vcombine.low %v3905_v4, %v3915_v25  ;;  %v5315_v8 = vcombine.low %v7675_v31, %v7680_v57  ;;  %v4387_v63 = vrot.slane %v7398_v48, 5  ;;  %v6163_v50 = vld [vmem:[%s6238_s22 + $0x28] sm:$0xf]  ;;  %v5273_v25 = vld [vmem:[%s6238_s22 + $0x30] sm:$0xe] }
 0x11e   : > { %5604 = vmatprep.mubr.msk.bf16.mxu1 %vm631_vm3, %v6111_v19  ;;  %v3924_v12 = vrot.slane %v3923_v24, 4  ;;  %v4303_v19 = vrot.slane %v6162_v11, 5  ;;  %v4307_v61 = vrot.slane %v6163_v50, 5  ;;  %v7703_v48 = vsel %vm6490_vm7, %v5299_v41, %v4384_v6  ;;  %v6115_v11 = vld [vmem:[%s6238_s22 + $0x6c] sm:$0xff]   ;;  %v8054_v41 = vld [vmem:[#allocation6_spill] sm:$0xff] }
 0x11f   : > { %v3939_v34 = vsel %vm6264_vm4, %v3934_v17, %v3938_v46  ;;  %v4386_v24 = vrot.slane %v4384_v6, 4  ;;  %v4301_v43 = vsel %vm6490_vm7, %v5287_v18, %v4300_v56  ;;  %v5288_v51 = vrot.slane %v5272_v2, 9  ;;  %v5285_v50 = vld [vmem:[%s6238_s22 + $0xc0] sm:$0xe]  ;;  %v6179_v31 = vld [vmem:[%s6238_s22 + $0xc8] sm:$0x1] }
 0x120   : > { %v3929_v4 = vsel %vm6264_vm4, %v3924_v12, %v7643_v5  ;;  %v4304_v23 = vsel %vm6490_vm7, %v4302_v9, %v4303_v19  ;;  %v6164_v5 = vld [vmem:[%s6238_s22 + $0x34] sm:$0xf]  ;;  %v6114_v12 = vld [vmem:[%s6238_s22 + $0x60] sm:$0xff]   ;;  %v5289_v18 = vrot.slane %v5273_v25, 9  ;;  %v4394_v9 = vrot.slane %v7512_v35, 5 }
 0x121   : > { %v4314_v16 = vrot.slane %v6164_v5, 5  ;;  %v7714_v62 = vsel %vm6490_vm7, %v4386_v24, %v4387_v63  ;;  %v5254_v46 = vcombine.low %v3929_v4, %v3939_v34  ;;  %v5304_v17 = vcombine.low %v4301_v43, %v4304_v23  ;;  %v5274_v24 = vld [vmem:[%s6238_s22 + $0x3c] sm:$0xe] }
 0x122   : > { %v5316_v56 = vcombine.low %v7703_v48, %v7714_v62  ;;  %v4317_v6 = vrot.slane %v8054_v41, 5  ;;  %v4308_v35 = vsel %vm6490_vm7, %v5288_v51, %v4307_v61  ;;  %v5301_v5 = vrot.slane %v5285_v50, 9 }
 0x123   : > { %v4316_v19 = vrot.slane %v4314_v16, 4  ;;  %v4315_v23 = vsel %vm6490_vm7, %v5289_v18, %v4314_v16  ;;  %v4401_v51 = vrot.slane %v7605_v52, 5  ;;  %v2381_v57 = vshll.u32 %v6179_v31, 16 }
 0x124   : > { %5757 = vmatmul.mubr.msk.bf16.gmra.mrb[24].mxu0 %vm631_vm3, %v5252_v7  ;;  %v5300_v7 = vrot.slane %v5284_v49, 9 }
 0x125   : > { %5605 = vmatmul.mubr.msk.bf16.gmra.mrb[8].mxu1 %vm631_vm3, %v6112_v47  ;;  %5760 = vmatprep.mubr.msk.bf16.mxu0 %vm631_vm3, %v5253_v29  ;;  %v4310_v47 = vrot.slane %v6165_v28, 5  ;;  %v4391_v29 = vrot.slane %v7463_v39, 5  ;;  %v8055_v39 = vld [vmem:[#allocation7_spill] sm:$0xff]  ;;  %v4318_v25 = vsel %vm6490_vm7, %v4316_v19, %v4317_v6  ;;  %v5290_v28 = vrot.slane %v5274_v24, 9 }
 0x126   : > { %5608 = vmatprep.mubr.msk.bf16.mxu1 %vm631_vm3, %v6113_v30  ;;  %v4309_v30 = vrot.slane %v4307_v61, 4  ;;  %v4321_v49 = vrot.slane %v8055_v39, 5  ;;  %v4398_v61 = vrot.slane %v7515_v58, 5  ;;  %v6166_v39 = vld [vmem:[%s6238_s22 + $0x70] sm:$0xf]  ;;  %v4405_v24 = vrot.slane %v7591_v55, 5 }
 0x127   : > { %v7726_v63 = vsel %vm6490_vm7, %v5300_v7, %v4391_v29  ;;  %v4393_v2 = vrot.slane %v4391_v29, 4  ;;  %v5003_v7 = vld [vmem:[%s6238_s22 + $0x6c] sm:$0xf]  ;;  %v8056_v29 = vld [vmem:[#allocation8_spill] sm:$0xff] }
 0x128   : > { %v4311_v34 = vsel %vm6490_vm7, %v4309_v30, %v4310_v47  ;;  %v4323_v47 = vrot.slane %v4321_v49, 4  ;;  %v6116_v30 = vld [vmem:[%s6238_s22 + $0x78] sm:$0xff]   ;;  %v7757_v16 = vsel %vm6490_vm7, %v5301_v5, %v4398_v61  ;;  %v4400_v18 = vrot.slane %v4398_v61, 4 }
 0x129   : > { %v7733_v4 = vsel %vm6490_vm7, %v4393_v2, %v4394_v9  ;;  %v5306_v9 = vcombine.low %v4315_v23, %v4318_v25  ;;  %v2194_v19 = vshrl.u32 %v5003_v7, 16  ;;  %v2197_v41 = vshll.u32 %v5003_v7, 16 }
 0x12a   : > { %v5317_v43 = vcombine.low %v7726_v63, %v7733_v4  ;;  %v7762_v58 = vsel %vm6490_vm7, %v4400_v18, %v4401_v51  ;;  %v4322_v6 = vsel %vm6490_vm7, %v5290_v28, %v4321_v49  ;;  %v4408_v49 = vrot.slane %v7636_v21, 5  ;;  %v6118_v51 = vld [vmem:[%s6238_s22 + $0x90] sm:$0xff]   ;;  %v6119_v21 = vld [vmem:[%s6238_s22 + $0x9c] sm:$0xff]  }
 0x12b   : > { %v5318_v50 = vcombine.low %v7757_v16, %v7762_v58  ;;  %v2196_v23 = vrot.slane %v2194_v19, 4  ;;  %v2199_v25 = vrot.slane %v2197_v41, 5  ;;  %v4407_v7 = vrot.slane %v4405_v24, 4 }
 0x12c   : > { %5761 = vmatmul.mubr.msk.bf16.gmra.mrb[28].mxu0 %vm631_vm3, %v5254_v46  ;;  %v5305_v46 = vcombine.low %v4308_v35, %v4311_v34  ;;  %v2203_v35 = vshll.u32 %v6166_v39, 16  ;;  %v2207_v34 = vshrl.u32 %v6166_v39, 16 }
 0x12d   : > { %5609 = vmatmul.mubr.msk.bf16.gmra.mrb[12].mxu1 %vm631_vm3, %v6114_v12  ;;  %5766 = vmatprep.mubr.msk.bf16.mxu0 %vm631_vm3, %v5304_v17  ;;  %v4324_v12 = vrot.slane %v8056_v29, 5  ;;  %v5286_v17 = vld [vmem:[%s6238_s22 + $0xcc] sm:$0xe]  ;;  %v7784_v55 = vsel %vm6490_vm7, %v4407_v7, %v4408_v49 }
 0x12e   : > { %5612 = vmatprep.mubr.msk.bf16.mxu1 %vm631_vm3, %v6115_v11  ;;  %v6117_v11 = vld [vmem:[%s6238_s22 + $0x84] sm:$0xff]   ;;  %v5302_v52 = vrot.slane %v5286_v17, 9  ;;  %v2209_v28 = vrot.slane %v2207_v34, 4  ;;  %v6167_v17 = vld [vmem:[%s6238_s22 + $0x74] sm:$0x1] }
 0x12f   : > { %v4325_v2 = vsel %vm6490_vm7, %v4323_v47, %v4324_v12  ;;  %v5009_v47 = vld [vmem:[%s6238_s22 + $0x84] sm:$0xf]  ;;  %v2200_v12 = vor.u32 %v2199_v25, %v2196_v23  ;;  %v6121_v34 = vld [vmem:[%s6238_s22 + $0xb4] sm:$0xff]  }
 0x130   : > { %v7779_v5 = vsel %vm6490_vm7, %v5302_v52, %v4405_v24  ;;  %v5307_v61 = vcombine.low %v4322_v6, %v4325_v2  ;;  %v2245_v18 = vshll.u32 %v5009_v47, 16  ;;  %v5012_v6 = vld [vmem:[%s6238_s22 + $0x90] sm:$0xf]  ;;  %v6120_v2 = vld [vmem:[%s6238_s22 + $0xa8] sm:$0xff]  }
 0x131   : > { %v5319_v29 = vcombine.low %v7779_v5, %v7784_v55  ;;  %v2201_v52 = vrot.slane %v2200_v12, 4  ;;  %v2266_v23 = vshrl.u32 %v5012_v6, 16  ;;  %v2269_v25 = vshll.u32 %v5012_v6, 16 }
 0x132   : > { %v2299_v12 = vshll.u32 %v6170_v60, 16 }
 0x133   : > { %v2271_v14 = vrot.slane %v2269_v25, 5  ;;  %v6173_v25 = vld [vmem:[%s6238_s22 + $0xa4] sm:$0x1] }
 0x134   : > { %5767 = vmatmul.mubr.msk.bf16.vlgmr.msra.gmra.mrb[0].mxu0 %vm631_vm3, %v5305_v46  ;;  %v2205_v46 = vrot.slane %v2203_v35, 5  ;;  %v5015_v35 = vld [vmem:[%s6238_s22 + $0x9c] sm:$0xf]  ;;  %v7826_v6 = vrot.slane %v2299_v12, 5 }
 0x135   : > { %5613 = vmatmul.mubr.msk.bf16.gmra.mrb[16].mxu1 %vm631_vm3, %v6116_v30  ;;  %5770 = vmatprep.mubr.msk.bf16.mxu0 %vm631_vm3, %v5306_v9  ;;  %v2213_v30 = vshll.u32 %v6167_v17, 16  ;;  %v2242_v9 = vshrl.u32 %v5009_v47, 16  ;;  %v2293_v47 = vshll.u32 %v5015_v35, 16  ;;  %v6171_v17 = vld [vmem:[%s6238_s22 + $0x8c] sm:$0x1] }
 0x136   : > { %5616 = vmatprep.mubr.msk.bf16.mxu1 %vm631_vm3, %v6117_v11  ;;  %v2210_v13 = vor.u32 %v2209_v28, %v2205_v46  ;;  %v6168_v11 = vld [vmem:[%s6238_s22 + $0x88] sm:$0xf]  ;;  %v2206_v7 = vsel %vm6264_vm4, %v2201_v52, %v2205_v46 }
 0x137   : > { %v2251_v19 = vshll.u32 %v6168_v11, 16  ;;  %v2255_v41 = vshrl.u32 %v6168_v11, 16  ;;  %v2215_v0 = vrot.slane %v2213_v30, 5  ;;  %v2244_v36 = vrot.slane %v2242_v9, 4 }
 0x138   : > { %v2211_v39 = vrot.slane %v2210_v13, 4  ;;  %v2261_v30 = vshll.u32 %v6171_v17, 16  ;;  %v2268_v9 = vrot.slane %v2266_v23, 4  ;;  %v2295_v11 = vrot.slane %v2293_v47, 5 }
 0x139   : > { %v7803_v24 = vrot.slane %v2251_v19, 5  ;;  %v2257_v49 = vrot.slane %v2255_v41, 4  ;;  %v6122_v19 = vld [vmem:[%s6238_s22 + $0xc0] sm:$0xff]  }
 0x13a   : > { %v2216_v46 = vsel %vm6264_vm4, %v2211_v39, %v2215_v0  ;;  %v5018_v39 = vld [vmem:[%s6238_s22 + $0xa8] sm:$0xf] }
 0x13b   : > { %v2258_v13 = vor.u32 %v2257_v49, %v7803_v24  ;;  %v5036_v41 = vcombine.low %v2206_v7, %v2216_v46  ;;  %v2309_v7 = vshll.u32 %v6173_v25, 16  ;;  %v2317_v45 = vshll.u32 %v5018_v39, 16 }
 0x13c   : > { %5771 = vmatmul.mubr.msk.bf16.gmra.mrb[4].mxu0 %vm631_vm3, %v5307_v61  ;;  %v6169_v61 = vld [vmem:[%s6238_s22 + $0x94] sm:$0xf] }
 0x13d   : > { %5617 = vmatmul.mubr.msk.bf16.gmra.mrb[20].mxu1 %vm631_vm3, %v6118_v51  ;;  %5774 = vmatprep.mubr.msk.bf16.mxu0 %vm631_vm3, %v5308_v10  ;;  %v2247_v10 = vrot.slane %v2245_v18, 5  ;;  %v2275_v51 = vshll.u32 %v6169_v61, 16  ;;  %v2279_v28 = vshrl.u32 %v6169_v61, 16  ;;  %v2259_v0 = vrot.slane %v2258_v13, 4 }
 0x13e   : > { %5620 = vmatprep.mubr.msk.bf16.mxu1 %vm631_vm3, %v6119_v21  ;;  %v2290_v21 = vshrl.u32 %v5015_v35, 16  ;;  %v6172_v35 = vld [vmem:[%s6238_s22 + $0x98] sm:$0x1]  ;;  %v2314_v61 = vshrl.u32 %v5018_v39, 16  ;;  %v5024_v39 = vld [vmem:[%s6238_s22 + $0xc0] sm:$0xf] }
 0x13f   : > { %v2248_v15 = vor.u32 %v2247_v10, %v2244_v36  ;;  %v7823_v26 = vrot.slane %v2275_v51, 5  ;;  %v2263_v36 = vrot.slane %v2261_v30, 5  ;;  %v2272_v10 = vor.u32 %v2271_v14, %v2268_v9  ;;  %v5021_v51 = vld [vmem:[%s6238_s22 + $0xb4] sm:$0xf] }
 0x140   : > { %v2292_v18 = vrot.slane %v2290_v21, 4  ;;  %v2327_v21 = vshrl.u32 %v6174_v27, 16  ;;  %v2338_v20 = vshrl.u32 %v5021_v51, 16  ;;  %v2341_v42 = vshll.u32 %v5021_v51, 16 }
 0x141   : > { %v2249_v52 = vrot.slane %v2248_v15, 4  ;;  %v2264_v46 = vsel %vm6264_vm4, %v2259_v0, %v2263_v36  ;;  %v2273_v15 = vrot.slane %v2272_v10, 4  ;;  %v2311_v30 = vrot.slane %v2309_v7, 5 }
 0x142   : > { %v2296_v23 = vor.u32 %v2295_v11, %v2292_v18  ;;  %v2316_v9 = vrot.slane %v2314_v61, 4  ;;  %v2329_v11 = vrot.slane %v2327_v21, 4  ;;  %v6178_v61 = vld [vmem:[%s6238_s22 + $0xbc] sm:$0x1] }
 0x143   : > { %v2254_v47 = vsel %vm6264_vm4, %v2249_v52, %v7803_v24  ;;  %v2278_v0 = vsel %vm6264_vm4, %v2273_v15, %v7823_v26  ;;  %v2357_v22 = vshll.u32 %v6178_v61, 16 }
 0x144   : > { %5775 = vmatmul.mubr.msk.bf16.gmra.mrb[8].mxu0 %vm631_vm3, %v5309_v40  ;;  %v2303_v40 = vshrl.u32 %v6170_v60, 16  ;;  %v2297_v17 = vrot.slane %v2296_v23, 4  ;;  %v5038_v24 = vcombine.low %v2254_v47, %v2264_v46 }
 0x145   : > { %5621 = vmatmul.mubr.msk.bf16.gmra.mrb[24].mxu1 %vm631_vm3, %v6120_v2  ;;  %5778 = vmatprep.mubr.msk.bf16.mxu0 %vm631_vm3, %v5310_v54  ;;  %v2281_v54 = vrot.slane %v2279_v28, 4 }
 0x146   : > { %5624 = vmatprep.mubr.msk.bf16.mxu1 %vm631_vm3, %v6121_v34  ;;  %v2305_v2 = vrot.slane %v2303_v40, 4  ;;  %v2285_v34 = vshll.u32 %v6172_v35, 16  ;;  %v2302_v10 = vsel %vm6264_vm4, %v2297_v17, %v7826_v6  ;;  %v2383_v17 = vrot.slane %v2381_v57, 5 }
 0x147   : > { %v2282_v49 = vor.u32 %v2281_v54, %v7823_v26  ;;  %v2319_v54 = vrot.slane %v2317_v45, 5  ;;  %v6176_v26 = vld [vmem:[%s6238_s22 + $0xb0] sm:$0x1] }
 0x148   : > { %v2306_v28 = vor.u32 %v2305_v2, %v7826_v6  ;;  %v2287_v60 = vrot.slane %v2285_v34, 5  ;;  %v2333_v35 = vshll.u32 %v6176_v26, 16  ;;  %v2362_v34 = vshrl.u32 %v5024_v39, 16 }
 0x149   : > { %v2283_v13 = vrot.slane %v2282_v49, 4  ;;  %v2320_v38 = vor.u32 %v2319_v54, %v2316_v9  ;;  %v2365_v6 = vshll.u32 %v5024_v39, 16  ;;  %v6177_v49 = vld [vmem:[%s6238_s22 + $0xc4] sm:$0xf] }
 0x14a   : > { %v2307_v14 = vrot.slane %v2306_v28, 4  ;;  %v2371_v23 = vshll.u32 %v6177_v49, 16  ;;  %v2375_v25 = vshrl.u32 %v6177_v49, 16  ;;  %v2335_v45 = vrot.slane %v2333_v35, 5 }
 0x14b   : > { %v2288_v36 = vsel %vm6264_vm4, %v2283_v13, %v2287_v60  ;;  %v2321_v51 = vrot.slane %v2320_v38, 4  ;;  %v2359_v60 = vrot.slane %v2357_v22, 5 }
 0x14c   : > { %5779 = vmatmul.mubr.msk.bf16.gmra.mrb[12].mxu0 %vm631_vm3, %v5311_v53  ;;  %v2323_v53 = vshll.u32 %v6174_v27, 16  ;;  %v2312_v59 = vsel %vm6264_vm4, %v2307_v14, %v2311_v30  ;;  %v5039_v44 = vcombine.low %v2278_v0, %v2288_v36  ;;  %v2364_v27 = vrot.slane %v2362_v34, 4 }
 0x14d   : > { %5625 = vmatmul.mubr.msk.bf16.gmra.mrb[28].mxu1 %vm631_vm3, %v6122_v19  ;;  %5782 = vmatprep.mubr.msk.bf16.mxu0 %vm631_vm3, %v5312_v33  ;;  %v6175_v33 = vld [vmem:[%s6238_s22 + $0xb8] sm:$0xf]  ;;  %v2340_v19 = vrot.slane %v2338_v20, 4  ;;  %v2373_v21 = vrot.slane %v2371_v23, 5  ;;  %v2377_v47 = vrot.slane %v2375_v25, 4 }
 0x14e   : > { %5646 = vmatprep.mubr.msk.bf16.mxu1 %vm631_vm3, %v5036_v41  ;;  %v2347_v12 = vshll.u32 %v6175_v33, 16  ;;  %v2351_v40 = vshrl.u32 %v6175_v33, 16  ;;  %v2325_v18 = vrot.slane %v2323_v53, 5  ;;  %v2343_v41 = vrot.slane %v2341_v42, 5 }
 0x14f   : > { %v2367_v53 = vrot.slane %v2365_v6, 5 }
 0x150   : > { %v2349_v52 = vrot.slane %v2347_v12, 5  ;;  %v2353_v2 = vrot.slane %v2351_v40, 4  ;;  %v2326_v20 = vsel %vm6264_vm4, %v2321_v51, %v2325_v18  ;;  %v2378_v12 = vor.u32 %v2377_v47, %v2373_v21 }
 0x151   : > { %v2368_v33 = vor.u32 %v2367_v53, %v2364_v27 }
 0x152   : > { %v2354_v7 = vor.u32 %v2353_v2, %v2349_v52  ;;  %v2379_v13 = vrot.slane %v2378_v12, 4 }
 0x153   : > { %v2369_v40 = vrot.slane %v2368_v33, 4 }
 0x154   : > { %5783 = vmatmul.mubr.msk.bf16.gmra.mrb[16].mxu0 %vm631_vm3, %v5313_v37  ;;  %v2330_v37 = vor.u32 %v2329_v11, %v2325_v18  ;;  %v2355_v15 = vrot.slane %v2354_v7, 4  ;;  %v2384_v9 = vsel %vm6264_vm4, %v2379_v13, %v2383_v17 }
 0x155   : > { %5647 = vmatmul.mubr.msk.bf16.vlgmr.msra.gmra.mrb[16].mxu1 %vm631_vm3, %v7632_v1  ;;  %5786 = vmatprep.mubr.msk.bf16.mxu0 %vm631_vm3, %v5314_v3  ;;  %v2344_v1 = vor.u32 %v2343_v41, %v2340_v19  ;;  %v5040_v3 = vcombine.low %v2302_v10, %v2312_v59  ;;  %v2374_v30 = vsel %vm6264_vm4, %v2369_v40, %v2373_v21 }
 0x156   : > { %5650 = vmatprep.mubr.msk.bf16.mxu1 %vm631_vm3, %v5038_v24  ;;  %v2331_v28 = vrot.slane %v2330_v37, 4  ;;  %v2360_v48 = vsel %vm6264_vm4, %v2355_v15, %v2359_v60  ;;  %v5043_v14 = vcombine.low %v2374_v30, %v2384_v9 }
 0x157   : > { %v2345_v46 = vrot.slane %v2344_v1, 4 }
 0x158   : > { %v2336_v42 = vsel %vm6264_vm4, %v2331_v28, %v2335_v45 }
 0x159   : > { %v5041_v62 = vcombine.low %v2326_v20, %v2336_v42 }
 0x15c   : > { %5787 = vmatmul.mubr.msk.bf16.gmra.mrb[20].mxu0 %vm631_vm3, %v5315_v8  ;;  %v2350_v8 = vsel %vm6264_vm4, %v2345_v46, %v2349_v52 }
 0x15d   : > { %5651 = vmatmul.mubr.msk.bf16.gmra.mrb[20].mxu1 %vm631_vm3, %v5039_v44  ;;  %5790 = vmatprep.mubr.msk.bf16.mxu0 %vm631_vm3, %v5316_v56  ;;  %v5042_v56 = vcombine.low %v2350_v8, %v2360_v48 }
 0x15e   : > { %5654 = vmatprep.mubr.msk.bf16.mxu1 %vm631_vm3, %v5040_v3 }
 0x164   : > { %5791 = vmatmul.mubr.msk.bf16.gmra.mrb[24].mxu0 %vm631_vm3, %v5317_v43 }
 0x165   : > { %5655 = vmatmul.mubr.msk.bf16.gmra.mrb[24].mxu1 %vm631_vm3, %v5041_v62  ;;  %5794 = vmatprep.mubr.msk.bf16.mxu0 %vm631_vm3, %v5318_v50 }
 0x166   : > { %5658 = vmatprep.mubr.msk.bf16.mxu1 %vm631_vm3, %v5042_v56 }
 0x16c   : > { %5795 = vmatmul.mubr.msk.bf16.gmra.mrb[28].mxu0 %vm631_vm3, %v5319_v29 }
 0x16d   : > { %5659 = vmatmul.mubr.msk.bf16.gmra.mrb[28].mxu1 %vm631_vm3, %v5043_v14 }
 0x1e8   : > { %v5598_v63 = vpop.f32.mrb[0].mxu1 }
 0x1e9   : > { %v1794_v4 = vpop.f32.mrb[1].mxu1 }
 0x1ea   : > { %v5599_v43 = vpop.f32.mrb[2].mxu1 }
 0x1eb   : > { %v1797_v16 = vpop.f32.mrb[3].mxu1 }
 0x1f0   : > { %v5602_v58 = vpop.f32.mrb[4].mxu1 }
 0x1f1   : > { %v1810_v50 = vpop.f32.mrb[5].mxu1 }
 0x1f2   : > { %v5603_v54 = vpop.f32.mrb[6].mxu1 }
 0x1f3   : > { %v1813_v18 = vpop.f32.mrb[7].mxu1 }
 0x1f8   : > { %v5606_v11 = vpop.f32.mrb[8].mxu1 }
 0x1f9   : > { %v1826_v32 = vpop.f32.mrb[9].mxu1 }
 0x1fa   : > { %v5607_v24 = vpop.f32.mrb[10].mxu1 }
 0x1fb   : > { %v1829_v19 = vpop.f32.mrb[11].mxu1 }
 0x200   : > { %v5610_v41 = vpop.f32.mrb[12].mxu1 }
 0x201   : > { %v1842_v52 = vpop.f32.mrb[13].mxu1 }
 0x202   : > { %v5611_v5 = vpop.f32.mrb[14].mxu1 }
 0x203   : > { %v1845_v55 = vpop.f32.mrb[15].mxu1 }
 0x207   : > { %v5768_v29 = vpop.f32.mrb[0].mxu0 }
 0x208   : > { %v5800_v2 = vadd.f32 %v5768_v29, %v5598_v63  ;;  %v4545_v39 = vpop.f32.mrb[1].mxu0 }
 0x209   : > { %v5801_v0 = vadd.f32 %v4545_v39, %v1794_v4  ;;  %v5769_v36 = vpop.f32.mrb[2].mxu0 }
 0x20a   : > { %4707 = vst.msk [vmem:[%s7918_s14 + $0x10] sm:$0xff] %vm4704_vm8, %v5800_v2  ;;  %v5802_v10 = vadd.f32 %v5769_v36, %v5599_v43  ;;  %v4548_v59 = vpop.f32.mrb[3].mxu0 }
 0x20b   : > { %4705 = vst.msk [vmem:[%s7918_s14] sm:$0xff] %vm4704_vm8, %v5801_v0  ;;  %v5803_v38 = vadd.f32 %v4548_v59, %v1797_v16 }
 0x20c   : > { %4708 = vst.msk [vmem:[%s7918_s14 + $0x18] sm:$0xff] %vm4704_vm8, %v5802_v10 }
 0x20d   : > { %4706 = vst.msk [vmem:[%s7918_s14 + $0x8] sm:$0xff] %vm4704_vm8, %v5803_v38 }
 0x20f   : > { %v5772_v37 = vpop.f32.mrb[4].mxu0 }
 0x210   : > { %v5804_v26 = vadd.f32 %v5772_v37, %v5602_v58  ;;  %v4561_v35 = vpop.f32.mrb[5].mxu0 }
 0x211   : > { %v5805_v34 = vadd.f32 %v4561_v35, %v1810_v50  ;;  %v5773_v6 = vpop.f32.mrb[6].mxu0 }
 0x212   : > { %4711 = vst.msk [vmem:[%s7918_s14 + $0x30] sm:$0xff] %vm4704_vm8, %v5804_v26  ;;  %v5806_v49 = vadd.f32 %v5773_v6, %v5603_v54  ;;  %v4564_v23 = vpop.f32.mrb[7].mxu0 }
 0x213   : > { %4709 = vst.msk [vmem:[%s7918_s14 + $0x20] sm:$0xff] %vm4704_vm8, %v5805_v34  ;;  %v5807_v25 = vadd.f32 %v4564_v23, %v1813_v18 }
 0x214   : > { %4712 = vst.msk [vmem:[%s7918_s14 + $0x38] sm:$0xff] %vm4704_vm8, %v5806_v49 }
 0x215   : > { %4710 = vst.msk [vmem:[%s7918_s14 + $0x28] sm:$0xff] %vm4704_vm8, %v5807_v25 }
 0x217   : > { %v5776_v1 = vpop.f32.mrb[8].mxu0 }
 0x218   : > { %v5808_v7 = vadd.f32 %v5776_v1, %v5606_v11  ;;  %v4577_v61 = vpop.f32.mrb[9].mxu0 }
 0x219   : > { %v5809_v22 = vadd.f32 %v4577_v61, %v1826_v32  ;;  %v5777_v44 = vpop.f32.mrb[10].mxu0 }
 0x21a   : > { %4715 = vst.msk [vmem:[%s7918_s14 + $0x50] sm:$0xff] %vm4704_vm8, %v5808_v7  ;;  %v5810_v3 = vadd.f32 %v5777_v44, %v5607_v24  ;;  %v4580_v51 = vpop.f32.mrb[11].mxu0 }
 0x21b   : > { %4713 = vst.msk [vmem:[%s7918_s14 + $0x40] sm:$0xff] %vm4704_vm8, %v5809_v22  ;;  %v5811_v28 = vadd.f32 %v4580_v51, %v1829_v19 }
 0x21c   : > { %4716 = vst.msk [vmem:[%s7918_s14 + $0x58] sm:$0xff] %vm4704_vm8, %v5810_v3 }
 0x21d   : > { %4714 = vst.msk [vmem:[%s7918_s14 + $0x48] sm:$0xff] %vm4704_vm8, %v5811_v28 }
 0x21f   : > { %v5780_v45 = vpop.f32.mrb[12].mxu0 }
 0x220   : > { %v5812_v27 = vadd.f32 %v5780_v45, %v5610_v41  ;;  %v4593_v53 = vpop.f32.mrb[13].mxu0 }
 0x221   : > { %v5813_v21 = vadd.f32 %v4593_v53, %v1842_v52  ;;  %v5781_v47 = vpop.f32.mrb[14].mxu0 }
 0x222   : > { %4719 = vst.msk [vmem:[%s7918_s14 + $0x70] sm:$0xff] %vm4704_vm8, %v5812_v27  ;;  %v5814_v46 = vadd.f32 %v5781_v47, %v5611_v5  ;;  %v4596_v15 = vpop.f32.mrb[15].mxu0 }
 0x223   : > { %4717 = vst.msk [vmem:[%s7918_s14 + $0x60] sm:$0xff] %vm4704_vm8, %v5813_v21  ;;  %v5815_v60 = vadd.f32 %v4596_v15, %v1845_v55 }
 0x224   : > { %4720 = vst.msk [vmem:[%s7918_s14 + $0x78] sm:$0xff] %vm4704_vm8, %v5814_v46 }
 0x225   : > { %4718 = vst.msk [vmem:[%s7918_s14 + $0x68] sm:$0xff] %vm4704_vm8, %v5815_v60 }
 0x227   : > { %v5784_v20 = vpop.f32.mrb[16].mxu0 }
 0x228   : > { %v5648_v42 = vpop.f32.mrb[16].mxu1  ;;  %v4609_v33 = vpop.f32.mrb[17].mxu0 }
 0x229   : > { %v5816_v12 = vadd.f32 %v5784_v20, %v5648_v42  ;;  %v2584_v31 = vpop.f32.mrb[17].mxu1  ;;  %v5785_v57 = vpop.f32.mrb[18].mxu0 }
 0x22a   : > { %v5817_v8 = vadd.f32 %v4609_v33, %v2584_v31  ;;  %v5649_v48 = vpop.f32.mrb[18].mxu1  ;;  %v4612_v62 = vpop.f32.mrb[19].mxu0 }
 0x22b   : > { %4723 = vst.msk [vmem:[%s7918_s14 + $0x90] sm:$0xff] %vm4704_vm8, %v5816_v12  ;;  %v5818_v56 = vadd.f32 %v5785_v57, %v5649_v48  ;;  %v2587_v40 = vpop.f32.mrb[19].mxu1 }
 0x22c   : > { %4721 = vst.msk [vmem:[%s7918_s14 + $0x80] sm:$0xff] %vm4704_vm8, %v5817_v8  ;;  %v5819_v13 = vadd.f32 %v4612_v62, %v2587_v40 }
 0x22d   : > { %4724 = vst.msk [vmem:[%s7918_s14 + $0x98] sm:$0xff] %vm4704_vm8, %v5818_v56 }
 0x22e   : > { %4722 = vst.msk [vmem:[%s7918_s14 + $0x88] sm:$0xff] %vm4704_vm8, %v5819_v13 }
 0x22f   : > { %v5788_v17 = vpop.f32.mrb[20].mxu0 }
 0x230   : > { %v5652_v30 = vpop.f32.mrb[20].mxu1  ;;  %v4625_v9 = vpop.f32.mrb[21].mxu0 }
 0x231   : > { %v5820_v14 = vadd.f32 %v5788_v17, %v5652_v30  ;;  %v2600_v63 = vpop.f32.mrb[21].mxu1  ;;  %v5789_v4 = vpop.f32.mrb[22].mxu0 }
 0x232   : > { %v5821_v43 = vadd.f32 %v4625_v9, %v2600_v63  ;;  %v5653_v16 = vpop.f32.mrb[22].mxu1  ;;  %v4628_v58 = vpop.f32.mrb[23].mxu0 }
 0x233   : > { %4727 = vst.msk [vmem:[%s7918_s14 + $0xb0] sm:$0xff] %vm4704_vm8, %v5820_v14  ;;  %v5822_v50 = vadd.f32 %v5789_v4, %v5653_v16  ;;  %v2603_v54 = vpop.f32.mrb[23].mxu1 }
 0x234   : > { %4725 = vst.msk [vmem:[%s7918_s14 + $0xa0] sm:$0xff] %vm4704_vm8, %v5821_v43  ;;  %v5823_v18 = vadd.f32 %v4628_v58, %v2603_v54 }
 0x235   : > { %4728 = vst.msk [vmem:[%s7918_s14 + $0xb8] sm:$0xff] %vm4704_vm8, %v5822_v50 }
 0x236   : > { %4726 = vst.msk [vmem:[%s7918_s14 + $0xa8] sm:$0xff] %vm4704_vm8, %v5823_v18 }
 0x237   : > { %v5792_v11 = vpop.f32.mrb[24].mxu0 }
 0x238   : > { %v5656_v32 = vpop.f32.mrb[24].mxu1  ;;  %v4641_v24 = vpop.f32.mrb[25].mxu0 }
 0x239   : > { %v5824_v19 = vadd.f32 %v5792_v11, %v5656_v32  ;;  %v2616_v41 = vpop.f32.mrb[25].mxu1  ;;  %v5793_v52 = vpop.f32.mrb[26].mxu0 }
 0x23a   : > { %v5825_v5 = vadd.f32 %v4641_v24, %v2616_v41  ;;  %v5657_v55 = vpop.f32.mrb[26].mxu1  ;;  %v4644_v29 = vpop.f32.mrb[27].mxu0 }
 0x23b   : > { %4731 = vst.msk [vmem:[%s7918_s14 + $0xd0] sm:$0xff] %vm4704_vm8, %v5824_v19  ;;  %v5826_v2 = vadd.f32 %v5793_v52, %v5657_v55  ;;  %v2619_v39 = vpop.f32.mrb[27].mxu1 }
 0x23c   : > { %4729 = vst.msk [vmem:[%s7918_s14 + $0xc0] sm:$0xff] %vm4704_vm8, %v5825_v5  ;;  %v5827_v0 = vadd.f32 %v4644_v29, %v2619_v39 }
 0x23d   : > { %4732 = vst.msk [vmem:[%s7918_s14 + $0xd8] sm:$0xff] %vm4704_vm8, %v5826_v2 }
 0x23e   : > { %4730 = vst.msk [vmem:[%s7918_s14 + $0xc8] sm:$0xff] %vm4704_vm8, %v5827_v0 }
 0x23f   : > { %v5796_v36 = vpop.f32.mrb[28].mxu0 }
 0x240   : > { %v5660_v10 = vpop.f32.mrb[28].mxu1  ;;  %v4657_v59 = vpop.f32.mrb[29].mxu0 }
 0x241   : > { %v5828_v38 = vadd.f32 %v5796_v36, %v5660_v10  ;;  %v2632_v37 = vpop.f32.mrb[29].mxu1  ;;  %v5797_v26 = vpop.f32.mrb[30].mxu0 }
 0x242   : > { %v5829_v35 = vadd.f32 %v4657_v59, %v2632_v37  ;;  %v5661_v34 = vpop.f32.mrb[30].mxu1  ;;  %v4660_v6 = vpop.f32.mrb[31].mxu0 }
 0x243   : > { %4735 = vst.msk [vmem:[%s7918_s14 + $0xf0] sm:$0xff] %vm4704_vm8, %v5828_v38  ;;  %v5830_v49 = vadd.f32 %v5797_v26, %v5661_v34  ;;  %v2635_v23 = vpop.f32.mrb[31].mxu1 }
 0x244   : > { %4733 = vst.msk [vmem:[%s7918_s14 + $0xe0] sm:$0xff] %vm4704_vm8, %v5829_v35  ;;  %v5831_v25 = vadd.f32 %v4660_v6, %v2635_v23 }
 0x245   : > { %4736 = vst.msk [vmem:[%s7918_s14 + $0xf8] sm:$0xff] %vm4704_vm8, %v5830_v49 }
 0x246   : > { %4734 = vst.msk [vmem:[%s7918_s14 + $0xe8] sm:$0xff] %vm4704_vm8, %v5831_v25 }
 0x247 PF: > { %s12_s9 = sadd.s32 1, %s6186_s9  }
 0x248   : > { %p9_p4 = scmp.ge.s32.totalorder %s12_s9, 4  }
 0x24a   :  { %11 = sbr.rel (!%p9_p4) target bundleno = 1 (0x1), region = 68 }

</bundles_post_ra>
